<compile_context>
chip_gen: v6e
topology: v6e:2x2x1
jax: 0.10.0
libtpu: 0.0.40
codegen_flags: <defaults>
</compile_context>

<pallas_src>
import functools

import jax
import jax.numpy as jnp
from jax.experimental import pallas as pl
from jax.experimental.pallas import tpu as pltpu


# ----------------------------------------------------------------------------
# Pallas kernel: fused (multi-input) dilated 3x3 conv + folded-BN bias + ReLU,
# computed as ONE MXU contraction per image.
# ----------------------------------------------------------------------------
def _rebnconv_kernel(*args, n_in, taps, m, relu):
    """args = x_refs (n_in) : (1, Cin_i, Lpad)  channel-major zero-padded image,
                              flattened over (Hp+1, Wp) rows.
              w_ref         : (Cout, K)  K = 9 * sum(Cin_i), BN scale folded,
                              columns ordered [input][dy][dx][cin].
              b_ref         : (Cout, 1)  folded BN bias.
              o_ref         : (1, Cout, m)  output, m = H * Wp (lane-dense).
    """
    x_refs = args[:n_in]
    w_ref, b_ref, o_ref = args[n_in], args[n_in + 1], args[n_in + 2]

    parts = []
    for xr in x_refs:
        slab = xr[0]                              # (Cin_i, Lpad), loaded once
        for off in taps:                          # 9 static tap offsets
            parts.append(slab[:, off:off + m])    # (Cin_i, m) shifted window
    patches = jnp.concatenate(parts, axis=0)      # (K, m) im2col slab in VMEM

    acc = jnp.dot(w_ref[...], patches, preferred_element_type=jnp.float32)
    acc = acc + b_ref[...]                        # eval-mode BN folded into bias
    if relu:
        acc = jnp.maximum(acc, 0.0)
    o_ref[0] = acc.astype(o_ref.dtype)            # (Cout, m): unmasked lane-dense store


def rebnconv(inputs, p, dirate=1, relu=True):
    """Fused REBNCONV on a list of NCHW inputs.

    A multi-element list implements torch.cat((a, b), 1) fused into the conv
    (the weight matrix was pre-merged over the concat halves).
    """
    d = int(dirate)
    N, _, H, W = inputs[0].shape
    Hp, Wp = H + 2 * d, W + 2 * d
    m = H * Wp                          # rows computed per image (cols W..Wp-1 = garbage, sliced off)
    lpad = (Hp + 1) * Wp                # one extra zero row so the last tap window fits
    cout, K = p["w"].shape

    flat = []
    for x in inputs:
        c = x.shape[1]
        # Single pad (rows padded (d, d+1)) -> flatten.  No second pad needed.
        xp = jnp.pad(x.astype(jnp.float32), ((0, 0), (0, 0), (d, d + 1), (d, d)))
        flat.append(xp.reshape(N, c, lpad))

    # Flat tap offset: output pixel j = h*Wp + w reads slab[:, j + dy*d*Wp + dx*d].
    taps = tuple(dy * d * Wp + dx * d for dy in range(3) for dx in range(3))
    kernel = functools.partial(_rebnconv_kernel, n_in=len(inputs), taps=taps,
                               m=m, relu=relu)

    bytes_accessed = int(sum(f.size for f in flat) * 4
                         + (p["w"].size + p["b"].size) * 4
                         + N * m * cout * 4)
    cost = pl.CostEstimate(flops=2 * N * m * K * cout, transcendentals=0,
                           bytes_accessed=bytes_accessed)

    in_specs = (
        [pl.BlockSpec((1, f.shape[1], lpad), lambda n: (n, 0, 0)) for f in flat]
        + [pl.BlockSpec((cout, K), lambda n: (0, 0)),
           pl.BlockSpec((cout, 1), lambda n: (0, 0))]
    )
    out = pl.pallas_call(
        kernel,
        out_shape=jax.ShapeDtypeStruct((N, cout, m), jnp.float32),
        grid=(N,),
        in_specs=in_specs,
        out_specs=pl.BlockSpec((1, cout, m), lambda n: (n, 0, 0)),
        compiler_params=pltpu.CompilerParams(dimension_semantics=("parallel",)),
        cost_estimate=cost,
    )(*flat, p["w"], p["b"])

    # (N, Cout, H*Wp) -> NCHW; columns W..Wp-1 are padding garbage.
    return out.reshape(N, cout, H, Wp)[:, :, :, :W]


# ----------------------------------------------------------------------------
# Plain-JAX glue (NCHW): 2x2 ceil-mode maxpool, bilinear (align_corners=False)
# TODO(synk): fuse these into the producing / consuming Pallas kernels.
# ----------------------------------------------------------------------------
def maxpool2x2_ceil(x):
    N, C, H, W = x.shape
    Ho, Wo = -(-H // 2), -(-W // 2)
    ph, pw = Ho * 2 - H, Wo * 2 - W
    if ph or pw:
        x = jnp.pad(x, ((0, 0), (0, 0), (0, ph), (0, pw)),
                    constant_values=-jnp.inf)
    return x.reshape(N, C, Ho, 2, Wo, 2).max(axis=(3, 5))


def bilinear_resize(x, out_h, out_w):
    N, C, H, W = x.shape
    if (H, W) == (out_h, out_w):
        return x
    sh, sw = H / out_h, W / out_w
    ys = jnp.maximum((jnp.arange(out_h, dtype=jnp.float32) + 0.5) * sh - 0.5, 0.0)
    y0 = jnp.minimum(jnp.floor(ys).astype(jnp.int32), H - 1)
    y1 = jnp.minimum(y0 + 1, H - 1)
    wy = ys - y0.astype(jnp.float32)
    xs = jnp.maximum((jnp.arange(out_w, dtype=jnp.float32) + 0.5) * sw - 0.5, 0.0)
    x0 = jnp.minimum(jnp.floor(xs).astype(jnp.int32), W - 1)
    x1 = jnp.minimum(x0 + 1, W - 1)
    wx = xs - x0.astype(jnp.float32)
    top, bot = x[:, :, y0, :], x[:, :, y1, :]
    v = top * (1.0 - wy)[None, None, :, None] + bot * wy[None, None, :, None]
    left, right = v[:, :, :, x0], v[:, :, :, x1]
    return left * (1.0 - wx)[None, None, None, :] + right * wx[None, None, None, :]


def upsample_like(src, tar):
    return bilinear_resize(src, tar.shape[2], tar.shape[3])


# ----------------------------------------------------------------------------
# Deterministic parameters: eval-mode BN folded (scale into weights, shift into
# bias); weights pre-reshaped to the kernel's (Cout, K) im2col layout.
# ----------------------------------------------------------------------------
class ParamGen:
    def __init__(self, seed=0):
        self.key = jax.random.PRNGKey(seed)
        self.i = 0

    def next(self):
        self.i += 1
        return jax.random.fold_in(self.key, self.i)


def make_rebnconv_params(pg, in_chs, out_ch):
    total = sum(in_chs)
    fan = 9 * total
    w = jax.random.normal(pg.next(), (3, 3, total, out_ch), jnp.float32) * (fan ** -0.5)
    b = 0.01 * jax.random.normal(pg.next(), (out_ch,), jnp.float32)
    gamma = 1.0 + 0.1 * jax.random.normal(pg.next(), (out_ch,), jnp.float32)
    beta = 0.1 * jax.random.normal(pg.next(), (out_ch,), jnp.float32)
    mean = 0.1 * jax.random.normal(pg.next(), (out_ch,), jnp.float32)
    var = 1.0 + 0.1 * jnp.abs(jax.random.normal(pg.next(), (out_ch,), jnp.float32))
    scale = gamma / jnp.sqrt(var + 1e-5)
    w_folded = w * scale[None, None, None, :]                 # fold BN scale
    bias = (beta + scale * (b - mean)).reshape(out_ch, 1)     # folded BN bias
    # (Cout, K) with K ordered [input][dy][dx][cin] — must match the kernel's
    # patch-slab stacking order.  Splitting per concat-input fuses torch.cat.
    pieces, start = [], 0
    for c in in_chs:
        wi = w_folded[:, :, start:start + c, :]               # (3, 3, c, Cout)
        pieces.append(jnp.transpose(wi, (3, 0, 1, 2)).reshape(out_ch, 9 * c))
        start += c
    return {"w": jnp.concatenate(pieces, axis=1), "b": bias}


def make_rsu5(seed=0, in_ch=3, mid_ch=12, out_ch=3):
    pg = ParamGen(seed)
    return {
        "in":  make_rebnconv_params(pg, (in_ch,), out_ch),
        "c1":  make_rebnconv_params(pg, (out_ch,), mid_ch),
        "c2":  make_rebnconv_params(pg, (mid_ch,), mid_ch),
        "c3":  make_rebnconv_params(pg, (mid_ch,), mid_ch),
        "c4":  make_rebnconv_params(pg, (mid_ch,), mid_ch),
        "c5":  make_rebnconv_params(pg, (mid_ch,), mid_ch),
        "c4d": make_rebnconv_params(pg, (mid_ch, mid_ch), mid_ch),
        "c3d": make_rebnconv_params(pg, (mid_ch, mid_ch), mid_ch),
        "c2d": make_rebnconv_params(pg, (mid_ch, mid_ch), out_ch),  # placeholder (fixed below)
        "c1d": make_rebnconv_params(pg, (mid_ch, mid_ch), out_ch),
    }


def _make_rsu5_params(seed=0, in_ch=3, mid_ch=12, out_ch=3):
    # Correct channel plan matching the PyTorch RSU5 (c2d outputs mid_ch).
    pg = ParamGen(seed)
    return {
        "in":  make_rebnconv_params(pg, (in_ch,), out_ch),
        "c1":  make_rebnconv_params(pg, (out_ch,), mid_ch),
        "c2":  make_rebnconv_params(pg, (mid_ch,), mid_ch),
        "c3":  make_rebnconv_params(pg, (mid_ch,), mid_ch),
        "c4":  make_rebnconv_params(pg, (mid_ch,), mid_ch),
        "c5":  make_rebnconv_params(pg, (mid_ch,), mid_ch),
        "c4d": make_rebnconv_params(pg, (mid_ch, mid_ch), mid_ch),
        "c3d": make_rebnconv_params(pg, (mid_ch, mid_ch), mid_ch),
        "c2d": make_rebnconv_params(pg, (mid_ch, mid_ch), mid_ch),
        "c1d": make_rebnconv_params(pg, (mid_ch, mid_ch), out_ch),
    }


# ----------------------------------------------------------------------------
# RSU5 forward (matches the PyTorch module, eval mode), NCHW throughout.
# ----------------------------------------------------------------------------
def rsu5_forward(x, p):
    hxin = rebnconv([x], p["in"], 1)
    hx1 = rebnconv([hxin], p["c1"], 1)
    hx2 = rebnconv([maxpool2x2_ceil(hx1)], p["c2"], 1)
    hx3 = rebnconv([maxpool2x2_ceil(hx2)], p["c3"], 1)
    hx4 = rebnconv([maxpool2x2_ceil(hx3)], p["c4"], 1)
    hx5 = rebnconv([hx4], p["c5"], 2)

    hx4d = rebnconv([hx5, hx4], p["c4d"], 1)                       # fused cat(hx5, hx4)
    hx3d = rebnconv([upsample_like(hx4d, hx3), hx3], p["c3d"], 1)  # fused cat
    hx2d = rebnconv([upsample_like(hx3d, hx2), hx2], p["c2d"], 1)  # fused cat
    hx1d = rebnconv([upsample_like(hx2d, hx1), hx1], p["c1d"], 1)  # fused cat
    return hx1d + hxin


# ----------------------------------------------------------------------------
if __name__ == "__main__":
    key = jax.random.PRNGKey(0)
    x = jax.random.normal(key, (2, 3, 16, 16), jnp.float32)        # NCHW, like PyTorch
    params = _make_rsu5_params(seed=0, in_ch=3, mid_ch=12, out_ch=3)

    fwd = jax.jit(lambda inp: rsu5_forward(inp, params))
    out = jax.block_until_ready(fwd(x))

    assert out.shape == (2, 3, 16, 16), out.shape
    assert bool(jnp.all(jnp.isfinite(out)))
    print("KERNEL_OK")
</pallas_src>

<mosaic_0001>
module attributes {stable_mosaic.version = 11 : i64} {
  func.func @_rebnconv_kernel(%arg0: i32, %arg1: memref<1x3x342xf32, #tpu.memory_space<vmem>>, %arg2: memref<3x27xf32, #tpu.memory_space<vmem>>, %arg3: memref<3x1xf32, #tpu.memory_space<vmem>>, %arg4: memref<1x3x288xf32, #tpu.memory_space<vmem>>) attributes {dimension_semantics = [#tpu.dimension_semantics<parallel>], iteration_bounds = array<i64: 2>, scalar_prefetch = 0 : i64, scratch_operands = 0 : i64, tpu.core_type = #tpu.core_type<tc>, window_params = [{transform_indices = @transform_0, window_bounds = array<i64: 1, 3, 342>}, {pipeline_mode = #tpu.pipeline_mode<synchronous>, transform_indices = @transform_1, window_bounds = array<i64: 3, 27>}, {pipeline_mode = #tpu.pipeline_mode<synchronous>, transform_indices = @transform_2, window_bounds = array<i64: 3, 1>}, {transform_indices = @transform_3, window_bounds = array<i64: 1, 3, 288>}]} {
    %c0 = arith.constant 0 : index
    %c0_0 = arith.constant 0 : index
    %c0_1 = arith.constant 0 : index
    %0 = vector.load %arg1[%c0, %c0_0, %c0_1] : memref<1x3x342xf32, #tpu.memory_space<vmem>>, vector<1x3x342xf32>
    %1 = vector.shape_cast %0 : vector<1x3x342xf32> to vector<3x342xf32>
    %2 = vector.extract_strided_slice %1 {offsets = [0, 0], sizes = [3, 288], strides = [1, 1]} : vector<3x342xf32> to vector<3x288xf32>
    %3 = vector.extract_strided_slice %1 {offsets = [0, 1], sizes = [3, 288], strides = [1, 1]} : vector<3x342xf32> to vector<3x288xf32>
    %4 = vector.extract_strided_slice %1 {offsets = [0, 2], sizes = [3, 288], strides = [1, 1]} : vector<3x342xf32> to vector<3x288xf32>
    %5 = vector.extract_strided_slice %1 {offsets = [0, 18], sizes = [3, 288], strides = [1, 1]} : vector<3x342xf32> to vector<3x288xf32>
    %6 = vector.extract_strided_slice %1 {offsets = [0, 19], sizes = [3, 288], strides = [1, 1]} : vector<3x342xf32> to vector<3x288xf32>
    %7 = vector.extract_strided_slice %1 {offsets = [0, 20], sizes = [3, 288], strides = [1, 1]} : vector<3x342xf32> to vector<3x288xf32>
    %8 = vector.extract_strided_slice %1 {offsets = [0, 36], sizes = [3, 288], strides = [1, 1]} : vector<3x342xf32> to vector<3x288xf32>
    %9 = vector.extract_strided_slice %1 {offsets = [0, 37], sizes = [3, 288], strides = [1, 1]} : vector<3x342xf32> to vector<3x288xf32>
    %10 = vector.extract_strided_slice %1 {offsets = [0, 38], sizes = [3, 288], strides = [1, 1]} : vector<3x342xf32> to vector<3x288xf32>
    %11 = tpu.concatenate %2, %3, %4, %5, %6, %7, %8, %9, %10 in 0 : vector<3x288xf32>, vector<3x288xf32>, vector<3x288xf32>, vector<3x288xf32>, vector<3x288xf32>, vector<3x288xf32>, vector<3x288xf32>, vector<3x288xf32>, vector<3x288xf32> -> vector<27x288xf32>
    %c0_2 = arith.constant 0 : index
    %c0_3 = arith.constant 0 : index
    %12 = vector.load %arg2[%c0_2, %c0_3] : memref<3x27xf32, #tpu.memory_space<vmem>>, vector<3x27xf32>
    %cst = arith.constant dense<0.000000e+00> : vector<3x288xf32>
    %13 = tpu.matmul %12, %11, %cst {dimension_numbers = #tpu.dot_dimension_numbers<[1], [0], [0], [1], [0, 0, 1, 1], [], []>} : vector<3x27xf32>, vector<27x288xf32>, vector<3x288xf32> -> vector<3x288xf32>
    %c0_4 = arith.constant 0 : index
    %c0_5 = arith.constant 0 : index
    %14 = vector.load %arg3[%c0_4, %c0_5] : memref<3x1xf32, #tpu.memory_space<vmem>>, vector<3x1xf32>
    %15 = vector.broadcast %14 : vector<3x1xf32> to vector<3x288xf32>
    %16 = arith.addf %13, %15 : vector<3x288xf32>
    %cst_6 = arith.constant 0.000000e+00 : f32
    %17 = vector.broadcast %cst_6 : f32 to vector<3x288xf32>
    %18 = arith.maximumf %16, %17 : vector<3x288xf32>
    %c0_7 = arith.constant 0 : index
    %c0_8 = arith.constant 0 : index
    %c0_9 = arith.constant 0 : index
    %19 = vector.load %arg4[%c0_7, %c0_8, %c0_9] : memref<1x3x288xf32, #tpu.memory_space<vmem>>, vector<1x3x288xf32>
    %20 = vector.shape_cast %19 : vector<1x3x288xf32> to vector<3x288xf32>
    %21 = vector.shape_cast %18 : vector<3x288xf32> to vector<1x3x288xf32>
    tpu.vector_store %arg4[%c0_7, %c0_8, %c0_9], %21 {strides = array<i32>} : memref<1x3x288xf32, #tpu.memory_space<vmem>>, vector<1x3x288xf32>,
    return
  }
  func.func @transform_0(%arg0: i32) -> (i32, i32, i32) {
    %c0_i32 = arith.constant 0 : i32
    %c0_i32_0 = arith.constant 0 : i32
    %c0_i32_1 = arith.constant 0 : i32
    return %arg0, %c0_i32, %c0_i32_0 : i32, i32, i32
  }
  func.func @transform_1(%arg0: i32) -> (i32, i32) {
    %c0_i32 = arith.constant 0 : i32
    %c0_i32_0 = arith.constant 0 : i32
    %c0_i32_1 = arith.constant 0 : i32
    return %c0_i32, %c0_i32_0 : i32, i32
  }
  func.func @transform_2(%arg0: i32) -> (i32, i32) {
    %c0_i32 = arith.constant 0 : i32
    %c0_i32_0 = arith.constant 0 : i32
    %c0_i32_1 = arith.constant 0 : i32
    return %c0_i32, %c0_i32_0 : i32, i32
  }
  func.func @transform_3(%arg0: i32) -> (i32, i32, i32) {
    %c0_i32 = arith.constant 0 : i32
    %c0_i32_0 = arith.constant 0 : i32
    %c0_i32_1 = arith.constant 0 : i32
    return %arg0, %c0_i32, %c0_i32_0 : i32, i32, i32
  }
}

module attributes {stable_mosaic.version = 11 : i64} {
  func.func @_rebnconv_kernel(%arg0: i32, %arg1: memref<1x3x342xf32, #tpu.memory_space<vmem>>, %arg2: memref<12x27xf32, #tpu.memory_space<vmem>>, %arg3: memref<12x1xf32, #tpu.memory_space<vmem>>, %arg4: memref<1x12x288xf32, #tpu.memory_space<vmem>>) attributes {dimension_semantics = [#tpu.dimension_semantics<parallel>], iteration_bounds = array<i64: 2>, scalar_prefetch = 0 : i64, scratch_operands = 0 : i64, tpu.core_type = #tpu.core_type<tc>, window_params = [{transform_indices = @transform_0, window_bounds = array<i64: 1, 3, 342>}, {pipeline_mode = #tpu.pipeline_mode<synchronous>, transform_indices = @transform_1, window_bounds = array<i64: 12, 27>}, {pipeline_mode = #tpu.pipeline_mode<synchronous>, transform_indices = @transform_2, window_bounds = array<i64: 12, 1>}, {transform_indices = @transform_3, window_bounds = array<i64: 1, 12, 288>}]} {
    %c0 = arith.constant 0 : index
    %c0_0 = arith.constant 0 : index
    %c0_1 = arith.constant 0 : index
    %0 = vector.load %arg1[%c0, %c0_0, %c0_1] : memref<1x3x342xf32, #tpu.memory_space<vmem>>, vector<1x3x342xf32>
    %1 = vector.shape_cast %0 : vector<1x3x342xf32> to vector<3x342xf32>
    %2 = vector.extract_strided_slice %1 {offsets = [0, 0], sizes = [3, 288], strides = [1, 1]} : vector<3x342xf32> to vector<3x288xf32>
    %3 = vector.extract_strided_slice %1 {offsets = [0, 1], sizes = [3, 288], strides = [1, 1]} : vector<3x342xf32> to vector<3x288xf32>
    %4 = vector.extract_strided_slice %1 {offsets = [0, 2], sizes = [3, 288], strides = [1, 1]} : vector<3x342xf32> to vector<3x288xf32>
    %5 = vector.extract_strided_slice %1 {offsets = [0, 18], sizes = [3, 288], strides = [1, 1]} : vector<3x342xf32> to vector<3x288xf32>
    %6 = vector.extract_strided_slice %1 {offsets = [0, 19], sizes = [3, 288], strides = [1, 1]} : vector<3x342xf32> to vector<3x288xf32>
    %7 = vector.extract_strided_slice %1 {offsets = [0, 20], sizes = [3, 288], strides = [1, 1]} : vector<3x342xf32> to vector<3x288xf32>
    %8 = vector.extract_strided_slice %1 {offsets = [0, 36], sizes = [3, 288], strides = [1, 1]} : vector<3x342xf32> to vector<3x288xf32>
    %9 = vector.extract_strided_slice %1 {offsets = [0, 37], sizes = [3, 288], strides = [1, 1]} : vector<3x342xf32> to vector<3x288xf32>
    %10 = vector.extract_strided_slice %1 {offsets = [0, 38], sizes = [3, 288], strides = [1, 1]} : vector<3x342xf32> to vector<3x288xf32>
    %11 = tpu.concatenate %2, %3, %4, %5, %6, %7, %8, %9, %10 in 0 : vector<3x288xf32>, vector<3x288xf32>, vector<3x288xf32>, vector<3x288xf32>, vector<3x288xf32>, vector<3x288xf32>, vector<3x288xf32>, vector<3x288xf32>, vector<3x288xf32> -> vector<27x288xf32>
    %c0_2 = arith.constant 0 : index
    %c0_3 = arith.constant 0 : index
    %12 = vector.load %arg2[%c0_2, %c0_3] : memref<12x27xf32, #tpu.memory_space<vmem>>, vector<12x27xf32>
    %cst = arith.constant dense<0.000000e+00> : vector<12x288xf32>
    %13 = tpu.matmul %12, %11, %cst {dimension_numbers = #tpu.dot_dimension_numbers<[1], [0], [0], [1], [0, 0, 1, 1], [], []>} : vector<12x27xf32>, vector<27x288xf32>, vector<12x288xf32> -> vector<12x288xf32>
    %c0_4 = arith.constant 0 : index
    %c0_5 = arith.constant 0 : index
    %14 = vector.load %arg3[%c0_4, %c0_5] : memref<12x1xf32, #tpu.memory_space<vmem>>, vector<12x1xf32>
    %15 = vector.broadcast %14 : vector<12x1xf32> to vector<12x288xf32>
    %16 = arith.addf %13, %15 : vector<12x288xf32>
    %cst_6 = arith.constant 0.000000e+00 : f32
    %17 = vector.broadcast %cst_6 : f32 to vector<12x288xf32>
    %18 = arith.maximumf %16, %17 : vector<12x288xf32>
    %c0_7 = arith.constant 0 : index
    %c0_8 = arith.constant 0 : index
    %c0_9 = arith.constant 0 : index
    %19 = vector.load %arg4[%c0_7, %c0_8, %c0_9] : memref<1x12x288xf32, #tpu.memory_space<vmem>>, vector<1x12x288xf32>
    %20 = vector.shape_cast %19 : vector<1x12x288xf32> to vector<12x288xf32>
    %21 = vector.shape_cast %18 : vector<12x288xf32> to vector<1x12x288xf32>
    tpu.vector_store %arg4[%c0_7, %c0_8, %c0_9], %21 {strides = array<i32>} : memref<1x12x288xf32, #tpu.memory_space<vmem>>, vector<1x12x288xf32>,
    return
  }
  func.func @transform_0(%arg0: i32) -> (i32, i32, i32) {
    %c0_i32 = arith.constant 0 : i32
    %c0_i32_0 = arith.constant 0 : i32
    %c0_i32_1 = arith.constant 0 : i32
    return %arg0, %c0_i32, %c0_i32_0 : i32, i32, i32
  }
  func.func @transform_1(%arg0: i32) -> (i32, i32) {
    %c0_i32 = arith.constant 0 : i32
    %c0_i32_0 = arith.constant 0 : i32
    %c0_i32_1 = arith.constant 0 : i32
    return %c0_i32, %c0_i32_0 : i32, i32
  }
  func.func @transform_2(%arg0: i32) -> (i32, i32) {
    %c0_i32 = arith.constant 0 : i32
    %c0_i32_0 = arith.constant 0 : i32
    %c0_i32_1 = arith.constant 0 : i32
    return %c0_i32, %c0_i32_0 : i32, i32
  }
  func.func @transform_3(%arg0: i32) -> (i32, i32, i32) {
    %c0_i32 = arith.constant 0 : i32
    %c0_i32_0 = arith.constant 0 : i32
    %c0_i32_1 = arith.constant 0 : i32
    return %arg0, %c0_i32, %c0_i32_0 : i32, i32, i32
  }
}

module attributes {stable_mosaic.version = 11 : i64} {
  func.func @_rebnconv_kernel(%arg0: i32, %arg1: memref<1x12x110xf32, #tpu.memory_space<vmem>>, %arg2: memref<12x108xf32, #tpu.memory_space<vmem>>, %arg3: memref<12x1xf32, #tpu.memory_space<vmem>>, %arg4: memref<1x12x80xf32, #tpu.memory_space<vmem>>) attributes {dimension_semantics = [#tpu.dimension_semantics<parallel>], iteration_bounds = array<i64: 2>, scalar_prefetch = 0 : i64, scratch_operands = 0 : i64, tpu.core_type = #tpu.core_type<tc>, window_params = [{transform_indices = @transform_0, window_bounds = array<i64: 1, 12, 110>}, {pipeline_mode = #tpu.pipeline_mode<synchronous>, transform_indices = @transform_1, window_bounds = array<i64: 12, 108>}, {pipeline_mode = #tpu.pipeline_mode<synchronous>, transform_indices = @transform_2, window_bounds = array<i64: 12, 1>}, {transform_indices = @transform_3, window_bounds = array<i64: 1, 12, 80>}]} {
    %c0 = arith.constant 0 : index
    %c0_0 = arith.constant 0 : index
    %c0_1 = arith.constant 0 : index
    %0 = vector.load %arg1[%c0, %c0_0, %c0_1] : memref<1x12x110xf32, #tpu.memory_space<vmem>>, vector<1x12x110xf32>
    %1 = vector.shape_cast %0 : vector<1x12x110xf32> to vector<12x110xf32>
    %2 = vector.extract_strided_slice %1 {offsets = [0, 0], sizes = [12, 80], strides = [1, 1]} : vector<12x110xf32> to vector<12x80xf32>
    %3 = vector.extract_strided_slice %1 {offsets = [0, 1], sizes = [12, 80], strides = [1, 1]} : vector<12x110xf32> to vector<12x80xf32>
    %4 = vector.extract_strided_slice %1 {offsets = [0, 2], sizes = [12, 80], strides = [1, 1]} : vector<12x110xf32> to vector<12x80xf32>
    %5 = vector.extract_strided_slice %1 {offsets = [0, 10], sizes = [12, 80], strides = [1, 1]} : vector<12x110xf32> to vector<12x80xf32>
    %6 = vector.extract_strided_slice %1 {offsets = [0, 11], sizes = [12, 80], strides = [1, 1]} : vector<12x110xf32> to vector<12x80xf32>
    %7 = vector.extract_strided_slice %1 {offsets = [0, 12], sizes = [12, 80], strides = [1, 1]} : vector<12x110xf32> to vector<12x80xf32>
    %8 = vector.extract_strided_slice %1 {offsets = [0, 20], sizes = [12, 80], strides = [1, 1]} : vector<12x110xf32> to vector<12x80xf32>
    %9 = vector.extract_strided_slice %1 {offsets = [0, 21], sizes = [12, 80], strides = [1, 1]} : vector<12x110xf32> to vector<12x80xf32>
    %10 = vector.extract_strided_slice %1 {offsets = [0, 22], sizes = [12, 80], strides = [1, 1]} : vector<12x110xf32> to vector<12x80xf32>
    %11 = tpu.concatenate %2, %3, %4, %5, %6, %7, %8, %9, %10 in 0 : vector<12x80xf32>, vector<12x80xf32>, vector<12x80xf32>, vector<12x80xf32>, vector<12x80xf32>, vector<12x80xf32>, vector<12x80xf32>, vector<12x80xf32>, vector<12x80xf32> -> vector<108x80xf32>
    %c0_2 = arith.constant 0 : index
    %c0_3 = arith.constant 0 : index
    %12 = vector.load %arg2[%c0_2, %c0_3] : memref<12x108xf32, #tpu.memory_space<vmem>>, vector<12x108xf32>
    %cst = arith.constant dense<0.000000e+00> : vector<12x80xf32>
    %13 = tpu.matmul %12, %11, %cst {dimension_numbers = #tpu.dot_dimension_numbers<[1], [0], [0], [1], [0, 0, 1, 1], [], []>} : vector<12x108xf32>, vector<108x80xf32>, vector<12x80xf32> -> vector<12x80xf32>
    %c0_4 = arith.constant 0 : index
    %c0_5 = arith.constant 0 : index
    %14 = vector.load %arg3[%c0_4, %c0_5] : memref<12x1xf32, #tpu.memory_space<vmem>>, vector<12x1xf32>
    %15 = vector.broadcast %14 : vector<12x1xf32> to vector<12x80xf32>
    %16 = arith.addf %13, %15 : vector<12x80xf32>
    %cst_6 = arith.constant 0.000000e+00 : f32
    %17 = vector.broadcast %cst_6 : f32 to vector<12x80xf32>
    %18 = arith.maximumf %16, %17 : vector<12x80xf32>
    %c0_7 = arith.constant 0 : index
    %c0_8 = arith.constant 0 : index
    %c0_9 = arith.constant 0 : index
    %19 = vector.load %arg4[%c0_7, %c0_8, %c0_9] : memref<1x12x80xf32, #tpu.memory_space<vmem>>, vector<1x12x80xf32>
    %20 = vector.shape_cast %19 : vector<1x12x80xf32> to vector<12x80xf32>
    %21 = vector.shape_cast %18 : vector<12x80xf32> to vector<1x12x80xf32>
    tpu.vector_store %arg4[%c0_7, %c0_8, %c0_9], %21 {strides = array<i32>} : memref<1x12x80xf32, #tpu.memory_space<vmem>>, vector<1x12x80xf32>,
    return
  }
  func.func @transform_0(%arg0: i32) -> (i32, i32, i32) {
    %c0_i32 = arith.constant 0 : i32
    %c0_i32_0 = arith.constant 0 : i32
    %c0_i32_1 = arith.constant 0 : i32
    return %arg0, %c0_i32, %c0_i32_0 : i32, i32, i32
  }
  func.func @transform_1(%arg0: i32) -> (i32, i32) {
    %c0_i32 = arith.constant 0 : i32
    %c0_i32_0 = arith.constant 0 : i32
    %c0_i32_1 = arith.constant 0 : i32
    return %c0_i32, %c0_i32_0 : i32, i32
  }
  func.func @transform_2(%arg0: i32) -> (i32, i32) {
    %c0_i32 = arith.constant 0 : i32
    %c0_i32_0 = arith.constant 0 : i32
    %c0_i32_1 = arith.constant 0 : i32
    return %c0_i32, %c0_i32_0 : i32, i32
  }
  func.func @transform_3(%arg0: i32) -> (i32, i32, i32) {
    %c0_i32 = arith.constant 0 : i32
    %c0_i32_0 = arith.constant 0 : i32
    %c0_i32_1 = arith.constant 0 : i32
    return %arg0, %c0_i32, %c0_i32_0 : i32, i32, i32
  }
}

module attributes {stable_mosaic.version = 11 : i64} {
  func.func @_rebnconv_kernel(%arg0: i32, %arg1: memref<1x12x42xf32, #tpu.memory_space<vmem>>, %arg2: memref<12x108xf32, #tpu.memory_space<vmem>>, %arg3: memref<12x1xf32, #tpu.memory_space<vmem>>, %arg4: memref<1x12x24xf32, #tpu.memory_space<vmem>>) attributes {dimension_semantics = [#tpu.dimension_semantics<parallel>], iteration_bounds = array<i64: 2>, scalar_prefetch = 0 : i64, scratch_operands = 0 : i64, tpu.core_type = #tpu.core_type<tc>, window_params = [{transform_indices = @transform_0, window_bounds = array<i64: 1, 12, 42>}, {pipeline_mode = #tpu.pipeline_mode<synchronous>, transform_indices = @transform_1, window_bounds = array<i64: 12, 108>}, {pipeline_mode = #tpu.pipeline_mode<synchronous>, transform_indices = @transform_2, window_bounds = array<i64: 12, 1>}, {transform_indices = @transform_3, window_bounds = array<i64: 1, 12, 24>}]} {
    %c0 = arith.constant 0 : index
    %c0_0 = arith.constant 0 : index
    %c0_1 = arith.constant 0 : index
    %0 = vector.load %arg1[%c0, %c0_0, %c0_1] : memref<1x12x42xf32, #tpu.memory_space<vmem>>, vector<1x12x42xf32>
    %1 = vector.shape_cast %0 : vector<1x12x42xf32> to vector<12x42xf32>
    %2 = vector.extract_strided_slice %1 {offsets = [0, 0], sizes = [12, 24], strides = [1, 1]} : vector<12x42xf32> to vector<12x24xf32>
    %3 = vector.extract_strided_slice %1 {offsets = [0, 1], sizes = [12, 24], strides = [1, 1]} : vector<12x42xf32> to vector<12x24xf32>
    %4 = vector.extract_strided_slice %1 {offsets = [0, 2], sizes = [12, 24], strides = [1, 1]} : vector<12x42xf32> to vector<12x24xf32>
    %5 = vector.extract_strided_slice %1 {offsets = [0, 6], sizes = [12, 24], strides = [1, 1]} : vector<12x42xf32> to vector<12x24xf32>
    %6 = vector.extract_strided_slice %1 {offsets = [0, 7], sizes = [12, 24], strides = [1, 1]} : vector<12x42xf32> to vector<12x24xf32>
    %7 = vector.extract_strided_slice %1 {offsets = [0, 8], sizes = [12, 24], strides = [1, 1]} : vector<12x42xf32> to vector<12x24xf32>
    %8 = vector.extract_strided_slice %1 {offsets = [0, 12], sizes = [12, 24], strides = [1, 1]} : vector<12x42xf32> to vector<12x24xf32>
    %9 = vector.extract_strided_slice %1 {offsets = [0, 13], sizes = [12, 24], strides = [1, 1]} : vector<12x42xf32> to vector<12x24xf32>
    %10 = vector.extract_strided_slice %1 {offsets = [0, 14], sizes = [12, 24], strides = [1, 1]} : vector<12x42xf32> to vector<12x24xf32>
    %11 = tpu.concatenate %2, %3, %4, %5, %6, %7, %8, %9, %10 in 0 : vector<12x24xf32>, vector<12x24xf32>, vector<12x24xf32>, vector<12x24xf32>, vector<12x24xf32>, vector<12x24xf32>, vector<12x24xf32>, vector<12x24xf32>, vector<12x24xf32> -> vector<108x24xf32>
    %c0_2 = arith.constant 0 : index
    %c0_3 = arith.constant 0 : index
    %12 = vector.load %arg2[%c0_2, %c0_3] : memref<12x108xf32, #tpu.memory_space<vmem>>, vector<12x108xf32>
    %cst = arith.constant dense<0.000000e+00> : vector<12x24xf32>
    %13 = tpu.matmul %12, %11, %cst {dimension_numbers = #tpu.dot_dimension_numbers<[1], [0], [0], [1], [0, 0, 1, 1], [], []>} : vector<12x108xf32>, vector<108x24xf32>, vector<12x24xf32> -> vector<12x24xf32>
    %c0_4 = arith.constant 0 : index
    %c0_5 = arith.constant 0 : index
    %14 = vector.load %arg3[%c0_4, %c0_5] : memref<12x1xf32, #tpu.memory_space<vmem>>, vector<12x1xf32>
    %15 = vector.broadcast %14 : vector<12x1xf32> to vector<12x24xf32>
    %16 = arith.addf %13, %15 : vector<12x24xf32>
    %cst_6 = arith.constant 0.000000e+00 : f32
    %17 = vector.broadcast %cst_6 : f32 to vector<12x24xf32>
    %18 = arith.maximumf %16, %17 : vector<12x24xf32>
    %c0_7 = arith.constant 0 : index
    %c0_8 = arith.constant 0 : index
    %c0_9 = arith.constant 0 : index
    %19 = vector.load %arg4[%c0_7, %c0_8, %c0_9] : memref<1x12x24xf32, #tpu.memory_space<vmem>>, vector<1x12x24xf32>
    %20 = vector.shape_cast %19 : vector<1x12x24xf32> to vector<12x24xf32>
    %21 = vector.shape_cast %18 : vector<12x24xf32> to vector<1x12x24xf32>
    tpu.vector_store %arg4[%c0_7, %c0_8, %c0_9], %21 {strides = array<i32>} : memref<1x12x24xf32, #tpu.memory_space<vmem>>, vector<1x12x24xf32>,
    return
  }
  func.func @transform_0(%arg0: i32) -> (i32, i32, i32) {
    %c0_i32 = arith.constant 0 : i32
    %c0_i32_0 = arith.constant 0 : i32
    %c0_i32_1 = arith.constant 0 : i32
    return %arg0, %c0_i32, %c0_i32_0 : i32, i32, i32
  }
  func.func @transform_1(%arg0: i32) -> (i32, i32) {
    %c0_i32 = arith.constant 0 : i32
    %c0_i32_0 = arith.constant 0 : i32
    %c0_i32_1 = arith.constant 0 : i32
    return %c0_i32, %c0_i32_0 : i32, i32
  }
  func.func @transform_2(%arg0: i32) -> (i32, i32) {
    %c0_i32 = arith.constant 0 : i32
    %c0_i32_0 = arith.constant 0 : i32
    %c0_i32_1 = arith.constant 0 : i32
    return %c0_i32, %c0_i32_0 : i32, i32
  }
  func.func @transform_3(%arg0: i32) -> (i32, i32, i32) {
    %c0_i32 = arith.constant 0 : i32
    %c0_i32_0 = arith.constant 0 : i32
    %c0_i32_1 = arith.constant 0 : i32
    return %arg0, %c0_i32, %c0_i32_0 : i32, i32, i32
  }
}

module attributes {stable_mosaic.version = 11 : i64} {
  func.func @_rebnconv_kernel(%arg0: i32, %arg1: memref<1x12x20xf32, #tpu.memory_space<vmem>>, %arg2: memref<12x108xf32, #tpu.memory_space<vmem>>, %arg3: memref<12x1xf32, #tpu.memory_space<vmem>>, %arg4: memref<1x12x8xf32, #tpu.memory_space<vmem>>) attributes {dimension_semantics = [#tpu.dimension_semantics<parallel>], iteration_bounds = array<i64: 2>, scalar_prefetch = 0 : i64, scratch_operands = 0 : i64, tpu.core_type = #tpu.core_type<tc>, window_params = [{transform_indices = @transform_0, window_bounds = array<i64: 1, 12, 20>}, {pipeline_mode = #tpu.pipeline_mode<synchronous>, transform_indices = @transform_1, window_bounds = array<i64: 12, 108>}, {pipeline_mode = #tpu.pipeline_mode<synchronous>, transform_indices = @transform_2, window_bounds = array<i64: 12, 1>}, {transform_indices = @transform_3, window_bounds = array<i64: 1, 12, 8>}]} {
    %c0 = arith.constant 0 : index
    %c0_0 = arith.constant 0 : index
    %c0_1 = arith.constant 0 : index
    %0 = vector.load %arg1[%c0, %c0_0, %c0_1] : memref<1x12x20xf32, #tpu.memory_space<vmem>>, vector<1x12x20xf32>
    %1 = vector.shape_cast %0 : vector<1x12x20xf32> to vector<12x20xf32>
    %2 = vector.extract_strided_slice %1 {offsets = [0, 0], sizes = [12, 8], strides = [1, 1]} : vector<12x20xf32> to vector<12x8xf32>
    %3 = vector.extract_strided_slice %1 {offsets = [0, 1], sizes = [12, 8], strides = [1, 1]} : vector<12x20xf32> to vector<12x8xf32>
    %4 = vector.extract_strided_slice %1 {offsets = [0, 2], sizes = [12, 8], strides = [1, 1]} : vector<12x20xf32> to vector<12x8xf32>
    %5 = vector.extract_strided_slice %1 {offsets = [0, 4], sizes = [12, 8], strides = [1, 1]} : vector<12x20xf32> to vector<12x8xf32>
    %6 = vector.extract_strided_slice %1 {offsets = [0, 5], sizes = [12, 8], strides = [1, 1]} : vector<12x20xf32> to vector<12x8xf32>
    %7 = vector.extract_strided_slice %1 {offsets = [0, 6], sizes = [12, 8], strides = [1, 1]} : vector<12x20xf32> to vector<12x8xf32>
    %8 = vector.extract_strided_slice %1 {offsets = [0, 8], sizes = [12, 8], strides = [1, 1]} : vector<12x20xf32> to vector<12x8xf32>
    %9 = vector.extract_strided_slice %1 {offsets = [0, 9], sizes = [12, 8], strides = [1, 1]} : vector<12x20xf32> to vector<12x8xf32>
    %10 = vector.extract_strided_slice %1 {offsets = [0, 10], sizes = [12, 8], strides = [1, 1]} : vector<12x20xf32> to vector<12x8xf32>
    %11 = tpu.concatenate %2, %3, %4, %5, %6, %7, %8, %9, %10 in 0 : vector<12x8xf32>, vector<12x8xf32>, vector<12x8xf32>, vector<12x8xf32>, vector<12x8xf32>, vector<12x8xf32>, vector<12x8xf32>, vector<12x8xf32>, vector<12x8xf32> -> vector<108x8xf32>
    %c0_2 = arith.constant 0 : index
    %c0_3 = arith.constant 0 : index
    %12 = vector.load %arg2[%c0_2, %c0_3] : memref<12x108xf32, #tpu.memory_space<vmem>>, vector<12x108xf32>
    %cst = arith.constant dense<0.000000e+00> : vector<12x8xf32>
    %13 = tpu.matmul %12, %11, %cst {dimension_numbers = #tpu.dot_dimension_numbers<[1], [0], [0], [1], [0, 0, 1, 1], [], []>} : vector<12x108xf32>, vector<108x8xf32>, vector<12x8xf32> -> vector<12x8xf32>
    %c0_4 = arith.constant 0 : index
    %c0_5 = arith.constant 0 : index
    %14 = vector.load %arg3[%c0_4, %c0_5] : memref<12x1xf32, #tpu.memory_space<vmem>>, vector<12x1xf32>
    %15 = vector.broadcast %14 : vector<12x1xf32> to vector<12x8xf32>
    %16 = arith.addf %13, %15 : vector<12x8xf32>
    %cst_6 = arith.constant 0.000000e+00 : f32
    %17 = vector.broadcast %cst_6 : f32 to vector<12x8xf32>
    %18 = arith.maximumf %16, %17 : vector<12x8xf32>
    %c0_7 = arith.constant 0 : index
    %c0_8 = arith.constant 0 : index
    %c0_9 = arith.constant 0 : index
    %19 = vector.load %arg4[%c0_7, %c0_8, %c0_9] : memref<1x12x8xf32, #tpu.memory_space<vmem>>, vector<1x12x8xf32>
    %20 = vector.shape_cast %19 : vector<1x12x8xf32> to vector<12x8xf32>
    %21 = vector.shape_cast %18 : vector<12x8xf32> to vector<1x12x8xf32>
    tpu.vector_store %arg4[%c0_7, %c0_8, %c0_9], %21 {strides = array<i32>} : memref<1x12x8xf32, #tpu.memory_space<vmem>>, vector<1x12x8xf32>,
    return
  }
  func.func @transform_0(%arg0: i32) -> (i32, i32, i32) {
    %c0_i32 = arith.constant 0 : i32
    %c0_i32_0 = arith.constant 0 : i32
    %c0_i32_1 = arith.constant 0 : i32
    return %arg0, %c0_i32, %c0_i32_0 : i32, i32, i32
  }
  func.func @transform_1(%arg0: i32) -> (i32, i32) {
    %c0_i32 = arith.constant 0 : i32
    %c0_i32_0 = arith.constant 0 : i32
    %c0_i32_1 = arith.constant 0 : i32
    return %c0_i32, %c0_i32_0 : i32, i32
  }
  func.func @transform_2(%arg0: i32) -> (i32, i32) {
    %c0_i32 = arith.constant 0 : i32
    %c0_i32_0 = arith.constant 0 : i32
    %c0_i32_1 = arith.constant 0 : i32
    return %c0_i32, %c0_i32_0 : i32, i32
  }
  func.func @transform_3(%arg0: i32) -> (i32, i32, i32) {
    %c0_i32 = arith.constant 0 : i32
    %c0_i32_0 = arith.constant 0 : i32
    %c0_i32_1 = arith.constant 0 : i32
    return %arg0, %c0_i32, %c0_i32_0 : i32, i32, i32
  }
}

module attributes {stable_mosaic.version = 11 : i64} {
  func.func @_rebnconv_kernel(%arg0: i32, %arg1: memref<1x12x20xf32, #tpu.memory_space<vmem>>, %arg2: memref<1x12x20xf32, #tpu.memory_space<vmem>>, %arg3: memref<12x216xf32, #tpu.memory_space<vmem>>, %arg4: memref<12x1xf32, #tpu.memory_space<vmem>>, %arg5: memref<1x12x8xf32, #tpu.memory_space<vmem>>) attributes {dimension_semantics = [#tpu.dimension_semantics<parallel>], iteration_bounds = array<i64: 2>, scalar_prefetch = 0 : i64, scratch_operands = 0 : i64, tpu.core_type = #tpu.core_type<tc>, window_params = [{transform_indices = @transform_0, window_bounds = array<i64: 1, 12, 20>}, {transform_indices = @transform_1, window_bounds = array<i64: 1, 12, 20>}, {pipeline_mode = #tpu.pipeline_mode<synchronous>, transform_indices = @transform_2, window_bounds = array<i64: 12, 216>}, {pipeline_mode = #tpu.pipeline_mode<synchronous>, transform_indices = @transform_3, window_bounds = array<i64: 12, 1>}, {transform_indices = @transform_4, window_bounds = array<i64: 1, 12, 8>}]} {
    %c0 = arith.constant 0 : index
    %c0_0 = arith.constant 0 : index
    %c0_1 = arith.constant 0 : index
    %0 = vector.load %arg1[%c0, %c0_0, %c0_1] : memref<1x12x20xf32, #tpu.memory_space<vmem>>, vector<1x12x20xf32>
    %1 = vector.shape_cast %0 : vector<1x12x20xf32> to vector<12x20xf32>
    %2 = vector.extract_strided_slice %1 {offsets = [0, 0], sizes = [12, 8], strides = [1, 1]} : vector<12x20xf32> to vector<12x8xf32>
    %3 = vector.extract_strided_slice %1 {offsets = [0, 1], sizes = [12, 8], strides = [1, 1]} : vector<12x20xf32> to vector<12x8xf32>
    %4 = vector.extract_strided_slice %1 {offsets = [0, 2], sizes = [12, 8], strides = [1, 1]} : vector<12x20xf32> to vector<12x8xf32>
    %5 = vector.extract_strided_slice %1 {offsets = [0, 4], sizes = [12, 8], strides = [1, 1]} : vector<12x20xf32> to vector<12x8xf32>
    %6 = vector.extract_strided_slice %1 {offsets = [0, 5], sizes = [12, 8], strides = [1, 1]} : vector<12x20xf32> to vector<12x8xf32>
    %7 = vector.extract_strided_slice %1 {offsets = [0, 6], sizes = [12, 8], strides = [1, 1]} : vector<12x20xf32> to vector<12x8xf32>
    %8 = vector.extract_strided_slice %1 {offsets = [0, 8], sizes = [12, 8], strides = [1, 1]} : vector<12x20xf32> to vector<12x8xf32>
    %9 = vector.extract_strided_slice %1 {offsets = [0, 9], sizes = [12, 8], strides = [1, 1]} : vector<12x20xf32> to vector<12x8xf32>
    %10 = vector.extract_strided_slice %1 {offsets = [0, 10], sizes = [12, 8], strides = [1, 1]} : vector<12x20xf32> to vector<12x8xf32>
    %c0_2 = arith.constant 0 : index
    %c0_3 = arith.constant 0 : index
    %c0_4 = arith.constant 0 : index
    %11 = vector.load %arg2[%c0_2, %c0_3, %c0_4] : memref<1x12x20xf32, #tpu.memory_space<vmem>>, vector<1x12x20xf32>
    %12 = vector.shape_cast %11 : vector<1x12x20xf32> to vector<12x20xf32>
    %13 = vector.extract_strided_slice %12 {offsets = [0, 0], sizes = [12, 8], strides = [1, 1]} : vector<12x20xf32> to vector<12x8xf32>
    %14 = vector.extract_strided_slice %12 {offsets = [0, 1], sizes = [12, 8], strides = [1, 1]} : vector<12x20xf32> to vector<12x8xf32>
    %15 = vector.extract_strided_slice %12 {offsets = [0, 2], sizes = [12, 8], strides = [1, 1]} : vector<12x20xf32> to vector<12x8xf32>
    %16 = vector.extract_strided_slice %12 {offsets = [0, 4], sizes = [12, 8], strides = [1, 1]} : vector<12x20xf32> to vector<12x8xf32>
    %17 = vector.extract_strided_slice %12 {offsets = [0, 5], sizes = [12, 8], strides = [1, 1]} : vector<12x20xf32> to vector<12x8xf32>
    %18 = vector.extract_strided_slice %12 {offsets = [0, 6], sizes = [12, 8], strides = [1, 1]} : vector<12x20xf32> to vector<12x8xf32>
    %19 = vector.extract_strided_slice %12 {offsets = [0, 8], sizes = [12, 8], strides = [1, 1]} : vector<12x20xf32> to vector<12x8xf32>
    %20 = vector.extract_strided_slice %12 {offsets = [0, 9], sizes = [12, 8], strides = [1, 1]} : vector<12x20xf32> to vector<12x8xf32>
    %21 = vector.extract_strided_slice %12 {offsets = [0, 10], sizes = [12, 8], strides = [1, 1]} : vector<12x20xf32> to vector<12x8xf32>
    %22 = tpu.concatenate %2, %3, %4, %5, %6, %7, %8, %9, %10, %13, %14, %15, %16, %17, %18, %19 in 0 : vector<12x8xf32>, vector<12x8xf32>, vector<12x8xf32>, vector<12x8xf32>, vector<12x8xf32>, vector<12x8xf32>, vector<12x8xf32>, vector<12x8xf32>, vector<12x8xf32>, vector<12x8xf32>, vector<12x8xf32>, vector<12x8xf32>, vector<12x8xf32>, vector<12x8xf32>, vector<12x8xf32>, vector<12x8xf32> -> vector<192x8xf32>
    %23 = tpu.concatenate %20, %21 in 0 : vector<12x8xf32>, vector<12x8xf32> -> vector<24x8xf32>
    %24 = tpu.concatenate %22, %23 in 0 : vector<192x8xf32>, vector<24x8xf32> -> vector<216x8xf32>
    %c0_5 = arith.constant 0 : index
    %c0_6 = arith.constant 0 : index
    %25 = vector.load %arg3[%c0_5, %c0_6] : memref<12x216xf32, #tpu.memory_space<vmem>>, vector<12x216xf32>
    %cst = arith.constant dense<0.000000e+00> : vector<12x8xf32>
    %26 = tpu.matmul %25, %24, %cst {dimension_numbers = #tpu.dot_dimension_numbers<[1], [0], [0], [1], [0, 0, 1, 1], [], []>} : vector<12x216xf32>, vector<216x8xf32>, vector<12x8xf32> -> vector<12x8xf32>
    %c0_7 = arith.constant 0 : index
    %c0_8 = arith.constant 0 : index
    %27 = vector.load %arg4[%c0_7, %c0_8] : memref<12x1xf32, #tpu.memory_space<vmem>>, vector<12x1xf32>
    %28 = vector.broadcast %27 : vector<12x1xf32> to vector<12x8xf32>
    %29 = arith.addf %26, %28 : vector<12x8xf32>
    %cst_9 = arith.constant 0.000000e+00 : f32
    %30 = vector.broadcast %cst_9 : f32 to vector<12x8xf32>
    %31 = arith.maximumf %29, %30 : vector<12x8xf32>
    %c0_10 = arith.constant 0 : index
    %c0_11 = arith.constant 0 : index
    %c0_12 = arith.constant 0 : index
    %32 = vector.load %arg5[%c0_10, %c0_11, %c0_12] : memref<1x12x8xf32, #tpu.memory_space<vmem>>, vector<1x12x8xf32>
    %33 = vector.shape_cast %32 : vector<1x12x8xf32> to vector<12x8xf32>
    %34 = vector.shape_cast %31 : vector<12x8xf32> to vector<1x12x8xf32>
    tpu.vector_store %arg5[%c0_10, %c0_11, %c0_12], %34 {strides = array<i32>} : memref<1x12x8xf32, #tpu.memory_space<vmem>>, vector<1x12x8xf32>,
    return
  }
  func.func @transform_0(%arg0: i32) -> (i32, i32, i32) {
    %c0_i32 = arith.constant 0 : i32
    %c0_i32_0 = arith.constant 0 : i32
    %c0_i32_1 = arith.constant 0 : i32
    return %arg0, %c0_i32, %c0_i32_0 : i32, i32, i32
  }
  func.func @transform_1(%arg0: i32) -> (i32, i32, i32) {
    %c0_i32 = arith.constant 0 : i32
    %c0_i32_0 = arith.constant 0 : i32
    %c0_i32_1 = arith.constant 0 : i32
    return %arg0, %c0_i32, %c0_i32_0 : i32, i32, i32
  }
  func.func @transform_2(%arg0: i32) -> (i32, i32) {
    %c0_i32 = arith.constant 0 : i32
    %c0_i32_0 = arith.constant 0 : i32
    %c0_i32_1 = arith.constant 0 : i32
    return %c0_i32, %c0_i32_0 : i32, i32
  }
  func.func @transform_3(%arg0: i32) -> (i32, i32) {
    %c0_i32 = arith.constant 0 : i32
    %c0_i32_0 = arith.constant 0 : i32
    %c0_i32_1 = arith.constant 0 : i32
    return %c0_i32, %c0_i32_0 : i32, i32
  }
  func.func @transform_4(%arg0: i32) -> (i32, i32, i32) {
    %c0_i32 = arith.constant 0 : i32
    %c0_i32_0 = arith.constant 0 : i32
    %c0_i32_1 = arith.constant 0 : i32
    return %arg0, %c0_i32, %c0_i32_0 : i32, i32, i32
  }
}

module attributes {stable_mosaic.version = 11 : i64} {
  func.func @_rebnconv_kernel(%arg0: i32, %arg1: memref<1x12x42xf32, #tpu.memory_space<vmem>>, %arg2: memref<12x108xf32, #tpu.memory_space<vmem>>, %arg3: memref<12x1xf32, #tpu.memory_space<vmem>>, %arg4: memref<1x12x12xf32, #tpu.memory_space<vmem>>) attributes {dimension_semantics = [#tpu.dimension_semantics<parallel>], iteration_bounds = array<i64: 2>, scalar_prefetch = 0 : i64, scratch_operands = 0 : i64, tpu.core_type = #tpu.core_type<tc>, window_params = [{transform_indices = @transform_0, window_bounds = array<i64: 1, 12, 42>}, {pipeline_mode = #tpu.pipeline_mode<synchronous>, transform_indices = @transform_1, window_bounds = array<i64: 12, 108>}, {pipeline_mode = #tpu.pipeline_mode<synchronous>, transform_indices = @transform_2, window_bounds = array<i64: 12, 1>}, {transform_indices = @transform_3, window_bounds = array<i64: 1, 12, 12>}]} {
    %c0 = arith.constant 0 : index
    %c0_0 = arith.constant 0 : index
    %c0_1 = arith.constant 0 : index
    %0 = vector.load %arg1[%c0, %c0_0, %c0_1] : memref<1x12x42xf32, #tpu.memory_space<vmem>>, vector<1x12x42xf32>
    %1 = vector.shape_cast %0 : vector<1x12x42xf32> to vector<12x42xf32>
    %2 = vector.extract_strided_slice %1 {offsets = [0, 0], sizes = [12, 12], strides = [1, 1]} : vector<12x42xf32> to vector<12x12xf32>
    %3 = vector.extract_strided_slice %1 {offsets = [0, 2], sizes = [12, 12], strides = [1, 1]} : vector<12x42xf32> to vector<12x12xf32>
    %4 = vector.extract_strided_slice %1 {offsets = [0, 4], sizes = [12, 12], strides = [1, 1]} : vector<12x42xf32> to vector<12x12xf32>
    %5 = vector.extract_strided_slice %1 {offsets = [0, 12], sizes = [12, 12], strides = [1, 1]} : vector<12x42xf32> to vector<12x12xf32>
    %6 = vector.extract_strided_slice %1 {offsets = [0, 14], sizes = [12, 12], strides = [1, 1]} : vector<12x42xf32> to vector<12x12xf32>
    %7 = vector.extract_strided_slice %1 {offsets = [0, 16], sizes = [12, 12], strides = [1, 1]} : vector<12x42xf32> to vector<12x12xf32>
    %8 = vector.extract_strided_slice %1 {offsets = [0, 24], sizes = [12, 12], strides = [1, 1]} : vector<12x42xf32> to vector<12x12xf32>
    %9 = vector.extract_strided_slice %1 {offsets = [0, 26], sizes = [12, 12], strides = [1, 1]} : vector<12x42xf32> to vector<12x12xf32>
    %10 = vector.extract_strided_slice %1 {offsets = [0, 28], sizes = [12, 12], strides = [1, 1]} : vector<12x42xf32> to vector<12x12xf32>
    %11 = tpu.concatenate %2, %3, %4, %5, %6, %7, %8, %9, %10 in 0 : vector<12x12xf32>, vector<12x12xf32>, vector<12x12xf32>, vector<12x12xf32>, vector<12x12xf32>, vector<12x12xf32>, vector<12x12xf32>, vector<12x12xf32>, vector<12x12xf32> -> vector<108x12xf32>
    %c0_2 = arith.constant 0 : index
    %c0_3 = arith.constant 0 : index
    %12 = vector.load %arg2[%c0_2, %c0_3] : memref<12x108xf32, #tpu.memory_space<vmem>>, vector<12x108xf32>
    %cst = arith.constant dense<0.000000e+00> : vector<12x12xf32>
    %13 = tpu.matmul %12, %11, %cst {dimension_numbers = #tpu.dot_dimension_numbers<[1], [0], [0], [1], [0, 0, 1, 1], [], []>} : vector<12x108xf32>, vector<108x12xf32>, vector<12x12xf32> -> vector<12x12xf32>
    %c0_4 = arith.constant 0 : index
    %c0_5 = arith.constant 0 : index
    %14 = vector.load %arg3[%c0_4, %c0_5] : memref<12x1xf32, #tpu.memory_space<vmem>>, vector<12x1xf32>
    %15 = vector.broadcast %14 : vector<12x1xf32> to vector<12x12xf32>
    %16 = arith.addf %13, %15 : vector<12x12xf32>
    %cst_6 = arith.constant 0.000000e+00 : f32
    %17 = vector.broadcast %cst_6 : f32 to vector<12x12xf32>
    %18 = arith.maximumf %16, %17 : vector<12x12xf32>
    %c0_7 = arith.constant 0 : index
    %c0_8 = arith.constant 0 : index
    %c0_9 = arith.constant 0 : index
    %19 = vector.load %arg4[%c0_7, %c0_8, %c0_9] : memref<1x12x12xf32, #tpu.memory_space<vmem>>, vector<1x12x12xf32>
    %20 = vector.shape_cast %19 : vector<1x12x12xf32> to vector<12x12xf32>
    %21 = vector.shape_cast %18 : vector<12x12xf32> to vector<1x12x12xf32>
    tpu.vector_store %arg4[%c0_7, %c0_8, %c0_9], %21 {strides = array<i32>} : memref<1x12x12xf32, #tpu.memory_space<vmem>>, vector<1x12x12xf32>,
    return
  }
  func.func @transform_0(%arg0: i32) -> (i32, i32, i32) {
    %c0_i32 = arith.constant 0 : i32
    %c0_i32_0 = arith.constant 0 : i32
    %c0_i32_1 = arith.constant 0 : i32
    return %arg0, %c0_i32, %c0_i32_0 : i32, i32, i32
  }
  func.func @transform_1(%arg0: i32) -> (i32, i32) {
    %c0_i32 = arith.constant 0 : i32
    %c0_i32_0 = arith.constant 0 : i32
    %c0_i32_1 = arith.constant 0 : i32
    return %c0_i32, %c0_i32_0 : i32, i32
  }
  func.func @transform_2(%arg0: i32) -> (i32, i32) {
    %c0_i32 = arith.constant 0 : i32
    %c0_i32_0 = arith.constant 0 : i32
    %c0_i32_1 = arith.constant 0 : i32
    return %c0_i32, %c0_i32_0 : i32, i32
  }
  func.func @transform_3(%arg0: i32) -> (i32, i32, i32) {
    %c0_i32 = arith.constant 0 : i32
    %c0_i32_0 = arith.constant 0 : i32
    %c0_i32_1 = arith.constant 0 : i32
    return %arg0, %c0_i32, %c0_i32_0 : i32, i32, i32
  }
}

module attributes {stable_mosaic.version = 11 : i64} {
  func.func @_rebnconv_kernel(%arg0: i32, %arg1: memref<1x12x42xf32, #tpu.memory_space<vmem>>, %arg2: memref<1x12x42xf32, #tpu.memory_space<vmem>>, %arg3: memref<12x216xf32, #tpu.memory_space<vmem>>, %arg4: memref<12x1xf32, #tpu.memory_space<vmem>>, %arg5: memref<1x12x24xf32, #tpu.memory_space<vmem>>) attributes {dimension_semantics = [#tpu.dimension_semantics<parallel>], iteration_bounds = array<i64: 2>, scalar_prefetch = 0 : i64, scratch_operands = 0 : i64, tpu.core_type = #tpu.core_type<tc>, window_params = [{transform_indices = @transform_0, window_bounds = array<i64: 1, 12, 42>}, {transform_indices = @transform_1, window_bounds = array<i64: 1, 12, 42>}, {pipeline_mode = #tpu.pipeline_mode<synchronous>, transform_indices = @transform_2, window_bounds = array<i64: 12, 216>}, {pipeline_mode = #tpu.pipeline_mode<synchronous>, transform_indices = @transform_3, window_bounds = array<i64: 12, 1>}, {transform_indices = @transform_4, window_bounds = array<i64: 1, 12, 24>}]} {
    %c0 = arith.constant 0 : index
    %c0_0 = arith.constant 0 : index
    %c0_1 = arith.constant 0 : index
    %0 = vector.load %arg1[%c0, %c0_0, %c0_1] : memref<1x12x42xf32, #tpu.memory_space<vmem>>, vector<1x12x42xf32>
    %1 = vector.shape_cast %0 : vector<1x12x42xf32> to vector<12x42xf32>
    %2 = vector.extract_strided_slice %1 {offsets = [0, 0], sizes = [12, 24], strides = [1, 1]} : vector<12x42xf32> to vector<12x24xf32>
    %3 = vector.extract_strided_slice %1 {offsets = [0, 1], sizes = [12, 24], strides = [1, 1]} : vector<12x42xf32> to vector<12x24xf32>
    %4 = vector.extract_strided_slice %1 {offsets = [0, 2], sizes = [12, 24], strides = [1, 1]} : vector<12x42xf32> to vector<12x24xf32>
    %5 = vector.extract_strided_slice %1 {offsets = [0, 6], sizes = [12, 24], strides = [1, 1]} : vector<12x42xf32> to vector<12x24xf32>
    %6 = vector.extract_strided_slice %1 {offsets = [0, 7], sizes = [12, 24], strides = [1, 1]} : vector<12x42xf32> to vector<12x24xf32>
    %7 = vector.extract_strided_slice %1 {offsets = [0, 8], sizes = [12, 24], strides = [1, 1]} : vector<12x42xf32> to vector<12x24xf32>
    %8 = vector.extract_strided_slice %1 {offsets = [0, 12], sizes = [12, 24], strides = [1, 1]} : vector<12x42xf32> to vector<12x24xf32>
    %9 = vector.extract_strided_slice %1 {offsets = [0, 13], sizes = [12, 24], strides = [1, 1]} : vector<12x42xf32> to vector<12x24xf32>
    %10 = vector.extract_strided_slice %1 {offsets = [0, 14], sizes = [12, 24], strides = [1, 1]} : vector<12x42xf32> to vector<12x24xf32>
    %c0_2 = arith.constant 0 : index
    %c0_3 = arith.constant 0 : index
    %c0_4 = arith.constant 0 : index
    %11 = vector.load %arg2[%c0_2, %c0_3, %c0_4] : memref<1x12x42xf32, #tpu.memory_space<vmem>>, vector<1x12x42xf32>
    %12 = vector.shape_cast %11 : vector<1x12x42xf32> to vector<12x42xf32>
    %13 = vector.extract_strided_slice %12 {offsets = [0, 0], sizes = [12, 24], strides = [1, 1]} : vector<12x42xf32> to vector<12x24xf32>
    %14 = vector.extract_strided_slice %12 {offsets = [0, 1], sizes = [12, 24], strides = [1, 1]} : vector<12x42xf32> to vector<12x24xf32>
    %15 = vector.extract_strided_slice %12 {offsets = [0, 2], sizes = [12, 24], strides = [1, 1]} : vector<12x42xf32> to vector<12x24xf32>
    %16 = vector.extract_strided_slice %12 {offsets = [0, 6], sizes = [12, 24], strides = [1, 1]} : vector<12x42xf32> to vector<12x24xf32>
    %17 = vector.extract_strided_slice %12 {offsets = [0, 7], sizes = [12, 24], strides = [1, 1]} : vector<12x42xf32> to vector<12x24xf32>
    %18 = vector.extract_strided_slice %12 {offsets = [0, 8], sizes = [12, 24], strides = [1, 1]} : vector<12x42xf32> to vector<12x24xf32>
    %19 = vector.extract_strided_slice %12 {offsets = [0, 12], sizes = [12, 24], strides = [1, 1]} : vector<12x42xf32> to vector<12x24xf32>
    %20 = vector.extract_strided_slice %12 {offsets = [0, 13], sizes = [12, 24], strides = [1, 1]} : vector<12x42xf32> to vector<12x24xf32>
    %21 = vector.extract_strided_slice %12 {offsets = [0, 14], sizes = [12, 24], strides = [1, 1]} : vector<12x42xf32> to vector<12x24xf32>
    %22 = tpu.concatenate %2, %3, %4, %5, %6, %7, %8, %9, %10, %13, %14, %15, %16, %17, %18, %19 in 0 : vector<12x24xf32>, vector<12x24xf32>, vector<12x24xf32>, vector<12x24xf32>, vector<12x24xf32>, vector<12x24xf32>, vector<12x24xf32>, vector<12x24xf32>, vector<12x24xf32>, vector<12x24xf32>, vector<12x24xf32>, vector<12x24xf32>, vector<12x24xf32>, vector<12x24xf32>, vector<12x24xf32>, vector<12x24xf32> -> vector<192x24xf32>
    %23 = tpu.concatenate %20, %21 in 0 : vector<12x24xf32>, vector<12x24xf32> -> vector<24x24xf32>
    %24 = tpu.concatenate %22, %23 in 0 : vector<192x24xf32>, vector<24x24xf32> -> vector<216x24xf32>
    %c0_5 = arith.constant 0 : index
    %c0_6 = arith.constant 0 : index
    %25 = vector.load %arg3[%c0_5, %c0_6] : memref<12x216xf32, #tpu.memory_space<vmem>>, vector<12x216xf32>
    %cst = arith.constant dense<0.000000e+00> : vector<12x24xf32>
    %26 = tpu.matmul %25, %24, %cst {dimension_numbers = #tpu.dot_dimension_numbers<[1], [0], [0], [1], [0, 0, 1, 1], [], []>} : vector<12x216xf32>, vector<216x24xf32>, vector<12x24xf32> -> vector<12x24xf32>
    %c0_7 = arith.constant 0 : index
    %c0_8 = arith.constant 0 : index
    %27 = vector.load %arg4[%c0_7, %c0_8] : memref<12x1xf32, #tpu.memory_space<vmem>>, vector<12x1xf32>
    %28 = vector.broadcast %27 : vector<12x1xf32> to vector<12x24xf32>
    %29 = arith.addf %26, %28 : vector<12x24xf32>
    %cst_9 = arith.constant 0.000000e+00 : f32
    %30 = vector.broadcast %cst_9 : f32 to vector<12x24xf32>
    %31 = arith.maximumf %29, %30 : vector<12x24xf32>
    %c0_10 = arith.constant 0 : index
    %c0_11 = arith.constant 0 : index
    %c0_12 = arith.constant 0 : index
    %32 = vector.load %arg5[%c0_10, %c0_11, %c0_12] : memref<1x12x24xf32, #tpu.memory_space<vmem>>, vector<1x12x24xf32>
    %33 = vector.shape_cast %32 : vector<1x12x24xf32> to vector<12x24xf32>
    %34 = vector.shape_cast %31 : vector<12x24xf32> to vector<1x12x24xf32>
    tpu.vector_store %arg5[%c0_10, %c0_11, %c0_12], %34 {strides = array<i32>} : memref<1x12x24xf32, #tpu.memory_space<vmem>>, vector<1x12x24xf32>,
    return
  }
  func.func @transform_0(%arg0: i32) -> (i32, i32, i32) {
    %c0_i32 = arith.constant 0 : i32
    %c0_i32_0 = arith.constant 0 : i32
    %c0_i32_1 = arith.constant 0 : i32
    return %arg0, %c0_i32, %c0_i32_0 : i32, i32, i32
  }
  func.func @transform_1(%arg0: i32) -> (i32, i32, i32) {
    %c0_i32 = arith.constant 0 : i32
    %c0_i32_0 = arith.constant 0 : i32
    %c0_i32_1 = arith.constant 0 : i32
    return %arg0, %c0_i32, %c0_i32_0 : i32, i32, i32
  }
  func.func @transform_2(%arg0: i32) -> (i32, i32) {
    %c0_i32 = arith.constant 0 : i32
    %c0_i32_0 = arith.constant 0 : i32
    %c0_i32_1 = arith.constant 0 : i32
    return %c0_i32, %c0_i32_0 : i32, i32
  }
  func.func @transform_3(%arg0: i32) -> (i32, i32) {
    %c0_i32 = arith.constant 0 : i32
    %c0_i32_0 = arith.constant 0 : i32
    %c0_i32_1 = arith.constant 0 : i32
    return %c0_i32, %c0_i32_0 : i32, i32
  }
  func.func @transform_4(%arg0: i32) -> (i32, i32, i32) {
    %c0_i32 = arith.constant 0 : i32
    %c0_i32_0 = arith.constant 0 : i32
    %c0_i32_1 = arith.constant 0 : i32
    return %arg0, %c0_i32, %c0_i32_0 : i32, i32, i32
  }
}

module attributes {stable_mosaic.version = 11 : i64} {
  func.func @_rebnconv_kernel(%arg0: i32, %arg1: memref<1x12x110xf32, #tpu.memory_space<vmem>>, %arg2: memref<1x12x110xf32, #tpu.memory_space<vmem>>, %arg3: memref<12x216xf32, #tpu.memory_space<vmem>>, %arg4: memref<12x1xf32, #tpu.memory_space<vmem>>, %arg5: memref<1x12x80xf32, #tpu.memory_space<vmem>>) attributes {dimension_semantics = [#tpu.dimension_semantics<parallel>], iteration_bounds = array<i64: 2>, scalar_prefetch = 0 : i64, scratch_operands = 0 : i64, tpu.core_type = #tpu.core_type<tc>, window_params = [{transform_indices = @transform_0, window_bounds = array<i64: 1, 12, 110>}, {transform_indices = @transform_1, window_bounds = array<i64: 1, 12, 110>}, {pipeline_mode = #tpu.pipeline_mode<synchronous>, transform_indices = @transform_2, window_bounds = array<i64: 12, 216>}, {pipeline_mode = #tpu.pipeline_mode<synchronous>, transform_indices = @transform_3, window_bounds = array<i64: 12, 1>}, {transform_indices = @transform_4, window_bounds = array<i64: 1, 12, 80>}]} {
    %c0 = arith.constant 0 : index
    %c0_0 = arith.constant 0 : index
    %c0_1 = arith.constant 0 : index
    %0 = vector.load %arg1[%c0, %c0_0, %c0_1] : memref<1x12x110xf32, #tpu.memory_space<vmem>>, vector<1x12x110xf32>
    %1 = vector.shape_cast %0 : vector<1x12x110xf32> to vector<12x110xf32>
    %2 = vector.extract_strided_slice %1 {offsets = [0, 0], sizes = [12, 80], strides = [1, 1]} : vector<12x110xf32> to vector<12x80xf32>
    %3 = vector.extract_strided_slice %1 {offsets = [0, 1], sizes = [12, 80], strides = [1, 1]} : vector<12x110xf32> to vector<12x80xf32>
    %4 = vector.extract_strided_slice %1 {offsets = [0, 2], sizes = [12, 80], strides = [1, 1]} : vector<12x110xf32> to vector<12x80xf32>
    %5 = vector.extract_strided_slice %1 {offsets = [0, 10], sizes = [12, 80], strides = [1, 1]} : vector<12x110xf32> to vector<12x80xf32>
    %6 = vector.extract_strided_slice %1 {offsets = [0, 11], sizes = [12, 80], strides = [1, 1]} : vector<12x110xf32> to vector<12x80xf32>
    %7 = vector.extract_strided_slice %1 {offsets = [0, 12], sizes = [12, 80], strides = [1, 1]} : vector<12x110xf32> to vector<12x80xf32>
    %8 = vector.extract_strided_slice %1 {offsets = [0, 20], sizes = [12, 80], strides = [1, 1]} : vector<12x110xf32> to vector<12x80xf32>
    %9 = vector.extract_strided_slice %1 {offsets = [0, 21], sizes = [12, 80], strides = [1, 1]} : vector<12x110xf32> to vector<12x80xf32>
    %10 = vector.extract_strided_slice %1 {offsets = [0, 22], sizes = [12, 80], strides = [1, 1]} : vector<12x110xf32> to vector<12x80xf32>
    %c0_2 = arith.constant 0 : index
    %c0_3 = arith.constant 0 : index
    %c0_4 = arith.constant 0 : index
    %11 = vector.load %arg2[%c0_2, %c0_3, %c0_4] : memref<1x12x110xf32, #tpu.memory_space<vmem>>, vector<1x12x110xf32>
    %12 = vector.shape_cast %11 : vector<1x12x110xf32> to vector<12x110xf32>
    %13 = vector.extract_strided_slice %12 {offsets = [0, 0], sizes = [12, 80], strides = [1, 1]} : vector<12x110xf32> to vector<12x80xf32>
    %14 = vector.extract_strided_slice %12 {offsets = [0, 1], sizes = [12, 80], strides = [1, 1]} : vector<12x110xf32> to vector<12x80xf32>
    %15 = vector.extract_strided_slice %12 {offsets = [0, 2], sizes = [12, 80], strides = [1, 1]} : vector<12x110xf32> to vector<12x80xf32>
    %16 = vector.extract_strided_slice %12 {offsets = [0, 10], sizes = [12, 80], strides = [1, 1]} : vector<12x110xf32> to vector<12x80xf32>
    %17 = vector.extract_strided_slice %12 {offsets = [0, 11], sizes = [12, 80], strides = [1, 1]} : vector<12x110xf32> to vector<12x80xf32>
    %18 = vector.extract_strided_slice %12 {offsets = [0, 12], sizes = [12, 80], strides = [1, 1]} : vector<12x110xf32> to vector<12x80xf32>
    %19 = vector.extract_strided_slice %12 {offsets = [0, 20], sizes = [12, 80], strides = [1, 1]} : vector<12x110xf32> to vector<12x80xf32>
    %20 = vector.extract_strided_slice %12 {offsets = [0, 21], sizes = [12, 80], strides = [1, 1]} : vector<12x110xf32> to vector<12x80xf32>
    %21 = vector.extract_strided_slice %12 {offsets = [0, 22], sizes = [12, 80], strides = [1, 1]} : vector<12x110xf32> to vector<12x80xf32>
    %22 = tpu.concatenate %2, %3, %4, %5, %6, %7, %8, %9, %10, %13, %14, %15, %16, %17, %18, %19 in 0 : vector<12x80xf32>, vector<12x80xf32>, vector<12x80xf32>, vector<12x80xf32>, vector<12x80xf32>, vector<12x80xf32>, vector<12x80xf32>, vector<12x80xf32>, vector<12x80xf32>, vector<12x80xf32>, vector<12x80xf32>, vector<12x80xf32>, vector<12x80xf32>, vector<12x80xf32>, vector<12x80xf32>, vector<12x80xf32> -> vector<192x80xf32>
    %23 = tpu.concatenate %20, %21 in 0 : vector<12x80xf32>, vector<12x80xf32> -> vector<24x80xf32>
    %24 = tpu.concatenate %22, %23 in 0 : vector<192x80xf32>, vector<24x80xf32> -> vector<216x80xf32>
    %c0_5 = arith.constant 0 : index
    %c0_6 = arith.constant 0 : index
    %25 = vector.load %arg3[%c0_5, %c0_6] : memref<12x216xf32, #tpu.memory_space<vmem>>, vector<12x216xf32>
    %cst = arith.constant dense<0.000000e+00> : vector<12x80xf32>
    %26 = tpu.matmul %25, %24, %cst {dimension_numbers = #tpu.dot_dimension_numbers<[1], [0], [0], [1], [0, 0, 1, 1], [], []>} : vector<12x216xf32>, vector<216x80xf32>, vector<12x80xf32> -> vector<12x80xf32>
    %c0_7 = arith.constant 0 : index
    %c0_8 = arith.constant 0 : index
    %27 = vector.load %arg4[%c0_7, %c0_8] : memref<12x1xf32, #tpu.memory_space<vmem>>, vector<12x1xf32>
    %28 = vector.broadcast %27 : vector<12x1xf32> to vector<12x80xf32>
    %29 = arith.addf %26, %28 : vector<12x80xf32>
    %cst_9 = arith.constant 0.000000e+00 : f32
    %30 = vector.broadcast %cst_9 : f32 to vector<12x80xf32>
    %31 = arith.maximumf %29, %30 : vector<12x80xf32>
    %c0_10 = arith.constant 0 : index
    %c0_11 = arith.constant 0 : index
    %c0_12 = arith.constant 0 : index
    %32 = vector.load %arg5[%c0_10, %c0_11, %c0_12] : memref<1x12x80xf32, #tpu.memory_space<vmem>>, vector<1x12x80xf32>
    %33 = vector.shape_cast %32 : vector<1x12x80xf32> to vector<12x80xf32>
    %34 = vector.shape_cast %31 : vector<12x80xf32> to vector<1x12x80xf32>
    tpu.vector_store %arg5[%c0_10, %c0_11, %c0_12], %34 {strides = array<i32>} : memref<1x12x80xf32, #tpu.memory_space<vmem>>, vector<1x12x80xf32>,
    return
  }
  func.func @transform_0(%arg0: i32) -> (i32, i32, i32) {
    %c0_i32 = arith.constant 0 : i32
    %c0_i32_0 = arith.constant 0 : i32
    %c0_i32_1 = arith.constant 0 : i32
    return %arg0, %c0_i32, %c0_i32_0 : i32, i32, i32
  }
  func.func @transform_1(%arg0: i32) -> (i32, i32, i32) {
    %c0_i32 = arith.constant 0 : i32
    %c0_i32_0 = arith.constant 0 : i32
    %c0_i32_1 = arith.constant 0 : i32
    return %arg0, %c0_i32, %c0_i32_0 : i32, i32, i32
  }
  func.func @transform_2(%arg0: i32) -> (i32, i32) {
    %c0_i32 = arith.constant 0 : i32
    %c0_i32_0 = arith.constant 0 : i32
    %c0_i32_1 = arith.constant 0 : i32
    return %c0_i32, %c0_i32_0 : i32, i32
  }
  func.func @transform_3(%arg0: i32) -> (i32, i32) {
    %c0_i32 = arith.constant 0 : i32
    %c0_i32_0 = arith.constant 0 : i32
    %c0_i32_1 = arith.constant 0 : i32
    return %c0_i32, %c0_i32_0 : i32, i32
  }
  func.func @transform_4(%arg0: i32) -> (i32, i32, i32) {
    %c0_i32 = arith.constant 0 : i32
    %c0_i32_0 = arith.constant 0 : i32
    %c0_i32_1 = arith.constant 0 : i32
    return %arg0, %c0_i32, %c0_i32_0 : i32, i32, i32
  }
}

module attributes {stable_mosaic.version = 11 : i64} {
  func.func @_rebnconv_kernel(%arg0: i32, %arg1: memref<1x12x342xf32, #tpu.memory_space<vmem>>, %arg2: memref<1x12x342xf32, #tpu.memory_space<vmem>>, %arg3: memref<3x216xf32, #tpu.memory_space<vmem>>, %arg4: memref<3x1xf32, #tpu.memory_space<vmem>>, %arg5: memref<1x3x288xf32, #tpu.memory_space<vmem>>) attributes {dimension_semantics = [#tpu.dimension_semantics<parallel>], iteration_bounds = array<i64: 2>, scalar_prefetch = 0 : i64, scratch_operands = 0 : i64, tpu.core_type = #tpu.core_type<tc>, window_params = [{transform_indices = @transform_0, window_bounds = array<i64: 1, 12, 342>}, {transform_indices = @transform_1, window_bounds = array<i64: 1, 12, 342>}, {pipeline_mode = #tpu.pipeline_mode<synchronous>, transform_indices = @transform_2, window_bounds = array<i64: 3, 216>}, {pipeline_mode = #tpu.pipeline_mode<synchronous>, transform_indices = @transform_3, window_bounds = array<i64: 3, 1>}, {transform_indices = @transform_4, window_bounds = array<i64: 1, 3, 288>}]} {
    %c0 = arith.constant 0 : index
    %c0_0 = arith.constant 0 : index
    %c0_1 = arith.constant 0 : index
    %0 = vector.load %arg1[%c0, %c0_0, %c0_1] : memref<1x12x342xf32, #tpu.memory_space<vmem>>, vector<1x12x342xf32>
    %1 = vector.shape_cast %0 : vector<1x12x342xf32> to vector<12x342xf32>
    %2 = vector.extract_strided_slice %1 {offsets = [0, 0], sizes = [12, 288], strides = [1, 1]} : vector<12x342xf32> to vector<12x288xf32>
    %3 = vector.extract_strided_slice %1 {offsets = [0, 1], sizes = [12, 288], strides = [1, 1]} : vector<12x342xf32> to vector<12x288xf32>
    %4 = vector.extract_strided_slice %1 {offsets = [0, 2], sizes = [12, 288], strides = [1, 1]} : vector<12x342xf32> to vector<12x288xf32>
    %5 = vector.extract_strided_slice %1 {offsets = [0, 18], sizes = [12, 288], strides = [1, 1]} : vector<12x342xf32> to vector<12x288xf32>
    %6 = vector.extract_strided_slice %1 {offsets = [0, 19], sizes = [12, 288], strides = [1, 1]} : vector<12x342xf32> to vector<12x288xf32>
    %7 = vector.extract_strided_slice %1 {offsets = [0, 20], sizes = [12, 288], strides = [1, 1]} : vector<12x342xf32> to vector<12x288xf32>
    %8 = vector.extract_strided_slice %1 {offsets = [0, 36], sizes = [12, 288], strides = [1, 1]} : vector<12x342xf32> to vector<12x288xf32>
    %9 = vector.extract_strided_slice %1 {offsets = [0, 37], sizes = [12, 288], strides = [1, 1]} : vector<12x342xf32> to vector<12x288xf32>
    %10 = vector.extract_strided_slice %1 {offsets = [0, 38], sizes = [12, 288], strides = [1, 1]} : vector<12x342xf32> to vector<12x288xf32>
    %c0_2 = arith.constant 0 : index
    %c0_3 = arith.constant 0 : index
    %c0_4 = arith.constant 0 : index
    %11 = vector.load %arg2[%c0_2, %c0_3, %c0_4] : memref<1x12x342xf32, #tpu.memory_space<vmem>>, vector<1x12x342xf32>
    %12 = vector.shape_cast %11 : vector<1x12x342xf32> to vector<12x342xf32>
    %13 = vector.extract_strided_slice %12 {offsets = [0, 0], sizes = [12, 288], strides = [1, 1]} : vector<12x342xf32> to vector<12x288xf32>
    %14 = vector.extract_strided_slice %12 {offsets = [0, 1], sizes = [12, 288], strides = [1, 1]} : vector<12x342xf32> to vector<12x288xf32>
    %15 = vector.extract_strided_slice %12 {offsets = [0, 2], sizes = [12, 288], strides = [1, 1]} : vector<12x342xf32> to vector<12x288xf32>
    %16 = vector.extract_strided_slice %12 {offsets = [0, 18], sizes = [12, 288], strides = [1, 1]} : vector<12x342xf32> to vector<12x288xf32>
    %17 = vector.extract_strided_slice %12 {offsets = [0, 19], sizes = [12, 288], strides = [1, 1]} : vector<12x342xf32> to vector<12x288xf32>
    %18 = vector.extract_strided_slice %12 {offsets = [0, 20], sizes = [12, 288], strides = [1, 1]} : vector<12x342xf32> to vector<12x288xf32>
    %19 = vector.extract_strided_slice %12 {offsets = [0, 36], sizes = [12, 288], strides = [1, 1]} : vector<12x342xf32> to vector<12x288xf32>
    %20 = vector.extract_strided_slice %12 {offsets = [0, 37], sizes = [12, 288], strides = [1, 1]} : vector<12x342xf32> to vector<12x288xf32>
    %21 = vector.extract_strided_slice %12 {offsets = [0, 38], sizes = [12, 288], strides = [1, 1]} : vector<12x342xf32> to vector<12x288xf32>
    %22 = tpu.concatenate %2, %3, %4, %5, %6, %7, %8, %9, %10, %13, %14, %15, %16, %17, %18, %19 in 0 : vector<12x288xf32>, vector<12x288xf32>, vector<12x288xf32>, vector<12x288xf32>, vector<12x288xf32>, vector<12x288xf32>, vector<12x288xf32>, vector<12x288xf32>, vector<12x288xf32>, vector<12x288xf32>, vector<12x288xf32>, vector<12x288xf32>, vector<12x288xf32>, vector<12x288xf32>, vector<12x288xf32>, vector<12x288xf32> -> vector<192x288xf32>
    %23 = tpu.concatenate %20, %21 in 0 : vector<12x288xf32>, vector<12x288xf32> -> vector<24x288xf32>
    %24 = tpu.concatenate %22, %23 in 0 : vector<192x288xf32>, vector<24x288xf32> -> vector<216x288xf32>
    %c0_5 = arith.constant 0 : index
    %c0_6 = arith.constant 0 : index
    %25 = vector.load %arg3[%c0_5, %c0_6] : memref<3x216xf32, #tpu.memory_space<vmem>>, vector<3x216xf32>
    %cst = arith.constant dense<0.000000e+00> : vector<3x288xf32>
    %26 = tpu.matmul %25, %24, %cst {dimension_numbers = #tpu.dot_dimension_numbers<[1], [0], [0], [1], [0, 0, 1, 1], [], []>} : vector<3x216xf32>, vector<216x288xf32>, vector<3x288xf32> -> vector<3x288xf32>
    %c0_7 = arith.constant 0 : index
    %c0_8 = arith.constant 0 : index
    %27 = vector.load %arg4[%c0_7, %c0_8] : memref<3x1xf32, #tpu.memory_space<vmem>>, vector<3x1xf32>
    %28 = vector.broadcast %27 : vector<3x1xf32> to vector<3x288xf32>
    %29 = arith.addf %26, %28 : vector<3x288xf32>
    %cst_9 = arith.constant 0.000000e+00 : f32
    %30 = vector.broadcast %cst_9 : f32 to vector<3x288xf32>
    %31 = arith.maximumf %29, %30 : vector<3x288xf32>
    %c0_10 = arith.constant 0 : index
    %c0_11 = arith.constant 0 : index
    %c0_12 = arith.constant 0 : index
    %32 = vector.load %arg5[%c0_10, %c0_11, %c0_12] : memref<1x3x288xf32, #tpu.memory_space<vmem>>, vector<1x3x288xf32>
    %33 = vector.shape_cast %32 : vector<1x3x288xf32> to vector<3x288xf32>
    %34 = vector.shape_cast %31 : vector<3x288xf32> to vector<1x3x288xf32>
    tpu.vector_store %arg5[%c0_10, %c0_11, %c0_12], %34 {strides = array<i32>} : memref<1x3x288xf32, #tpu.memory_space<vmem>>, vector<1x3x288xf32>,
    return
  }
  func.func @transform_0(%arg0: i32) -> (i32, i32, i32) {
    %c0_i32 = arith.constant 0 : i32
    %c0_i32_0 = arith.constant 0 : i32
    %c0_i32_1 = arith.constant 0 : i32
    return %arg0, %c0_i32, %c0_i32_0 : i32, i32, i32
  }
  func.func @transform_1(%arg0: i32) -> (i32, i32, i32) {
    %c0_i32 = arith.constant 0 : i32
    %c0_i32_0 = arith.constant 0 : i32
    %c0_i32_1 = arith.constant 0 : i32
    return %arg0, %c0_i32, %c0_i32_0 : i32, i32, i32
  }
  func.func @transform_2(%arg0: i32) -> (i32, i32) {
    %c0_i32 = arith.constant 0 : i32
    %c0_i32_0 = arith.constant 0 : i32
    %c0_i32_1 = arith.constant 0 : i32
    return %c0_i32, %c0_i32_0 : i32, i32
  }
  func.func @transform_3(%arg0: i32) -> (i32, i32) {
    %c0_i32 = arith.constant 0 : i32
    %c0_i32_0 = arith.constant 0 : i32
    %c0_i32_1 = arith.constant 0 : i32
    return %c0_i32, %c0_i32_0 : i32, i32
  }
  func.func @transform_4(%arg0: i32) -> (i32, i32, i32) {
    %c0_i32 = arith.constant 0 : i32
    %c0_i32_0 = arith.constant 0 : i32
    %c0_i32_1 = arith.constant 0 : i32
    return %arg0, %c0_i32, %c0_i32_0 : i32, i32, i32
  }
}

</mosaic_0001>

<bundles_post_ra>
// kernel: _lambda_.10
= control target key start
LH: loop header
LB: loop body
LE: loop exit
PB: predicated region body
PF: predicated region fallthrough
CT: control target
= control target key end

     0   :  { %s634_s12 = smov 0   ;;  %s748_s0 = inlined_call_operand.vmem [shape: f32[2,3,342], index: 0, kind: input, shape index: {}]   ;;  %s749_s1 = inlined_call_operand.vmem [shape: f32[3,27], index: 1, kind: input, shape index: {}]   ;;  %s750_s2 = inlined_call_operand.vmem [shape: f32[3,1], index: 2, kind: input, shape index: {}]   ;;  %s751_s3 = inlined_call_operand.vmem [shape: f32[2,3,288], index: 3, kind: output, shape index: {}]  }
   0x1 LB: > { %s541_s13 = sadd.s32 4294967295, %s601_s12   ;;  %p545_p0 = scmp.ge.s32.totalorder %s601_s12, 1  ;;  %s601_s12 = sphi %s634_s12, %s13_s12  }
   0x2   : > { %p137_p1 = scmp.lt.s32.totalorder %s601_s12, 3 }
   0x4   : > { %p138_p2 = pnand %p545_p0, %p137_p1 }
   0x5   : > { %p161_p3 = scmp.lt.s32.totalorder (!%p138_p2), %s541_s13, 1  ;;  %s604_s18 = smov (!%p138_p2), 90  }
   0x6   : > { %141 = sbr.rel (%p138_p2) target bundleno = 384 (0x180), region = 32  ;;  %s605_s19 = smov (!%p138_p2), 108  }
   0x7   : > { %s606_s20 = smov (!%p138_p2), 92   ;;  %s607_s21 = smov (!%p138_p2), 126  }
   0x8   : > { %s608_s22 = smov (!%p138_p2), 110   ;;  %s609_s23 = smov (!%p138_p2), 91  }
   0x9   : > { %s610_s24 = smov (!%p138_p2), 109   ;;  %s613_s25 = smov (!%p138_p2), 127  }
   0xb   : > { %v603_v0 = vmov 0.0   ;;  %s753_s13 = smov (!%p161_p3, %s541_s13), 1  ;;  %vm611_vm0 = vmmov 0   ;;  %v612_v22 = vmov 0   ;;  %v319_v25 = vld [vmem:[%s750_s2] sm:$0x7] }
   0xc   : > { %560 = vmatprep.subr.mxu1 %v603_v0  ;;  %399 = vmatprep.mubr.f32.mxu0 %v603_v0  ;;  %s571_s14 = smul.u32 12, %s753_s13  ;;  %vm290_vm1 = vcmask 1042432   ;;  %vm287_vm2 = vcmask 736256   ;;  %vm310_vm3 = vcmask 1041408   ;;  %vm314_vm4 = vcmask 1044480  }
   0xd   : > { %568 = vmatprep.mubr.msk.f32.mxu1 %vm611_vm0, %v603_v0  ;;  %591 = vset.pattern.permute.xlu0 %v612_v22  ;;  %vm260_vm5 = vcmask 752640   ;;  %vm275_vm6 = vcmask 744448   ;;  %vm245_vm7 = vcmask 883712   ;;  %vm216_vm8 = vcmask 900096  }
   0xe   : > { %s165_s17 = scalar_lea.vmem %s748_s0, %s571_s14  ;;  %vm201_vm9 = vcmask 1031168   ;;  %vm298_vm10 = vcmask 1040384   ;;  %vm230_vm11 = vcmask 891904   ;;  %vm302_vm12 = vcmask 1043456   ;;  %s170_s5 = scalar_lea.vmem %s751_s3, %s571_s14 }
   0xf   : > { %v652_v1 = vld [vmem:[%s165_s17 + $0x8] sm:$0x7]  ;;  %v654_v2 = vld [vmem:[%s165_s17] sm:$0x77]  ;;  %vm306_vm13 = vcmask 1046528   ;;  %vm186_vm14 = vcmask 1039360  }
  0x10   : > { %285 = vrot.lane.b32.xlu1 %v652_v1, %s604_s18  ;;  %v238_v3 = vrot.slane %v652_v1, 1  ;;  %v253_v4 = vrot.slane %v652_v1, 6  ;;  %v662_v5 = vcombine.high %v654_v2, %v654_v2  ;;  %v194_v6 = vrot.slane %v652_v1, 2 }
  0x11   : > { %v209_v10 = vrot.slane %v652_v1, 7  ;;  %v251_v12 = vrot.slane %v654_v2, 6  ;;  %v236_v13 = vrot.slane %v654_v2, 1  ;;  %v268_v14 = vrot.slane %v652_v1, 3 }
  0x12   : > { %243 = vrot.lane.b32.xlu0 %v238_v3, %s605_s19  ;;  %v237_v7 = vrot.slane %v662_v5, 1  ;;  %v252_v8 = vrot.slane %v662_v5, 6  ;;  %v193_v9 = vrot.slane %v662_v5, 2  ;;  %v208_v11 = vrot.slane %v662_v5, 7 }
  0x13   : > { %v267_v15 = vrot.slane %v662_v5, 3  ;;  %v192_v16 = vrot.slane %v654_v2, 2  ;;  %v207_v17 = vrot.slane %v654_v2, 7  ;;  %v266_v18 = vrot.slane %v654_v2, 3 }
  0x14   : > { %258 = vrot.lane.b32.xlu1 %v253_v4, %s606_s20  ;;  %v223_v19 = vcombine.low %v652_v1, %v652_v1  ;;  %v178_v20 = vrot.slane %v662_v5, 5  ;;  %v222_v21 = vcombine.low %v654_v2, %v654_v2  ;;  %v177_v23 = vrot.slane %v654_v2, 5 }
  0x15   : > { %v179_v24 = vrot.slane %v652_v1, 5  ;;  %vm294_vm15 = vcmask 1045504   ;;  %vm325_vm0 = vcmask 220160  }
  0x16   : > { %283 = vrot.lane.b32.xlu0 %v662_v5, %s604_s18 }
  0x18   : > { %199 = vrot.lane.b32.xlu1 %v194_v6, %s607_s21 }
  0x1a   : > { %241 = vrot.lane.b32.xlu0 %v237_v7, %s605_s19 }
  0x1c   : > { %256 = vrot.lane.b32.xlu1 %v252_v8, %s606_s20 }
  0x1e   : > { %197 = vrot.lane.b32.xlu0 %v193_v9, %s607_s21 }
  0x20   : > { %214 = vrot.lane.b32.xlu1 %v209_v10, %s608_s22 }
  0x22   : > { %212 = vrot.lane.b32.xlu0 %v208_v11, %s608_s22 }
  0x24   : > { %254 = vrot.lane.b32.xlu1 %v251_v12, %s606_s20 }
  0x26   : > { %239 = vrot.lane.b32.xlu0 %v236_v13, %s605_s19 }
  0x28   : > { %273 = vrot.lane.b32.xlu1 %v268_v14, %s609_s23 }
  0x2a   : > { %271 = vrot.lane.b32.xlu0 %v267_v15, %s609_s23 }
  0x2c   : > { %195 = vrot.lane.b32.xlu1 %v192_v16, %s607_s21 }
  0x2e   : > { %281 = vrot.lane.b32.xlu0 %v654_v2, %s604_s18 }
  0x30   : > { %226 = vrot.lane.b32.xlu1 %v654_v2, %s610_s24 }
  0x32   : > { %210 = vrot.lane.b32.xlu0 %v207_v17, %s608_s22 }
  0x34   : > { %269 = vrot.lane.b32.xlu1 %v266_v18, %s609_s23 }
  0x36   : > { %228 = vrot.lane.b32.xlu0 %v223_v19, %s610_s24 }
  0x38   : > { %182 = vrot.lane.b32.xlu1 %v178_v20, %s613_s25 }
  0x3a   : > { %224 = vrot.lane.b32.xlu0 %v222_v21, %s610_s24 }
  0x3c   : > { %180 = vrot.lane.b32.xlu1 %v177_v23, %s613_s25 }
  0x3e   : > { %184 = vrot.lane.b32.xlu0 %v179_v24, %s613_s25 }
  0x42   : > { %322 = vperm.xlu0 %591, %v319_v25   ;;  %v318_v25 = vld [vmem:[%s749_s1] sm:$0x7] }
  0x82   : > { %v286_v26 = vpop.permute.xlu1 %285 }
  0x83   : > { %561 = vmatpush3.msk.msra.mxu1 %vm290_vm1, %v286_v26 }
  0x84   : > { %v244_v27 = vpop.permute.xlu0 %243  ;;  %562 = vmatprep.subr.mxu1 %v603_v0 }
  0x86   : > { %v259_v28 = vpop.permute.xlu1 %258 }
  0x87   : > { %v313_v39 = vsel %vm310_vm3, %v244_v27, %v259_v28 }
  0x88   : > { %v284_v29 = vpop.permute.xlu0 %283 }
  0x89   : > { %v289_v30 = vsel %vm287_vm2, %v284_v29, %v286_v26 }
  0x8a   : > { %v696_v31 = vpop.permute.xlu1 %199  ;;  %548 = vmatprep.subr.msk.mxu0 %vm290_vm1, %v289_v30 }
  0x8c   : > { %v242_v32 = vpop.permute.xlu0 %241 }
  0x8d   : > { %v247_v46 = vsel %vm245_vm7, %v242_v32, %v244_v27 }
  0x8e   : > { %v257_v33 = vpop.permute.xlu1 %256 }
  0x8f   : > { %v262_v43 = vsel %vm260_vm5, %v257_v33, %v259_v28 }
  0x90   : > { %v198_v34 = vpop.permute.xlu0 %197  ;;  %v312_v49 = vsel %vm310_vm3, %v247_v46, %v262_v43 }
  0x91   : > { %v203_v59 = vsel %vm201_vm9, %v198_v34, %v696_v31 }
  0x92   : > { %v215_v35 = vpop.permute.xlu1 %214 }
  0x93   : > { %v301_v60 = vsel %vm298_vm10, %v696_v31, %v215_v35 }
  0x94   : > { %v213_v36 = vpop.permute.xlu0 %212 }
  0x95   : > { %v218_v54 = vsel %vm216_vm8, %v213_v36, %v215_v35 }
  0x96   : > { %v255_v37 = vpop.permute.xlu1 %254  ;;  %v300_v63 = vsel %vm298_vm10, %v203_v59, %v218_v54 }
  0x97   : > { %v261_v55 = vsel %vm260_vm5, %v255_v37, %v257_v33 }
  0x98   : > { %v240_v38 = vpop.permute.xlu0 %239 }
  0x99   : > { %v246_v52 = vsel %vm245_vm7, %v240_v38, %v242_v32 }
  0x9a   : > { %v274_v40 = vpop.permute.xlu1 %273  ;;  %v311_v58 = vsel %vm310_vm3, %v246_v52, %v261_v55 }
  0x9b   : > { %v317_v41 = vsel %vm314_vm4, %v313_v39, %v274_v40 }
  0x9c   : > { %563 = vmatpush3.msra.mxu1 %v317_v41  ;;  %v272_v42 = vpop.permute.xlu0 %271 }
  0x9d   : > { %564 = vmatprep.subr.mxu1 %v603_v0  ;;  %v277_v45 = vsel %vm275_vm6, %v272_v42, %v274_v40 }
  0x9e   : > { %v196_v44 = vpop.permute.xlu1 %195  ;;  %v316_v51 = vsel %vm314_vm4, %v312_v49, %v277_v45 }
  0x9f   : > { %v202_v11 = vsel %vm201_vm9, %v196_v44, %v198_v34 }
  0xa0   : > { %v282_v47 = vpop.permute.xlu0 %281 }
  0xa1   : > { %v288_v48 = vsel %vm287_vm2, %v282_v47, %v284_v29 }
  0xa2   : > { %v227_v50 = vpop.permute.xlu1 %226  ;;  %549 = vmatpush1.msk.msra.mxu0 %vm290_vm1, %v288_v48 }
  0xa3   : > { %361 = vmatprep.subr.mxu0 %v316_v51 }
  0xa4   : > { %v211_v53 = vpop.permute.xlu0 %210 }
  0xa5   : > { %v217_v6 = vsel %vm216_vm8, %v211_v53, %v213_v36 }
  0xa6   : > { %v270_v56 = vpop.permute.xlu1 %269  ;;  %v299_v13 = vsel %vm298_vm10, %v202_v11, %v217_v6 }
  0xa7   : > { %v276_v57 = vsel %vm275_vm6, %v270_v56, %v272_v42 }
  0xa8   : > { %v229_v61 = vpop.permute.xlu0 %228  ;;  %v315_v62 = vsel %vm314_vm4, %v311_v58, %v276_v57 }
  0xa9   : > { %v232_v3 = vsel %vm230_vm11, %v227_v50, %v229_v61  ;;  %v305_v4 = vsel %vm302_vm12, %v301_v60, %v229_v61  ;;  %362 = vmatpush1.msra.mxu0 %v315_v62 }
  0xaa   : > { %v183_v7 = vpop.permute.xlu1 %182  ;;  %v309_v8 = vsel %vm306_vm13, %v305_v4, %v244_v27  ;;  %v304_v9 = vsel %vm302_vm12, %v300_v63, %v232_v3 }
  0xab   : > { %565 = vmatpush3.msra.mxu1 %v309_v8  ;;  %v308_v10 = vsel %vm306_vm13, %v304_v9, %v247_v46 }
  0xac   : > { %363 = vmatprep.subr.mxu0 %v308_v10  ;;  %v225_v12 = vpop.permute.xlu0 %224  ;;  %566 = vmatprep.subr.mxu1 %v603_v0 }
  0xad   : > { %v231_v14 = vsel %vm230_vm11, %v225_v12, %v227_v50 }
  0xae   : > { %v181_v15 = vpop.permute.xlu1 %180  ;;  %v303_v16 = vsel %vm302_vm12, %v299_v13, %v231_v14 }
  0xaf   : > { %v187_v17 = vsel %vm186_vm14, %v181_v15, %v183_v7  ;;  %v307_v18 = vsel %vm306_vm13, %v303_v16, %v246_v52 }
  0xb0   : > { %364 = vmatpush1.msra.mxu0 %v307_v18  ;;  %v185_v19 = vpop.permute.xlu0 %184  ;;  %v291_v0 = vsel %vm290_vm1, %v654_v2, %v187_v17 }
  0xb1   : > { %v188_v20 = vsel %vm186_vm14, %v183_v7, %v185_v19  ;;  %v293_v21 = vsel %vm290_vm1, %v652_v1, %v185_v19  ;;  %v295_v26 = vsel %vm294_vm15, %v291_v0, %v202_v11 }
  0xb2   : > { %v297_v22 = vsel %vm294_vm15, %v293_v21, %v696_v31  ;;  %v292_v23 = vsel %vm290_vm1, %v662_v5, %v188_v20  ;;  %vm484_vm1 = vcmask 256000  }
  0xb3   : > { %567 = vmatpush3.msra.mxu1 %v297_v22  ;;  %v296_v24 = vsel %vm294_vm15, %v292_v23, %v203_v59 }
  0xb4   : > { %365 = vmatprep.subr.mxu0 %v296_v24  ;;  %569 = vmatmul.mubr.msk.f32.vlgmr.msra.gmra.mxu1 %vm325_vm0, %v318_v25 }
  0xb5   : > { %366 = vmatpush1.msra.mxu0 %v295_v26 }
  0xb6   : > { %550 = vmatmul.mubr.msk.f32.vlgmr.msra.gmra.mxu0 %vm325_vm0, %v318_v25 }
  0xbd   : > { %v323_v1 = vpop.permute.xlu0 %322 }
 0x174   : > { %v472_v2 = vpop.f32.mrf.mxu1 }
 0x175   : > { %v473_v27 = vadd.f32 %v472_v2, %v323_v1 }
 0x176   : > { %v401_v28 = vpop.f32.mrf.mxu0  ;;  %v570_v5 = vpop.f32.mrf.mxu1 }
 0x177   : > { %v402_v29 = vadd.f32 %v401_v28, %v323_v1  ;;  %v478_v30 = vmax.f32 %v473_v27, 0.0 }
 0x178   : > { %v403_v31 = vpop.f32.mrf.mxu0 }
 0x179   : > { %v404_v32 = vadd.f32 %v403_v31, %v323_v1  ;;  %485 = vst.msk [vmem:[%s170_s5 + $0x8] sm:$0x7] %vm484_vm1, %v478_v30  ;;  %v476_v33 = vmax.f32 %v402_v29, 0.0 }
 0x17b   : > { %v477_v34 = vmax.f32 %v404_v32, 0.0 }
 0x17d   : > { %v481_v35 = vcombine.low %v476_v33, %v477_v34 }
 0x17f   : > { %483 = vst [vmem:[%s170_s5] sm:$0x77] %v481_v35 }
 0x180 PF: > { %s13_s12 = sadd.s32 1, %s601_s12  }
 0x181   : > { %p10_p4 = scmp.ge.s32.totalorder %s13_s12, 4  }
 0x183   :  { %12 = sbr.rel (!%p10_p4) target bundleno = 1 (0x1), region = 62 }

// kernel: _lambda_.11
= control target key start
LH: loop header
LB: loop body
LE: loop exit
PB: predicated region body
PF: predicated region fallthrough
CT: control target
= control target key end

     0   :  { %s662_s12 = smov 0   ;;  %s784_s0 = inlined_call_operand.vmem [shape: f32[2,3,342], index: 0, kind: input, shape index: {}]   ;;  %s785_s1 = inlined_call_operand.vmem [shape: f32[12,27], index: 1, kind: input, shape index: {}]   ;;  %s786_s2 = inlined_call_operand.vmem [shape: f32[12,1], index: 2, kind: input, shape index: {}]   ;;  %s787_s3 = inlined_call_operand.vmem [shape: f32[2,12,288], index: 3, kind: output, shape index: {}]  }
   0x1 LB: > { %s566_s13 = sadd.s32 4294967295, %s630_s12   ;;  %p570_p0 = scmp.ge.s32.totalorder %s630_s12, 1  ;;  %s630_s12 = sphi %s662_s12, %s13_s12  }
   0x2   : > { %p137_p1 = scmp.lt.s32.totalorder %s630_s12, 3 }
   0x4   : > { %p138_p2 = pnand %p570_p0, %p137_p1 }
   0x5   : > { %p161_p3 = scmp.lt.s32.totalorder (!%p138_p2), %s566_s13, 1  ;;  %s632_s18 = smov (!%p138_p2), 90  }
   0x6   : > { %141 = sbr.rel (%p138_p2) target bundleno = 386 (0x182), region = 32  ;;  %s633_s19 = smov (!%p138_p2), 108  }
   0x7   : > { %s634_s20 = smov (!%p138_p2), 92   ;;  %s635_s21 = smov (!%p138_p2), 126  }
   0x8   : > { %s636_s22 = smov (!%p138_p2), 110   ;;  %s637_s23 = smov (!%p138_p2), 91  }
   0x9   : > { %s638_s24 = smov (!%p138_p2), 109   ;;  %s640_s27 = smov (!%p138_p2), 127  }
   0xb   : > { %s789_s13 = smov (!%p161_p3, %s566_s13), 1  ;;  %v639_v20 = vmov 0.0   ;;  %v713_v21 = vld [vmem:[%s785_s1] sm:$0xff]  ;;  %vm332_vm0 = vcmask 220160   ;;  %v641_v25 = vmov 0   ;;  %vm290_vm1 = vcmask 1042432  }
   0xc   : > { %s599_s14 = smul.u32 12, %s789_s13  ;;  %409 = vmatprep.mubr.f32.mxu0 %v639_v20  ;;  %596 = vmatprep.mubr.msk.f32.mxu1 %vm332_vm0, %v713_v21  ;;  %v321_v26 = vld [vmem:[%s786_s2 + $0x8] sm:$0xf]  ;;  %v320_v27 = vld [vmem:[%s786_s2] sm:$0xff]  ;;  %vm287_vm2 = vcmask 736256   ;;  %vm310_vm3 = vcmask 1041408  }
   0xd   : > { %619 = vset.pattern.permute.xlu0 %v641_v25  ;;  %620 = vset.pattern.permute.xlu1 %v641_v25  ;;  %vm314_vm4 = vcmask 1044480   ;;  %vm260_vm5 = vcmask 752640   ;;  %vm275_vm6 = vcmask 744448   ;;  %vm245_vm7 = vcmask 883712   ;;  %s600_s7 = smul.u32 48, %s789_s13 }
   0xe   : > { %s165_s17 = scalar_lea.vmem %s784_s0, %s599_s14  ;;  %vm216_vm8 = vcmask 900096   ;;  %vm201_vm9 = vcmask 1031168   ;;  %vm298_vm10 = vcmask 1040384   ;;  %vm230_vm11 = vcmask 891904  }
   0xf   : > { %v676_v0 = vld [vmem:[%s165_s17 + $0x8] sm:$0x7]  ;;  %v678_v1 = vld [vmem:[%s165_s17] sm:$0x77]  ;;  %vm302_vm12 = vcmask 1043456   ;;  %vm306_vm13 = vcmask 1046528   ;;  %s170_s10 = scalar_lea.vmem %s787_s3, %s600_s7 }
  0x10   : > { %285 = vrot.lane.b32.xlu1 %v676_v0, %s632_s18  ;;  %v238_v2 = vrot.slane %v676_v0, 1  ;;  %v253_v3 = vrot.slane %v676_v0, 6  ;;  %v686_v4 = vcombine.high %v678_v1, %v678_v1  ;;  %v194_v5 = vrot.slane %v676_v0, 2 }
  0x11   : > { %v209_v9 = vrot.slane %v676_v0, 7  ;;  %v251_v11 = vrot.slane %v678_v1, 6  ;;  %v236_v12 = vrot.slane %v678_v1, 1  ;;  %v268_v13 = vrot.slane %v676_v0, 3 }
  0x12   : > { %243 = vrot.lane.b32.xlu0 %v238_v2, %s633_s19  ;;  %v237_v6 = vrot.slane %v686_v4, 1  ;;  %v252_v7 = vrot.slane %v686_v4, 6  ;;  %v193_v8 = vrot.slane %v686_v4, 2  ;;  %v208_v10 = vrot.slane %v686_v4, 7 }
  0x13   : > { %v267_v14 = vrot.slane %v686_v4, 3  ;;  %v192_v15 = vrot.slane %v678_v1, 2  ;;  %v207_v16 = vrot.slane %v678_v1, 7  ;;  %v266_v17 = vrot.slane %v678_v1, 3 }
  0x14   : > { %258 = vrot.lane.b32.xlu1 %v253_v3, %s634_s20  ;;  %v223_v18 = vcombine.low %v676_v0, %v676_v0  ;;  %v178_v19 = vrot.slane %v686_v4, 5  ;;  %v222_v22 = vcombine.low %v678_v1, %v678_v1  ;;  %v177_v23 = vrot.slane %v678_v1, 5 }
  0x15   : > { %v179_v24 = vrot.slane %v676_v0, 5  ;;  %vm186_vm14 = vcmask 1039360   ;;  %vm294_vm15 = vcmask 1045504  }
  0x16   : > { %283 = vrot.lane.b32.xlu0 %v686_v4, %s632_s18 }
  0x18   : > { %199 = vrot.lane.b32.xlu1 %v194_v5, %s635_s21 }
  0x1a   : > { %241 = vrot.lane.b32.xlu0 %v237_v6, %s633_s19 }
  0x1c   : > { %256 = vrot.lane.b32.xlu1 %v252_v7, %s634_s20 }
  0x1e   : > { %197 = vrot.lane.b32.xlu0 %v193_v8, %s635_s21 }
  0x20   : > { %214 = vrot.lane.b32.xlu1 %v209_v9, %s636_s22 }
  0x22   : > { %212 = vrot.lane.b32.xlu0 %v208_v10, %s636_s22 }
  0x24   : > { %254 = vrot.lane.b32.xlu1 %v251_v11, %s634_s20 }
  0x26   : > { %239 = vrot.lane.b32.xlu0 %v236_v12, %s633_s19 }
  0x28   : > { %273 = vrot.lane.b32.xlu1 %v268_v13, %s637_s23 }
  0x2a   : > { %271 = vrot.lane.b32.xlu0 %v267_v14, %s637_s23 }
  0x2c   : > { %195 = vrot.lane.b32.xlu1 %v192_v15, %s635_s21 }
  0x2e   : > { %281 = vrot.lane.b32.xlu0 %v678_v1, %s632_s18 }
  0x30   : > { %226 = vrot.lane.b32.xlu1 %v678_v1, %s638_s24 }
  0x32   : > { %210 = vrot.lane.b32.xlu0 %v207_v16, %s636_s22 }
  0x34   : > { %269 = vrot.lane.b32.xlu1 %v266_v17, %s637_s23 }
  0x36   : > { %228 = vrot.lane.b32.xlu0 %v223_v18, %s638_s24 }
  0x38   : > { %182 = vrot.lane.b32.xlu1 %v178_v19, %s640_s27 }
  0x3a   : > { %224 = vrot.lane.b32.xlu0 %v222_v22, %s638_s24 }
  0x3c   : > { %180 = vrot.lane.b32.xlu1 %v177_v23, %s640_s27 }
  0x3e   : > { %184 = vrot.lane.b32.xlu0 %v179_v24, %s640_s27 }
  0x40   : > { %329 = vperm.xlu1 %620, %v321_v26  }
  0x42   : > { %324 = vperm.xlu0 %619, %v320_v27  }
  0x82   : > { %v286_v28 = vpop.permute.xlu1 %285 }
  0x83   : > { %588 = vmatprep.subr.msk.mxu1 %vm290_vm1, %v286_v28 }
  0x84   : > { %v244_v29 = vpop.permute.xlu0 %243  ;;  %589 = vmatpush3.msk.msra.mxu1 %vm290_vm1, %v286_v28 }
  0x86   : > { %v259_v30 = vpop.permute.xlu1 %258 }
  0x87   : > { %v313_v41 = vsel %vm310_vm3, %v244_v29, %v259_v30 }
  0x88   : > { %v284_v31 = vpop.permute.xlu0 %283 }
  0x89   : > { %v289_v32 = vsel %vm287_vm2, %v284_v31, %v286_v28  ;;  %v319_v28 = vld [vmem:[%s785_s1 + $0x8] sm:$0xf] }
  0x8a   : > { %v730_v33 = vpop.permute.xlu1 %199  ;;  %573 = vmatprep.subr.msk.mxu0 %vm290_vm1, %v289_v32 }
  0x8c   : > { %v242_v34 = vpop.permute.xlu0 %241 }
  0x8d   : > { %v247_v48 = vsel %vm245_vm7, %v242_v34, %v244_v29 }
  0x8e   : > { %v257_v35 = vpop.permute.xlu1 %256 }
  0x8f   : > { %v262_v45 = vsel %vm260_vm5, %v257_v35, %v259_v30 }
  0x90   : > { %v198_v36 = vpop.permute.xlu0 %197  ;;  %v312_v51 = vsel %vm310_vm3, %v247_v48, %v262_v45 }
  0x91   : > { %v203_v61 = vsel %vm201_vm9, %v198_v36, %v730_v33 }
  0x92   : > { %v215_v37 = vpop.permute.xlu1 %214 }
  0x93   : > { %v301_v62 = vsel %vm298_vm10, %v730_v33, %v215_v37 }
  0x94   : > { %v213_v38 = vpop.permute.xlu0 %212 }
  0x95   : > { %v218_v56 = vsel %vm216_vm8, %v213_v38, %v215_v37 }
  0x96   : > { %v255_v39 = vpop.permute.xlu1 %254  ;;  %v300_v3 = vsel %vm298_vm10, %v203_v61, %v218_v56 }
  0x97   : > { %v261_v57 = vsel %vm260_vm5, %v255_v39, %v257_v35 }
  0x98   : > { %v240_v40 = vpop.permute.xlu0 %239 }
  0x99   : > { %v246_v54 = vsel %vm245_vm7, %v240_v40, %v242_v34 }
  0x9a   : > { %v274_v42 = vpop.permute.xlu1 %273  ;;  %v311_v60 = vsel %vm310_vm3, %v246_v54, %v261_v57 }
  0x9b   : > { %v317_v43 = vsel %vm314_vm4, %v313_v41, %v274_v42 }
  0x9c   : > { %590 = vmatprep.subr.mxu1 %v317_v43  ;;  %v272_v44 = vpop.permute.xlu0 %271 }
  0x9d   : > { %591 = vmatpush3.msra.mxu1 %v317_v43  ;;  %v277_v47 = vsel %vm275_vm6, %v272_v44, %v274_v42 }
  0x9e   : > { %v196_v46 = vpop.permute.xlu1 %195  ;;  %v316_v53 = vsel %vm314_vm4, %v312_v51, %v277_v47 }
  0x9f   : > { %v202_v12 = vsel %vm201_vm9, %v196_v46, %v198_v36 }
  0xa0   : > { %v282_v49 = vpop.permute.xlu0 %281 }
  0xa1   : > { %v288_v50 = vsel %vm287_vm2, %v282_v49, %v284_v31  ;;  %vm505_vm2 = vcmask 261120  }
  0xa2   : > { %v227_v52 = vpop.permute.xlu1 %226  ;;  %574 = vmatpush1.msk.msra.mxu0 %vm290_vm1, %v288_v50 }
  0xa3   : > { %371 = vmatprep.subr.mxu0 %v316_v53 }
  0xa4   : > { %v211_v55 = vpop.permute.xlu0 %210 }
  0xa5   : > { %v217_v7 = vsel %vm216_vm8, %v211_v55, %v213_v38 }
  0xa6   : > { %v270_v58 = vpop.permute.xlu1 %269  ;;  %v299_v14 = vsel %vm298_vm10, %v202_v12, %v217_v7 }
  0xa7   : > { %v276_v59 = vsel %vm275_vm6, %v270_v58, %v272_v44 }
  0xa8   : > { %v229_v63 = vpop.permute.xlu0 %228  ;;  %v315_v2 = vsel %vm314_vm4, %v311_v60, %v276_v59 }
  0xa9   : > { %v232_v5 = vsel %vm230_vm11, %v227_v52, %v229_v63  ;;  %v305_v6 = vsel %vm302_vm12, %v301_v62, %v229_v63  ;;  %372 = vmatpush1.msra.mxu0 %v315_v2 }
  0xaa   : > { %v183_v8 = vpop.permute.xlu1 %182  ;;  %v309_v9 = vsel %vm306_vm13, %v305_v6, %v244_v29  ;;  %v304_v10 = vsel %vm302_vm12, %v300_v3, %v232_v5 }
  0xab   : > { %592 = vmatprep.subr.mxu1 %v309_v9  ;;  %v308_v11 = vsel %vm306_vm13, %v304_v10, %v247_v48 }
  0xac   : > { %373 = vmatprep.subr.mxu0 %v308_v11  ;;  %593 = vmatpush3.msra.mxu1 %v309_v9  ;;  %v225_v13 = vpop.permute.xlu0 %224 }
  0xad   : > { %v231_v15 = vsel %vm230_vm11, %v225_v13, %v227_v52 }
  0xae   : > { %v181_v16 = vpop.permute.xlu1 %180  ;;  %v303_v17 = vsel %vm302_vm12, %v299_v14, %v231_v15 }
  0xaf   : > { %v187_v18 = vsel %vm186_vm14, %v181_v16, %v183_v8  ;;  %v307_v19 = vsel %vm306_vm13, %v303_v17, %v246_v54 }
  0xb0   : > { %374 = vmatpush1.msra.mxu0 %v307_v19  ;;  %v185_v22 = vpop.permute.xlu0 %184  ;;  %v291_v25 = vsel %vm290_vm1, %v678_v1, %v187_v18 }
  0xb1   : > { %v188_v23 = vsel %vm186_vm14, %v183_v8, %v185_v22  ;;  %v293_v24 = vsel %vm290_vm1, %v676_v0, %v185_v22  ;;  %v295_v30 = vsel %vm294_vm15, %v291_v25, %v202_v12 }
  0xb2   : > { %v297_v26 = vsel %vm294_vm15, %v293_v24, %v730_v33  ;;  %v292_v27 = vsel %vm290_vm1, %v686_v4, %v188_v23  ;;  %vm509_vm1 = vcmask 257024  }
  0xb3   : > { %594 = vmatprep.subr.mxu1 %v297_v26  ;;  %v296_v29 = vsel %vm294_vm15, %v292_v27, %v203_v61 }
  0xb4   : > { %375 = vmatprep.subr.mxu0 %v296_v29  ;;  %595 = vmatpush3.msra.mxu1 %v297_v26 }
  0xb5   : > { %376 = vmatpush1.msra.mxu0 %v295_v30  ;;  %597 = vmatmul.mubr.msk.f32.vlgmr.msra.gmra.mxu1 %vm332_vm0, %v319_v28 }
  0xb6   : > { %575 = vmatmul.mubr.msk.f32.vlgmr.msra.gmra.mxu0 %vm332_vm0, %v713_v21 }
  0xb7   : > { %415 = vmatprep.mubr.f32.mxu0 %v639_v20 }
  0xba   : > { %576 = vmatmul.mubr.msk.f32.gmra.mxu0 %vm332_vm0, %v319_v28 }
  0xbb   : > { %v330_v0 = vpop.permute.xlu1 %329 }
  0xbd   : > { %v325_v1 = vpop.permute.xlu0 %324 }
 0x175   : > { %v598_v4 = vpop.f32.mrf.mxu1 }
 0x176   : > { %v411_v31 = vpop.f32.mrf.mxu0  ;;  %v494_v32 = vadd.f32 %v598_v4, %v330_v0 }
 0x177   : > { %v412_v33 = vadd.f32 %v411_v31, %v325_v1  ;;  %v488_v34 = vpop.f32.mrf.mxu1 }
 0x178   : > { %v413_v35 = vpop.f32.mrf.mxu0  ;;  %v489_v36 = vadd.f32 %v488_v34, %v325_v1  ;;  %v502_v21 = vmax.f32 %v494_v32, 0.0 }
 0x179   : > { %v497_v37 = vmax.f32 %v412_v33, 0.0  ;;  %v414_v20 = vadd.f32 %v413_v35, %v325_v1 }
 0x17a   : > { %v417_v38 = vpop.f32.mrf.mxu0  ;;  %v499_v39 = vmax.f32 %v489_v36, 0.0  ;;  %510 = vst.msk [vmem:[%s170_s10 + $0x28] sm:$0xf] %vm509_vm1, %v502_v21 }
 0x17b   : > { %503 = vst [vmem:[%s170_s10] sm:$0xff] %v497_v37  ;;  %v498_v40 = vmax.f32 %v414_v20, 0.0  ;;  %v418_v41 = vadd.f32 %v417_v38, %v330_v0 }
 0x17c   : > { %506 = vst.msk [vmem:[%s170_s10 + $0x10] sm:$0xff] %vm505_vm2, %v499_v39  ;;  %v419_v42 = vpop.f32.mrf.mxu0 }
 0x17d   : > { %504 = vst [vmem:[%s170_s10 + $0x8] sm:$0xff] %v498_v40  ;;  %v500_v43 = vmax.f32 %v418_v41, 0.0  ;;  %v420_v44 = vadd.f32 %v419_v42, %v330_v0 }
 0x17f   : > { %507 = vst [vmem:[%s170_s10 + $0x18] sm:$0xf] %v500_v43  ;;  %v501_v45 = vmax.f32 %v420_v44, 0.0 }
 0x181   : > { %508 = vst [vmem:[%s170_s10 + $0x20] sm:$0xf] %v501_v45 }
 0x182 PF: > { %s13_s12 = sadd.s32 1, %s630_s12  }
 0x183   : > { %p10_p4 = scmp.ge.s32.totalorder %s13_s12, 4  }
 0x185   :  { %12 = sbr.rel (!%p10_p4) target bundleno = 1 (0x1), region = 62 }

// kernel: _lambda_.12
= control target key start
LH: loop header
LB: loop body
LE: loop exit
PB: predicated region body
PF: predicated region fallthrough
CT: control target
= control target key end

     0   :  { %s508_s12 = smov 0   ;;  %s570_s0 = inlined_call_operand.vmem [shape: f32[2,12,110], index: 0, kind: input, shape index: {}]   ;;  %s571_s1 = inlined_call_operand.vmem [shape: f32[12,108], index: 1, kind: input, shape index: {}]   ;;  %s572_s2 = inlined_call_operand.vmem [shape: f32[12,1], index: 2, kind: input, shape index: {}]   ;;  %s573_s3 = inlined_call_operand.vmem [shape: f32[2,12,80], index: 3, kind: output, shape index: {}]  }
   0x1 LB: > { %s389_s13 = sadd.s32 4294967295, %s477_s12   ;;  %p393_p0 = scmp.ge.s32.totalorder %s477_s12, 1  ;;  %s477_s12 = sphi %s508_s12, %s13_s12  }
   0x2   : > { %p137_p1 = scmp.lt.s32.totalorder %s477_s12, 3 }
   0x4   : > { %p138_p2 = pnand %p393_p0, %p137_p1 }
   0x5   : > { %p161_p3 = scmp.lt.s32.totalorder (!%p138_p2), %s389_s13, 1  ;;  %s479_s18 = smov (!%p138_p2), 108  }
   0x6   : > { %141 = sbr.rel (%p138_p2) target bundleno = 365 (0x16d), region = 32  ;;  %s480_s19 = smov (!%p138_p2), 106  }
   0x7   : > { %s481_s20 = smov (!%p138_p2), 107   ;;  %s482_s21 = smov (!%p138_p2), 116  }
   0x8   : > { %s483_s22 = smov (!%p138_p2), 117   ;;  %s484_s23 = smov (!%p138_p2), 118  }
   0x9   : > { %s485_s24 = smov (!%p138_p2), 126   ;;  %s487_s27 = smov (!%p138_p2), 127  }
   0xb   : > { %s575_s13 = smov (!%p161_p3, %s389_s13), 1  ;;  %vm175_vm0 = vcmask 1043456   ;;  %v230_v5 = vld [vmem:[%s571_s1] sm:$0xff]  ;;  %vm244_vm1 = vcmask 883712   ;;  %v486_v6 = vmov 0   ;;  %vm332_vm2 = vcmask 650240  }
   0xc   : > { %s403_s14 = sshll.u32 %s575_s13, 4  ;;  %449 = vmatprep.mubr.msk.f32.mxu0 %vm244_vm1, %v230_v5  ;;  %470 = vset.pattern.permute.xlu1 %v486_v6  ;;  %v233_v7 = vld [vmem:[%s572_s2 + $0x8] sm:$0xf]  ;;  %v232_v8 = vld [vmem:[%s572_s2] sm:$0xff]  ;;  %vm330_vm3 = vcmask 654336  }
   0xd   : > { %s165_s17 = scalar_lea.vmem %s570_s0, %s403_s14  ;;  %469 = vset.pattern.permute.xlu0 %v486_v6  ;;  %v231_v29 = vld [vmem:[%s571_s1 + $0x8] sm:$0xf]  ;;  %s170_s9 = scalar_lea.vmem %s573_s3, %s403_s14 }
   0xe   : > { %v524_v0 = vld [vmem:[%s165_s17 + $0x8] sm:$0xf]  ;;  %v526_v1 = vld [vmem:[%s165_s17] sm:$0xff] }
   0xf   : > { %211 = vrot.lane.b32.xlu1 %v524_v0, %s479_s18  ;;  %223 = vrot.lane.b32.xlu0 %v524_v0, %s480_s19  ;;  %v176_v2 = vrot.slane %v526_v1, 4  ;;  %v177_v3 = vrot.slane %v524_v0, 4 }
  0x11   : > { %v178_v4 = vsel %vm175_vm0, %v176_v2, %v177_v3 }
  0x13   : > { %209 = vrot.lane.b32.xlu1 %v526_v1, %s479_s18  ;;  %221 = vrot.lane.b32.xlu0 %v526_v1, %s480_s19 }
  0x17   : > { %215 = vrot.lane.b32.xlu0 %v176_v2, %s481_s20  ;;  %217 = vrot.lane.b32.xlu1 %v178_v4, %s481_s20 }
  0x1b   : > { %205 = vrot.lane.b32.xlu0 %v178_v4, %s482_s21  ;;  %199 = vrot.lane.b32.xlu1 %v524_v0, %s483_s22 }
  0x1f   : > { %203 = vrot.lane.b32.xlu0 %v176_v2, %s482_s21  ;;  %197 = vrot.lane.b32.xlu1 %v526_v1, %s483_s22 }
  0x23   : > { %193 = vrot.lane.b32.xlu0 %v178_v4, %s484_s23  ;;  %187 = vrot.lane.b32.xlu1 %v524_v0, %s485_s24 }
  0x27   : > { %191 = vrot.lane.b32.xlu0 %v176_v2, %s484_s23  ;;  %185 = vrot.lane.b32.xlu1 %v526_v1, %s485_s24 }
  0x2b   : > { %181 = vrot.lane.b32.xlu0 %v178_v4, %s487_s27  ;;  %179 = vrot.lane.b32.xlu1 %v176_v2, %s487_s27 }
  0x2f   : > { %241 = vperm.xlu1 %470, %v233_v7   ;;  %236 = vperm.xlu0 %469, %v232_v8  }
  0x81   : > { %v212_v9 = vpop.permute.xlu1 %211  ;;  %v224_v10 = vpop.permute.xlu0 %223 }
  0x82   : > { %421 = vmatprep.subr.msk.mxu0 %vm175_vm0, %v224_v10 }
  0x83   : > { %422 = vmatpush3.msk.msra.mxu0 %vm175_vm0, %v224_v10 }
  0x85   : > { %v210_v11 = vpop.permute.xlu1 %209  ;;  %v222_v12 = vpop.permute.xlu0 %221 }
  0x86   : > { %423 = vmatprep.subr.mxu0 %v222_v12 }
  0x87   : > { %424 = vmatpush3.msra.mxu0 %v222_v12 }
  0x89   : > { %v216_v13 = vpop.permute.xlu0 %215  ;;  %v218_v14 = vpop.permute.xlu1 %217 }
  0x8a   : > { %425 = vmatprep.subr.mxu0 %v218_v14  ;;  %v229_v15 = vsel %vm175_vm0, %v212_v9, %v216_v13 }
  0x8b   : > { %426 = vmatpush3.msra.mxu0 %v218_v14 }
  0x8c   : > { %427 = vmatprep.subr.mxu0 %v229_v15 }
  0x8d   : > { %v206_v16 = vpop.permute.xlu0 %205  ;;  %428 = vmatpush3.msra.mxu0 %v229_v15  ;;  %v200_v17 = vpop.permute.xlu1 %199 }
  0x8e   : > { %429 = vmatprep.subr.mxu0 %v210_v11 }
  0x8f   : > { %430 = vmatpush3.msra.mxu0 %v210_v11 }
  0x90   : > { %431 = vmatprep.subr.mxu0 %v206_v16 }
  0x91   : > { %v204_v18 = vpop.permute.xlu0 %203  ;;  %432 = vmatpush3.msra.mxu0 %v206_v16  ;;  %v198_v19 = vpop.permute.xlu1 %197 }
  0x92   : > { %v228_v20 = vsel %vm175_vm0, %v200_v17, %v204_v18 }
  0x93   : > { %433 = vmatprep.subr.mxu0 %v228_v20 }
  0x94   : > { %434 = vmatpush3.msra.mxu0 %v228_v20 }
  0x95   : > { %v194_v21 = vpop.permute.xlu0 %193  ;;  %435 = vmatprep.subr.mxu0 %v198_v19  ;;  %v188_v22 = vpop.permute.xlu1 %187 }
  0x96   : > { %436 = vmatpush3.msra.mxu0 %v198_v19 }
  0x97   : > { %437 = vmatprep.subr.mxu0 %v194_v21 }
  0x98   : > { %438 = vmatpush3.msra.mxu0 %v194_v21 }
  0x99   : > { %v192_v23 = vpop.permute.xlu0 %191  ;;  %v186_v24 = vpop.permute.xlu1 %185 }
  0x9a   : > { %v227_v25 = vsel %vm175_vm0, %v188_v22, %v192_v23 }
  0x9b   : > { %439 = vmatprep.subr.mxu0 %v227_v25 }
  0x9c   : > { %440 = vmatpush3.msra.mxu0 %v227_v25 }
  0x9d   : > { %441 = vmatprep.subr.mxu0 %v186_v24  ;;  %v182_v26 = vpop.permute.xlu0 %181  ;;  %v180_v27 = vpop.permute.xlu1 %179 }
  0x9e   : > { %442 = vmatpush3.msra.mxu0 %v186_v24  ;;  %v226_v28 = vsel %vm175_vm0, %v524_v0, %v180_v27 }
  0x9f   : > { %443 = vmatprep.subr.mxu0 %v182_v26 }
  0xa0   : > { %444 = vmatpush3.msra.mxu0 %v182_v26 }
  0xa1   : > { %445 = vmatprep.subr.mxu0 %v226_v28 }
  0xa2   : > { %446 = vmatpush3.msra.mxu0 %v226_v28 }
  0xa3   : > { %447 = vmatprep.subr.mxu0 %v526_v1 }
  0xa4   : > { %448 = vmatpush3.msra.mxu0 %v526_v1 }
  0xa5   : > { %450 = vmatmul.mubr.msk.f32.vlgmr.msra.gmra.mxu0 %vm244_vm1, %v231_v29 }
  0xaa   : > { %v242_v30 = vpop.permute.xlu1 %241  ;;  %v237_v32 = vpop.permute.xlu0 %236 }
 0x165   : > { %v451_v31 = vpop.f32.mrf.mxu0 }
 0x166   : > { %v325_v33 = vadd.f32 %v451_v31, %v242_v30 }
 0x167   : > { %v319_v34 = vpop.f32.mrf.mxu0 }
 0x168   : > { %v329_v35 = vmax.f32 %v325_v33, 0.0  ;;  %v320_v36 = vadd.f32 %v319_v34, %v237_v32 }
 0x16a   : > { %333 = vst.msk [vmem:[%s170_s9 + $0x8] sm:$0xf] %vm332_vm2, %v329_v35  ;;  %v328_v37 = vmax.f32 %v320_v36, 0.0 }
 0x16c   : > { %331 = vst.msk [vmem:[%s170_s9] sm:$0xff] %vm330_vm3, %v328_v37 }
 0x16d PF: > { %s13_s12 = sadd.s32 1, %s477_s12  }
 0x16e   : > { %p10_p4 = scmp.ge.s32.totalorder %s13_s12, 4  }
 0x170   :  { %12 = sbr.rel (!%p10_p4) target bundleno = 1 (0x1), region = 62 }

// kernel: _lambda_.13
= control target key start
LH: loop header
LB: loop body
LE: loop exit
PB: predicated region body
PF: predicated region fallthrough
CT: control target
= control target key end

     0   :  { %s508_s12 = smov 0   ;;  %s570_s0 = inlined_call_operand.vmem [shape: f32[2,12,42], index: 0, kind: input, shape index: {}]   ;;  %s571_s1 = inlined_call_operand.vmem [shape: f32[12,108], index: 1, kind: input, shape index: {}]   ;;  %s572_s2 = inlined_call_operand.vmem [shape: f32[12,1], index: 2, kind: input, shape index: {}]   ;;  %s573_s3 = inlined_call_operand.vmem [shape: f32[2,12,24], index: 3, kind: output, shape index: {}]  }
   0x1 LB: > { %s389_s13 = sadd.s32 4294967295, %s477_s12   ;;  %p393_p0 = scmp.ge.s32.totalorder %s477_s12, 1  ;;  %s477_s12 = sphi %s508_s12, %s13_s12  }
   0x2   : > { %p137_p1 = scmp.lt.s32.totalorder %s477_s12, 3 }
   0x4   : > { %p138_p2 = pnand %p393_p0, %p137_p1 }
   0x5   : > { %p161_p3 = scmp.lt.s32.totalorder (!%p138_p2), %s389_s13, 1  ;;  %s479_s18 = smov (!%p138_p2), 116  }
   0x6   : > { %141 = sbr.rel (%p138_p2) target bundleno = 365 (0x16d), region = 32  ;;  %s480_s19 = smov (!%p138_p2), 114  }
   0x7   : > { %s481_s20 = smov (!%p138_p2), 115   ;;  %s482_s21 = smov (!%p138_p2), 120  }
   0x8   : > { %s483_s22 = smov (!%p138_p2), 121   ;;  %s484_s23 = smov (!%p138_p2), 122  }
   0x9   : > { %s485_s24 = smov (!%p138_p2), 126   ;;  %s487_s27 = smov (!%p138_p2), 127  }
   0xb   : > { %s575_s13 = smov (!%p161_p3, %s389_s13), 1  ;;  %vm175_vm0 = vcmask 1043456   ;;  %v230_v5 = vld [vmem:[%s571_s1] sm:$0xff]  ;;  %vm244_vm1 = vcmask 883712   ;;  %v486_v6 = vmov 0   ;;  %vm332_vm2 = vcmask 191488  }
   0xc   : > { %s403_s14 = sshll.u32 %s575_s13, 4  ;;  %449 = vmatprep.mubr.msk.f32.mxu0 %vm244_vm1, %v230_v5  ;;  %470 = vset.pattern.permute.xlu1 %v486_v6  ;;  %v233_v7 = vld [vmem:[%s572_s2 + $0x8] sm:$0xf]  ;;  %v232_v8 = vld [vmem:[%s572_s2] sm:$0xff]  ;;  %vm330_vm3 = vcmask 195584  }
   0xd   : > { %s165_s17 = scalar_lea.vmem %s570_s0, %s403_s14  ;;  %469 = vset.pattern.permute.xlu0 %v486_v6  ;;  %v231_v29 = vld [vmem:[%s571_s1 + $0x8] sm:$0xf]  ;;  %s170_s9 = scalar_lea.vmem %s573_s3, %s403_s14 }
   0xe   : > { %v524_v0 = vld [vmem:[%s165_s17 + $0x8] sm:$0xf]  ;;  %v526_v1 = vld [vmem:[%s165_s17] sm:$0xff] }
   0xf   : > { %211 = vrot.lane.b32.xlu1 %v524_v0, %s479_s18  ;;  %223 = vrot.lane.b32.xlu0 %v524_v0, %s480_s19  ;;  %v176_v2 = vrot.slane %v526_v1, 4  ;;  %v177_v3 = vrot.slane %v524_v0, 4 }
  0x11   : > { %v178_v4 = vsel %vm175_vm0, %v176_v2, %v177_v3 }
  0x13   : > { %209 = vrot.lane.b32.xlu1 %v526_v1, %s479_s18  ;;  %221 = vrot.lane.b32.xlu0 %v526_v1, %s480_s19 }
  0x17   : > { %215 = vrot.lane.b32.xlu0 %v176_v2, %s481_s20  ;;  %217 = vrot.lane.b32.xlu1 %v178_v4, %s481_s20 }
  0x1b   : > { %205 = vrot.lane.b32.xlu0 %v178_v4, %s482_s21  ;;  %199 = vrot.lane.b32.xlu1 %v524_v0, %s483_s22 }
  0x1f   : > { %203 = vrot.lane.b32.xlu0 %v176_v2, %s482_s21  ;;  %197 = vrot.lane.b32.xlu1 %v526_v1, %s483_s22 }
  0x23   : > { %193 = vrot.lane.b32.xlu0 %v178_v4, %s484_s23  ;;  %187 = vrot.lane.b32.xlu1 %v524_v0, %s485_s24 }
  0x27   : > { %191 = vrot.lane.b32.xlu0 %v176_v2, %s484_s23  ;;  %185 = vrot.lane.b32.xlu1 %v526_v1, %s485_s24 }
  0x2b   : > { %181 = vrot.lane.b32.xlu0 %v178_v4, %s487_s27  ;;  %179 = vrot.lane.b32.xlu1 %v176_v2, %s487_s27 }
  0x2f   : > { %241 = vperm.xlu1 %470, %v233_v7   ;;  %236 = vperm.xlu0 %469, %v232_v8  }
  0x81   : > { %v212_v9 = vpop.permute.xlu1 %211  ;;  %v224_v10 = vpop.permute.xlu0 %223 }
  0x82   : > { %421 = vmatprep.subr.msk.mxu0 %vm175_vm0, %v224_v10 }
  0x83   : > { %422 = vmatpush3.msk.msra.mxu0 %vm175_vm0, %v224_v10 }
  0x85   : > { %v210_v11 = vpop.permute.xlu1 %209  ;;  %v222_v12 = vpop.permute.xlu0 %221 }
  0x86   : > { %423 = vmatprep.subr.mxu0 %v222_v12 }
  0x87   : > { %424 = vmatpush3.msra.mxu0 %v222_v12 }
  0x89   : > { %v216_v13 = vpop.permute.xlu0 %215  ;;  %v218_v14 = vpop.permute.xlu1 %217 }
  0x8a   : > { %425 = vmatprep.subr.mxu0 %v218_v14  ;;  %v229_v15 = vsel %vm175_vm0, %v212_v9, %v216_v13 }
  0x8b   : > { %426 = vmatpush3.msra.mxu0 %v218_v14 }
  0x8c   : > { %427 = vmatprep.subr.mxu0 %v229_v15 }
  0x8d   : > { %v206_v16 = vpop.permute.xlu0 %205  ;;  %428 = vmatpush3.msra.mxu0 %v229_v15  ;;  %v200_v17 = vpop.permute.xlu1 %199 }
  0x8e   : > { %429 = vmatprep.subr.mxu0 %v210_v11 }
  0x8f   : > { %430 = vmatpush3.msra.mxu0 %v210_v11 }
  0x90   : > { %431 = vmatprep.subr.mxu0 %v206_v16 }
  0x91   : > { %v204_v18 = vpop.permute.xlu0 %203  ;;  %432 = vmatpush3.msra.mxu0 %v206_v16  ;;  %v198_v19 = vpop.permute.xlu1 %197 }
  0x92   : > { %v228_v20 = vsel %vm175_vm0, %v200_v17, %v204_v18 }
  0x93   : > { %433 = vmatprep.subr.mxu0 %v228_v20 }
  0x94   : > { %434 = vmatpush3.msra.mxu0 %v228_v20 }
  0x95   : > { %v194_v21 = vpop.permute.xlu0 %193  ;;  %435 = vmatprep.subr.mxu0 %v198_v19  ;;  %v188_v22 = vpop.permute.xlu1 %187 }
  0x96   : > { %436 = vmatpush3.msra.mxu0 %v198_v19 }
  0x97   : > { %437 = vmatprep.subr.mxu0 %v194_v21 }
  0x98   : > { %438 = vmatpush3.msra.mxu0 %v194_v21 }
  0x99   : > { %v192_v23 = vpop.permute.xlu0 %191  ;;  %v186_v24 = vpop.permute.xlu1 %185 }
  0x9a   : > { %v227_v25 = vsel %vm175_vm0, %v188_v22, %v192_v23 }
  0x9b   : > { %439 = vmatprep.subr.mxu0 %v227_v25 }
  0x9c   : > { %440 = vmatpush3.msra.mxu0 %v227_v25 }
  0x9d   : > { %441 = vmatprep.subr.mxu0 %v186_v24  ;;  %v182_v26 = vpop.permute.xlu0 %181  ;;  %v180_v27 = vpop.permute.xlu1 %179 }
  0x9e   : > { %442 = vmatpush3.msra.mxu0 %v186_v24  ;;  %v226_v28 = vsel %vm175_vm0, %v524_v0, %v180_v27 }
  0x9f   : > { %443 = vmatprep.subr.mxu0 %v182_v26 }
  0xa0   : > { %444 = vmatpush3.msra.mxu0 %v182_v26 }
  0xa1   : > { %445 = vmatprep.subr.mxu0 %v226_v28 }
  0xa2   : > { %446 = vmatpush3.msra.mxu0 %v226_v28 }
  0xa3   : > { %447 = vmatprep.subr.mxu0 %v526_v1 }
  0xa4   : > { %448 = vmatpush3.msra.mxu0 %v526_v1 }
  0xa5   : > { %450 = vmatmul.mubr.msk.f32.vlgmr.msra.gmra.mxu0 %vm244_vm1, %v231_v29 }
  0xaa   : > { %v242_v30 = vpop.permute.xlu1 %241  ;;  %v237_v32 = vpop.permute.xlu0 %236 }
 0x165   : > { %v451_v31 = vpop.f32.mrf.mxu0 }
 0x166   : > { %v325_v33 = vadd.f32 %v451_v31, %v242_v30 }
 0x167   : > { %v319_v34 = vpop.f32.mrf.mxu0 }
 0x168   : > { %v329_v35 = vmax.f32 %v325_v33, 0.0  ;;  %v320_v36 = vadd.f32 %v319_v34, %v237_v32 }
 0x16a   : > { %333 = vst.msk [vmem:[%s170_s9 + $0x8] sm:$0xf] %vm332_vm2, %v329_v35  ;;  %v328_v37 = vmax.f32 %v320_v36, 0.0 }
 0x16c   : > { %331 = vst.msk [vmem:[%s170_s9] sm:$0xff] %vm330_vm3, %v328_v37 }
 0x16d PF: > { %s13_s12 = sadd.s32 1, %s477_s12  }
 0x16e   : > { %p10_p4 = scmp.ge.s32.totalorder %s13_s12, 4  }
 0x170   :  { %12 = sbr.rel (!%p10_p4) target bundleno = 1 (0x1), region = 62 }

// kernel: _lambda_.14
= control target key start
LH: loop header
LB: loop body
LE: loop exit
PB: predicated region body
PF: predicated region fallthrough
CT: control target
= control target key end

     0   :  { %s508_s12 = smov 0   ;;  %s570_s0 = inlined_call_operand.vmem [shape: f32[2,12,20], index: 0, kind: input, shape index: {}]   ;;  %s571_s1 = inlined_call_operand.vmem [shape: f32[12,108], index: 1, kind: input, shape index: {}]   ;;  %s572_s2 = inlined_call_operand.vmem [shape: f32[12,1], index: 2, kind: input, shape index: {}]   ;;  %s573_s3 = inlined_call_operand.vmem [shape: f32[2,12,8], index: 3, kind: output, shape index: {}]  }
   0x1 LB: > { %s389_s13 = sadd.s32 4294967295, %s477_s12   ;;  %p393_p0 = scmp.ge.s32.totalorder %s477_s12, 1  ;;  %s477_s12 = sphi %s508_s12, %s13_s12  }
   0x2   : > { %p137_p1 = scmp.lt.s32.totalorder %s477_s12, 3 }
   0x4   : > { %p138_p2 = pnand %p393_p0, %p137_p1 }
   0x5   : > { %p161_p3 = scmp.lt.s32.totalorder (!%p138_p2), %s389_s13, 1  ;;  %s479_s18 = smov (!%p138_p2), 120  }
   0x6   : > { %141 = sbr.rel (%p138_p2) target bundleno = 365 (0x16d), region = 32  ;;  %s480_s19 = smov (!%p138_p2), 118  }
   0x7   : > { %s481_s20 = smov (!%p138_p2), 119   ;;  %s482_s21 = smov (!%p138_p2), 122  }
   0x8   : > { %s483_s22 = smov (!%p138_p2), 123   ;;  %s484_s23 = smov (!%p138_p2), 124  }
   0x9   : > { %s485_s24 = smov (!%p138_p2), 126   ;;  %s487_s27 = smov (!%p138_p2), 127  }
   0xb   : > { %s575_s13 = smov (!%p161_p3, %s389_s13), 1  ;;  %vm175_vm0 = vcmask 1043456   ;;  %v230_v5 = vld [vmem:[%s571_s1] sm:$0xff]  ;;  %vm244_vm1 = vcmask 883712   ;;  %v486_v6 = vmov 0   ;;  %vm332_vm2 = vcmask 60416  }
   0xc   : > { %s403_s14 = sshll.u32 %s575_s13, 4  ;;  %449 = vmatprep.mubr.msk.f32.mxu0 %vm244_vm1, %v230_v5  ;;  %470 = vset.pattern.permute.xlu1 %v486_v6  ;;  %v233_v7 = vld [vmem:[%s572_s2 + $0x8] sm:$0xf]  ;;  %v232_v8 = vld [vmem:[%s572_s2] sm:$0xff]  ;;  %vm330_vm3 = vcmask 64512  }
   0xd   : > { %s165_s17 = scalar_lea.vmem %s570_s0, %s403_s14  ;;  %469 = vset.pattern.permute.xlu0 %v486_v6  ;;  %v231_v29 = vld [vmem:[%s571_s1 + $0x8] sm:$0xf]  ;;  %s170_s9 = scalar_lea.vmem %s573_s3, %s403_s14 }
   0xe   : > { %v524_v0 = vld [vmem:[%s165_s17 + $0x8] sm:$0xf]  ;;  %v526_v1 = vld [vmem:[%s165_s17] sm:$0xff] }
   0xf   : > { %211 = vrot.lane.b32.xlu1 %v524_v0, %s479_s18  ;;  %223 = vrot.lane.b32.xlu0 %v524_v0, %s480_s19  ;;  %v176_v2 = vrot.slane %v526_v1, 4  ;;  %v177_v3 = vrot.slane %v524_v0, 4 }
  0x11   : > { %v178_v4 = vsel %vm175_vm0, %v176_v2, %v177_v3 }
  0x13   : > { %209 = vrot.lane.b32.xlu1 %v526_v1, %s479_s18  ;;  %221 = vrot.lane.b32.xlu0 %v526_v1, %s480_s19 }
  0x17   : > { %215 = vrot.lane.b32.xlu0 %v176_v2, %s481_s20  ;;  %217 = vrot.lane.b32.xlu1 %v178_v4, %s481_s20 }
  0x1b   : > { %205 = vrot.lane.b32.xlu0 %v178_v4, %s482_s21  ;;  %199 = vrot.lane.b32.xlu1 %v524_v0, %s483_s22 }
  0x1f   : > { %203 = vrot.lane.b32.xlu0 %v176_v2, %s482_s21  ;;  %197 = vrot.lane.b32.xlu1 %v526_v1, %s483_s22 }
  0x23   : > { %193 = vrot.lane.b32.xlu0 %v178_v4, %s484_s23  ;;  %187 = vrot.lane.b32.xlu1 %v524_v0, %s485_s24 }
  0x27   : > { %191 = vrot.lane.b32.xlu0 %v176_v2, %s484_s23  ;;  %185 = vrot.lane.b32.xlu1 %v526_v1, %s485_s24 }
  0x2b   : > { %181 = vrot.lane.b32.xlu0 %v178_v4, %s487_s27  ;;  %179 = vrot.lane.b32.xlu1 %v176_v2, %s487_s27 }
  0x2f   : > { %241 = vperm.xlu1 %470, %v233_v7   ;;  %236 = vperm.xlu0 %469, %v232_v8  }
  0x81   : > { %v212_v9 = vpop.permute.xlu1 %211  ;;  %v224_v10 = vpop.permute.xlu0 %223 }
  0x82   : > { %421 = vmatprep.subr.msk.mxu0 %vm175_vm0, %v224_v10 }
  0x83   : > { %422 = vmatpush3.msk.msra.mxu0 %vm175_vm0, %v224_v10 }
  0x85   : > { %v210_v11 = vpop.permute.xlu1 %209  ;;  %v222_v12 = vpop.permute.xlu0 %221 }
  0x86   : > { %423 = vmatprep.subr.mxu0 %v222_v12 }
  0x87   : > { %424 = vmatpush3.msra.mxu0 %v222_v12 }
  0x89   : > { %v216_v13 = vpop.permute.xlu0 %215  ;;  %v218_v14 = vpop.permute.xlu1 %217 }
  0x8a   : > { %425 = vmatprep.subr.mxu0 %v218_v14  ;;  %v229_v15 = vsel %vm175_vm0, %v212_v9, %v216_v13 }
  0x8b   : > { %426 = vmatpush3.msra.mxu0 %v218_v14 }
  0x8c   : > { %427 = vmatprep.subr.mxu0 %v229_v15 }
  0x8d   : > { %v206_v16 = vpop.permute.xlu0 %205  ;;  %428 = vmatpush3.msra.mxu0 %v229_v15  ;;  %v200_v17 = vpop.permute.xlu1 %199 }
  0x8e   : > { %429 = vmatprep.subr.mxu0 %v210_v11 }
  0x8f   : > { %430 = vmatpush3.msra.mxu0 %v210_v11 }
  0x90   : > { %431 = vmatprep.subr.mxu0 %v206_v16 }
  0x91   : > { %v204_v18 = vpop.permute.xlu0 %203  ;;  %432 = vmatpush3.msra.mxu0 %v206_v16  ;;  %v198_v19 = vpop.permute.xlu1 %197 }
  0x92   : > { %v228_v20 = vsel %vm175_vm0, %v200_v17, %v204_v18 }
  0x93   : > { %433 = vmatprep.subr.mxu0 %v228_v20 }
  0x94   : > { %434 = vmatpush3.msra.mxu0 %v228_v20 }
  0x95   : > { %v194_v21 = vpop.permute.xlu0 %193  ;;  %435 = vmatprep.subr.mxu0 %v198_v19  ;;  %v188_v22 = vpop.permute.xlu1 %187 }
  0x96   : > { %436 = vmatpush3.msra.mxu0 %v198_v19 }
  0x97   : > { %437 = vmatprep.subr.mxu0 %v194_v21 }
  0x98   : > { %438 = vmatpush3.msra.mxu0 %v194_v21 }
  0x99   : > { %v192_v23 = vpop.permute.xlu0 %191  ;;  %v186_v24 = vpop.permute.xlu1 %185 }
  0x9a   : > { %v227_v25 = vsel %vm175_vm0, %v188_v22, %v192_v23 }
  0x9b   : > { %439 = vmatprep.subr.mxu0 %v227_v25 }
  0x9c   : > { %440 = vmatpush3.msra.mxu0 %v227_v25 }
  0x9d   : > { %441 = vmatprep.subr.mxu0 %v186_v24  ;;  %v182_v26 = vpop.permute.xlu0 %181  ;;  %v180_v27 = vpop.permute.xlu1 %179 }
  0x9e   : > { %442 = vmatpush3.msra.mxu0 %v186_v24  ;;  %v226_v28 = vsel %vm175_vm0, %v524_v0, %v180_v27 }
  0x9f   : > { %443 = vmatprep.subr.mxu0 %v182_v26 }
  0xa0   : > { %444 = vmatpush3.msra.mxu0 %v182_v26 }
  0xa1   : > { %445 = vmatprep.subr.mxu0 %v226_v28 }
  0xa2   : > { %446 = vmatpush3.msra.mxu0 %v226_v28 }
  0xa3   : > { %447 = vmatprep.subr.mxu0 %v526_v1 }
  0xa4   : > { %448 = vmatpush3.msra.mxu0 %v526_v1 }
  0xa5   : > { %450 = vmatmul.mubr.msk.f32.vlgmr.msra.gmra.mxu0 %vm244_vm1, %v231_v29 }
  0xaa   : > { %v242_v30 = vpop.permute.xlu1 %241  ;;  %v237_v32 = vpop.permute.xlu0 %236 }
 0x165   : > { %v451_v31 = vpop.f32.mrf.mxu0 }
 0x166   : > { %v325_v33 = vadd.f32 %v451_v31, %v242_v30 }
 0x167   : > { %v319_v34 = vpop.f32.mrf.mxu0 }
 0x168   : > { %v329_v35 = vmax.f32 %v325_v33, 0.0  ;;  %v320_v36 = vadd.f32 %v319_v34, %v237_v32 }
 0x16a   : > { %333 = vst.msk [vmem:[%s170_s9 + $0x8] sm:$0xf] %vm332_vm2, %v329_v35  ;;  %v328_v37 = vmax.f32 %v320_v36, 0.0 }
 0x16c   : > { %331 = vst.msk [vmem:[%s170_s9] sm:$0xff] %vm330_vm3, %v328_v37 }
 0x16d PF: > { %s13_s12 = sadd.s32 1, %s477_s12  }
 0x16e   : > { %p10_p4 = scmp.ge.s32.totalorder %s13_s12, 4  }
 0x170   :  { %12 = sbr.rel (!%p10_p4) target bundleno = 1 (0x1), region = 62 }

// kernel: _lambda_.16
= control target key start
LH: loop header
LB: loop body
LE: loop exit
PB: predicated region body
PF: predicated region fallthrough
CT: control target
= control target key end

     0   :  { %s649_s15 = smov 0   ;;  %s835_s0 = inlined_call_operand.vmem [shape: f32[2,12,20], index: 0, kind: input, shape index: {}]   ;;  %s836_s1 = inlined_call_operand.vmem [shape: f32[2,12,20], index: 1, kind: input, shape index: {}]   ;;  %s837_s2 = inlined_call_operand.vmem [shape: f32[12,216], index: 2, kind: input, shape index: {}]   ;;  %s838_s3 = inlined_call_operand.vmem [shape: f32[12,1], index: 3, kind: input, shape index: {}]   ;;  %s839_s4 = inlined_call_operand.vmem [shape: f32[2,12,8], index: 4, kind: output, shape index: {}]  }
   0x1 LB: > { %s514_s16 = sadd.s32 4294967295, %s612_s15   ;;  %p518_p0 = scmp.ge.s32.totalorder %s612_s15, 1  ;;  %s612_s15 = sphi %s649_s15, %s14_s15  }
   0x2   : > { %p172_p1 = scmp.lt.s32.totalorder %s612_s15, 3 }
   0x4   : > { %p173_p2 = pnand %p518_p0, %p172_p1 }
   0x5   : > { %p203_p3 = scmp.lt.s32.totalorder (!%p173_p2), %s514_s16, 1  ;;  %s614_s24 = smov (!%p173_p2), 127  }
   0x6   : > { %176 = sbr.rel (%p173_p2) target bundleno = 474 (0x1da), region = 36  ;;  %s615_s25 = smov (!%p173_p2), 118  }
   0x7   : > { %s616_s26 = smov (!%p173_p2), 119   ;;  %s617_s27 = smov (!%p173_p2), 120  }
   0x8   : > { %s618_s28 = smov (!%p173_p2), 122   ;;  %s620_s29 = smov (!%p173_p2), 123  }
   0x9   : > { %s621_s30 = smov (!%p173_p2), 124   ;;  %s622_s5 = smov (!%p173_p2), 126  }
   0xb   : > { %s841_s16 = smov (!%p203_p3, %s514_s16), 1  ;;  %vm224_vm0 = vcmask 1043456   ;;  %v619_v10 = vmov 0.0   ;;  %v344_v30 = vld [vmem:[%s837_s2 + $0x8] sm:$0xff]  ;;  %vm359_vm1 = vcmask 719872   ;;  %v623_v35 = vmov 0  }
   0xc   : > { %s657_s17 = sshll.u32 %s841_s16, 4  ;;  %366 = vmatprep.subr.mxu0 %v619_v10  ;;  %532 = vmatprep.subr.mxu1 %v619_v10  ;;  %v346_v33 = vld [vmem:[%s837_s2 + $0x18] sm:$0xf]  ;;  %v348_v37 = vld [vmem:[%s838_s3 + $0x8] sm:$0xf]  ;;  %v347_v40 = vld [vmem:[%s838_s3] sm:$0xff] }
   0xd   : > { %s212_s20 = scalar_lea.vmem %s836_s1, %s657_s17  ;;  %s207_s23 = scalar_lea.vmem %s835_s0, %s657_s17  ;;  %525 = vmatprep.mubr.msk.f32.mxu0 %vm359_vm1, %v344_v30  ;;  %526 = vmatprep.mubr.msk.f32.mxu1 %vm359_vm1, %v346_v33  ;;  %v343_v57 = vld [vmem:[%s837_s2] sm:$0xff]  ;;  %v345_v58 = vld [vmem:[%s837_s2 + $0x10] sm:$0xf]  ;;  %vm445_vm2 = vcmask 60416   ;;  %vm443_vm3 = vcmask 64512  }
   0xe   : > { %v667_v0 = vld [vmem:[%s212_s20] sm:$0xff]  ;;  %v669_v1 = vld [vmem:[%s212_s20 + $0x8] sm:$0xf]  ;;  %605 = vset.pattern.permute.xlu0 %v623_v35  ;;  %604 = vset.pattern.permute.xlu1 %v623_v35  ;;  %s217_s22 = scalar_lea.vmem %s839_s4, %s657_s17 }
   0xf   : > { %v671_v2 = vld [vmem:[%s207_s23 + $0x8] sm:$0xf]  ;;  %v674_v3 = vrot.slane %v667_v0, 4  ;;  %v279_v4 = vrot.slane %v669_v1, 4  ;;  %283 = vrot.lane.b32.xlu1 %v667_v0, %s614_s24  ;;  %v679_v5 = vld [vmem:[%s207_s23] sm:$0xff] }
  0x10   : > { %v225_v6 = vrot.slane %v679_v5, 4  ;;  %v226_v7 = vrot.slane %v671_v2, 4 }
  0x11   : > { %v685_v8 = vsel %vm224_vm0, %v674_v3, %v279_v4 }
  0x12   : > { %329 = vrot.lane.b32.xlu0 %v685_v8, %s614_s24  ;;  %v227_v9 = vsel %vm224_vm0, %v225_v6, %v226_v7 }
  0x13   : > { %272 = vrot.lane.b32.xlu1 %v671_v2, %s615_s25 }
  0x16   : > { %327 = vrot.lane.b32.xlu0 %v674_v3, %s614_s24 }
  0x17   : > { %266 = vrot.lane.b32.xlu1 %v227_v9, %s616_s26 }
  0x1a   : > { %270 = vrot.lane.b32.xlu0 %v679_v5, %s615_s25 }
  0x1b   : > { %264 = vrot.lane.b32.xlu1 %v225_v6, %s616_s26 }
  0x1e   : > { %260 = vrot.lane.b32.xlu0 %v671_v2, %s617_s27 }
  0x1f   : > { %254 = vrot.lane.b32.xlu1 %v227_v9, %s618_s28 }
  0x22   : > { %258 = vrot.lane.b32.xlu0 %v679_v5, %s617_s27 }
  0x23   : > { %252 = vrot.lane.b32.xlu1 %v225_v6, %s618_s28 }
  0x26   : > { %248 = vrot.lane.b32.xlu0 %v671_v2, %s620_s29 }
  0x27   : > { %242 = vrot.lane.b32.xlu1 %v227_v9, %s621_s30 }
  0x2a   : > { %246 = vrot.lane.b32.xlu0 %v679_v5, %s620_s29 }
  0x2b   : > { %240 = vrot.lane.b32.xlu1 %v225_v6, %s621_s30 }
  0x2e   : > { %236 = vrot.lane.b32.xlu0 %v671_v2, %s622_s5 }
  0x2f   : > { %230 = vrot.lane.b32.xlu1 %v227_v9, %s614_s24 }
  0x32   : > { %234 = vrot.lane.b32.xlu0 %v679_v5, %s622_s5 }
  0x33   : > { %334 = vrot.lane.b32.xlu1 %v667_v0, %s616_s26 }
  0x36   : > { %228 = vrot.lane.b32.xlu0 %v225_v6, %s614_s24 }
  0x3a   : > { %315 = vrot.lane.b32.xlu0 %v685_v8, %s617_s27 }
  0x81   : > { %v284_v11 = vpop.permute.xlu1 %283 }
  0x82   : > { %367 = vmatpush1.msra.mxu0 %v284_v11  ;;  %559 = vmatpush1.msra.mxu1 %v284_v11 }
  0x83   : > { %368 = vmatprep.subr.mxu0 %v619_v10  ;;  %533 = vmatprep.subr.mxu1 %v619_v10 }
  0x84   : > { %v330_v12 = vpop.permute.xlu0 %329  ;;  %369 = vmatpush1.msra.mxu0 %v685_v8  ;;  %560 = vmatpush1.msra.mxu1 %v685_v8 }
  0x85   : > { %338 = vrot.lane.b32.xlu1 %v330_v12, %s616_s26  ;;  %v273_v13 = vpop.permute.xlu1 %272  ;;  %370 = vmatprep.subr.mxu0 %v619_v10 }
  0x86   : > { %534 = vmatprep.subr.mxu1 %v619_v10  ;;  %v323_v14 = vsel %vm224_vm0, %v273_v13, %v674_v3 }
  0x87   : > { %371 = vmatpush1.msra.mxu0 %v323_v14  ;;  %561 = vmatpush1.msra.mxu1 %v323_v14 }
  0x88   : > { %v328_v15 = vpop.permute.xlu0 %327  ;;  %372 = vmatprep.subr.mxu0 %v619_v10  ;;  %535 = vmatprep.subr.mxu1 %v619_v10 }
  0x89   : > { %v332_v16 = vsel %vm224_vm0, %v669_v1, %v328_v15  ;;  %309 = vrot.lane.b32.xlu1 %v669_v1, %s618_s28  ;;  %v267_v17 = vpop.permute.xlu1 %266 }
  0x8a   : > { %336 = vrot.lane.b32.xlu0 %v332_v16, %s616_s26 }
  0x8c   : > { %v271_v18 = vpop.permute.xlu0 %270 }
  0x8d   : > { %307 = vrot.lane.b32.xlu1 %v667_v0, %s618_s28  ;;  %373 = vmatpush1.msra.mxu0 %v271_v18  ;;  %v265_v19 = vpop.permute.xlu1 %264 }
  0x8e   : > { %313 = vrot.lane.b32.xlu0 %v674_v3, %s617_s27  ;;  %562 = vmatpush1.msra.mxu1 %v271_v18 }
  0x8f   : > { %374 = vmatprep.subr.mxu0 %v619_v10  ;;  %536 = vmatprep.subr.mxu1 %v619_v10 }
  0x90   : > { %v261_v20 = vpop.permute.xlu0 %260  ;;  %375 = vmatpush1.msra.mxu0 %v267_v17  ;;  %563 = vmatpush1.msra.mxu1 %v267_v17 }
  0x91   : > { %297 = vrot.lane.b32.xlu1 %v669_v1, %s621_s30  ;;  %376 = vmatprep.subr.mxu0 %v619_v10  ;;  %v322_v21 = vsel %vm224_vm0, %v261_v20, %v265_v19  ;;  %v255_v22 = vpop.permute.xlu1 %254 }
  0x92   : > { %303 = vrot.lane.b32.xlu0 %v685_v8, %s620_s29  ;;  %537 = vmatprep.subr.mxu1 %v619_v10 }
  0x93   : > { %377 = vmatpush1.msra.mxu0 %v322_v21  ;;  %564 = vmatpush1.msra.mxu1 %v322_v21 }
  0x94   : > { %v259_v23 = vpop.permute.xlu0 %258  ;;  %378 = vmatprep.subr.mxu0 %v619_v10  ;;  %538 = vmatprep.subr.mxu1 %v619_v10 }
  0x95   : > { %295 = vrot.lane.b32.xlu1 %v667_v0, %s621_s30  ;;  %379 = vmatpush1.msra.mxu0 %v259_v23  ;;  %v253_v24 = vpop.permute.xlu1 %252 }
  0x96   : > { %301 = vrot.lane.b32.xlu0 %v674_v3, %s620_s29  ;;  %565 = vmatpush1.msra.mxu1 %v259_v23 }
  0x97   : > { %380 = vmatprep.subr.mxu0 %v619_v10  ;;  %539 = vmatprep.subr.mxu1 %v619_v10 }
  0x98   : > { %v249_v25 = vpop.permute.xlu0 %248  ;;  %381 = vmatpush1.msra.mxu0 %v255_v22  ;;  %566 = vmatpush1.msra.mxu1 %v255_v22 }
  0x99   : > { %285 = vrot.lane.b32.xlu1 %v669_v1, %s614_s24  ;;  %382 = vmatprep.subr.mxu0 %v619_v10  ;;  %v321_v26 = vsel %vm224_vm0, %v249_v25, %v253_v24  ;;  %v243_v27 = vpop.permute.xlu1 %242 }
  0x9a   : > { %291 = vrot.lane.b32.xlu0 %v685_v8, %s622_s5  ;;  %540 = vmatprep.subr.mxu1 %v619_v10 }
  0x9b   : > { %383 = vmatpush1.msra.mxu0 %v321_v26  ;;  %567 = vmatpush1.msra.mxu1 %v321_v26 }
  0x9c   : > { %v247_v28 = vpop.permute.xlu0 %246  ;;  %384 = vmatprep.subr.mxu0 %v619_v10  ;;  %541 = vmatprep.subr.mxu1 %v619_v10 }
  0x9d   : > { %385 = vmatpush1.msra.mxu0 %v247_v28  ;;  %568 = vmatpush1.msra.mxu1 %v247_v28  ;;  %v241_v29 = vpop.permute.xlu1 %240 }
  0x9e   : > { %289 = vrot.lane.b32.xlu0 %v674_v3, %s622_s5  ;;  %386 = vmatprep.subr.mxu0 %v619_v10 }
  0x9f   : > { %542 = vmatprep.subr.mxu1 %v619_v10  ;;  %387 = vmatpush1.msra.mxu0 %v243_v27 }
  0xa0   : > { %v237_v31 = vpop.permute.xlu0 %236  ;;  %569 = vmatpush1.msra.mxu1 %v243_v27  ;;  %388 = vmatprep.subr.mxu0 %v619_v10 }
  0xa1   : > { %543 = vmatprep.subr.mxu1 %v619_v10  ;;  %v320_v32 = vsel %vm224_vm0, %v237_v31, %v241_v29  ;;  %v231_v36 = vpop.permute.xlu1 %230  ;;  %351 = vperm.xlu1 %604, %v347_v40  }
  0xa2   : > { %389 = vmatpush1.msra.mxu0 %v320_v32  ;;  %570 = vmatpush1.msra.mxu1 %v320_v32 }
  0xa3   : > { %390 = vmatprep.subr.mxu0 %v619_v10  ;;  %544 = vmatprep.subr.mxu1 %v619_v10 }
  0xa4   : > { %v235_v34 = vpop.permute.xlu0 %234  ;;  %356 = vperm.xlu0 %605, %v348_v37  }
  0xa5   : > { %391 = vmatpush1.msra.mxu0 %v235_v34  ;;  %571 = vmatpush1.msra.mxu1 %v235_v34  ;;  %v335_v41 = vpop.permute.xlu1 %334 }
  0xa6   : > { %392 = vmatprep.subr.mxu0 %v619_v10  ;;  %545 = vmatprep.subr.mxu1 %v619_v10 }
  0xa7   : > { %393 = vmatpush1.msra.mxu0 %v231_v36  ;;  %572 = vmatpush1.msra.mxu1 %v231_v36 }
  0xa8   : > { %v229_v38 = vpop.permute.xlu0 %228  ;;  %394 = vmatprep.subr.mxu0 %v619_v10  ;;  %546 = vmatprep.subr.mxu1 %v619_v10 }
  0xa9   : > { %v319_v39 = vsel %vm224_vm0, %v671_v2, %v229_v38 }
  0xaa   : > { %395 = vmatpush1.msra.mxu0 %v319_v39  ;;  %573 = vmatpush1.msra.mxu1 %v319_v39 }
  0xab   : > { %396 = vmatprep.subr.mxu0 %v619_v10  ;;  %547 = vmatprep.subr.mxu1 %v619_v10 }
  0xac   : > { %397 = vmatpush1.msra.mxu0 %v679_v5  ;;  %574 = vmatpush1.msra.mxu1 %v679_v5  ;;  %v316_v42 = vpop.permute.xlu0 %315 }
  0xad   : > { %408 = vmatprep.subr.mxu0 %v619_v10  ;;  %548 = vmatprep.subr.mxu1 %v619_v10 }
  0xf7   : > { %v339_v43 = vpop.permute.xlu1 %338 }
  0xf8   : > { %409 = vmatpush2.msra.mxu0 %v339_v43  ;;  %575 = vmatpush2.msra.mxu1 %v339_v43 }
  0xf9   : > { %410 = vmatprep.subr.mxu0 %v619_v10  ;;  %549 = vmatprep.subr.mxu1 %v619_v10 }
  0xfb   : > { %v310_v44 = vpop.permute.xlu1 %309 }
  0xfc   : > { %v337_v45 = vpop.permute.xlu0 %336 }
  0xfd   : > { %411 = vmatpush2.msra.mxu0 %v337_v45  ;;  %576 = vmatpush2.msra.mxu1 %v337_v45 }
  0xfe   : > { %412 = vmatprep.subr.mxu0 %v619_v10  ;;  %550 = vmatprep.subr.mxu1 %v619_v10 }
  0xff   : > { %413 = vmatpush2.msra.mxu0 %v335_v41  ;;  %577 = vmatpush2.msra.mxu1 %v335_v41  ;;  %v308_v46 = vpop.permute.xlu1 %307 }
 0x100   : > { %v314_v47 = vpop.permute.xlu0 %313  ;;  %414 = vmatprep.subr.mxu0 %v619_v10  ;;  %551 = vmatprep.subr.mxu1 %v619_v10 }
 0x101   : > { %415 = vmatpush2.msra.mxu0 %v316_v42  ;;  %578 = vmatpush2.msra.mxu1 %v316_v42  ;;  %v326_v48 = vsel %vm224_vm0, %v310_v44, %v314_v47 }
 0x102   : > { %416 = vmatprep.subr.mxu0 %v619_v10  ;;  %552 = vmatprep.subr.mxu1 %v619_v10 }
 0x103   : > { %417 = vmatpush2.msra.mxu0 %v326_v48  ;;  %579 = vmatpush2.msra.mxu1 %v326_v48  ;;  %v298_v49 = vpop.permute.xlu1 %297 }
 0x104   : > { %v304_v50 = vpop.permute.xlu0 %303  ;;  %418 = vmatprep.subr.mxu0 %v619_v10  ;;  %553 = vmatprep.subr.mxu1 %v619_v10 }
 0x105   : > { %419 = vmatpush2.msra.mxu0 %v308_v46  ;;  %580 = vmatpush2.msra.mxu1 %v308_v46 }
 0x106   : > { %420 = vmatprep.subr.mxu0 %v619_v10  ;;  %554 = vmatprep.subr.mxu1 %v619_v10 }
 0x107   : > { %421 = vmatpush2.msra.mxu0 %v304_v50  ;;  %581 = vmatpush2.msra.mxu1 %v304_v50  ;;  %v296_v52 = vpop.permute.xlu1 %295 }
 0x108   : > { %v302_v51 = vpop.permute.xlu0 %301  ;;  %422 = vmatprep.subr.mxu0 %v619_v10  ;;  %555 = vmatprep.subr.mxu1 %v619_v10 }
 0x109   : > { %v325_v53 = vsel %vm224_vm0, %v298_v49, %v302_v51 }
 0x10a   : > { %423 = vmatpush2.msra.mxu0 %v325_v53  ;;  %582 = vmatpush2.msra.mxu1 %v325_v53 }
 0x10b   : > { %424 = vmatprep.subr.mxu0 %v619_v10  ;;  %556 = vmatprep.subr.mxu1 %v619_v10  ;;  %v286_v55 = vpop.permute.xlu1 %285 }
 0x10c   : > { %v292_v54 = vpop.permute.xlu0 %291  ;;  %425 = vmatpush2.msra.mxu0 %v296_v52  ;;  %583 = vmatpush2.msra.mxu1 %v296_v52 }
 0x10d   : > { %426 = vmatprep.subr.mxu0 %v619_v10  ;;  %557 = vmatprep.subr.mxu1 %v619_v10 }
 0x10e   : > { %427 = vmatpush2.msra.mxu0 %v292_v54  ;;  %584 = vmatpush2.msra.mxu1 %v292_v54 }
 0x10f   : > { %428 = vmatprep.subr.mxu0 %v619_v10  ;;  %558 = vmatprep.subr.mxu1 %v619_v10 }
 0x110   : > { %v290_v56 = vpop.permute.xlu0 %289 }
 0x111   : > { %v324_v59 = vsel %vm224_vm0, %v286_v55, %v290_v56 }
 0x112   : > { %429 = vmatpush2.msra.mxu0 %v324_v59  ;;  %585 = vmatpush2.msra.mxu1 %v324_v59 }
 0x113   : > { %431 = vmatmul.mubr.f32.vlgmr.msra.gmra.mxu0 %v343_v57  ;;  %436 = vmatmul.mubr.f32.vlgmr.msra.gmra.mxu1 %v345_v58 }
 0x11c   : > { %v352_v61 = vpop.permute.xlu1 %351 }
 0x11f   : > { %v357_v60 = vpop.permute.xlu0 %356 }
 0x1d3   : > { %v432_v62 = vpop.f32.mrf.mxu0  ;;  %v437_v63 = vpop.f32.mrf.mxu1 }
 0x1d4   : > { %v438_v0 = vadd.f32 %v437_v63, %v357_v60  ;;  %v433_v1 = vadd.f32 %v432_v62, %v352_v61 }
 0x1d5   : > { %v434_v2 = vpop.f32.mrf.mxu0  ;;  %v439_v3 = vpop.f32.mrf.mxu1 }
 0x1d6   : > { %v442_v4 = vmax.f32 %v438_v0, 0.0  ;;  %v441_v5 = vmax.f32 %v433_v1, 0.0 }
 0x1d8   : > { %446 = vst.msk [vmem:[%s217_s22 + $0x8] sm:$0xf] %vm445_vm2, %v442_v4 }
 0x1d9   : > { %444 = vst.msk [vmem:[%s217_s22] sm:$0xff] %vm443_vm3, %v441_v5 }
 0x1da PF: > { %s14_s15 = sadd.s32 1, %s612_s15  }
 0x1db   : > { %p11_p4 = scmp.ge.s32.totalorder %s14_s15, 4  }
 0x1dd   :  { %13 = sbr.rel (!%p11_p4) target bundleno = 1 (0x1), region = 69 }

// kernel: _lambda_.15
= control target key start
LH: loop header
LB: loop body
LE: loop exit
PB: predicated region body
PF: predicated region fallthrough
CT: control target
= control target key end

     0   :  { %s508_s12 = smov 0   ;;  %s570_s0 = inlined_call_operand.vmem [shape: f32[2,12,42], index: 0, kind: input, shape index: {}]   ;;  %s571_s1 = inlined_call_operand.vmem [shape: f32[12,108], index: 1, kind: input, shape index: {}]   ;;  %s572_s2 = inlined_call_operand.vmem [shape: f32[12,1], index: 2, kind: input, shape index: {}]   ;;  %s573_s3 = inlined_call_operand.vmem [shape: f32[2,12,12], index: 3, kind: output, shape index: {}]  }
   0x1 LB: > { %s389_s13 = sadd.s32 4294967295, %s477_s12   ;;  %p393_p0 = scmp.ge.s32.totalorder %s477_s12, 1  ;;  %s477_s12 = sphi %s508_s12, %s13_s12  }
   0x2   : > { %p137_p1 = scmp.lt.s32.totalorder %s477_s12, 3 }
   0x4   : > { %p138_p2 = pnand %p393_p0, %p137_p1 }
   0x5   : > { %p161_p3 = scmp.lt.s32.totalorder (!%p138_p2), %s389_s13, 1  ;;  %s479_s18 = smov (!%p138_p2), 104  }
   0x6   : > { %141 = sbr.rel (%p138_p2) target bundleno = 365 (0x16d), region = 32  ;;  %s480_s19 = smov (!%p138_p2), 100  }
   0x7   : > { %s481_s20 = smov (!%p138_p2), 102   ;;  %s482_s21 = smov (!%p138_p2), 112  }
   0x8   : > { %s483_s22 = smov (!%p138_p2), 114   ;;  %s484_s23 = smov (!%p138_p2), 116  }
   0x9   : > { %s485_s24 = smov (!%p138_p2), 124   ;;  %s487_s27 = smov (!%p138_p2), 126  }
   0xb   : > { %s575_s13 = smov (!%p161_p3, %s389_s13), 1  ;;  %vm175_vm0 = vcmask 1043456   ;;  %v230_v5 = vld [vmem:[%s571_s1] sm:$0xff]  ;;  %vm244_vm1 = vcmask 883712   ;;  %v486_v6 = vmov 0   ;;  %vm332_vm2 = vcmask 93184  }
   0xc   : > { %s403_s14 = sshll.u32 %s575_s13, 4  ;;  %449 = vmatprep.mubr.msk.f32.mxu0 %vm244_vm1, %v230_v5  ;;  %470 = vset.pattern.permute.xlu1 %v486_v6  ;;  %v233_v7 = vld [vmem:[%s572_s2 + $0x8] sm:$0xf]  ;;  %v232_v8 = vld [vmem:[%s572_s2] sm:$0xff]  ;;  %vm330_vm3 = vcmask 97280  }
   0xd   : > { %s165_s17 = scalar_lea.vmem %s570_s0, %s403_s14  ;;  %469 = vset.pattern.permute.xlu0 %v486_v6  ;;  %v231_v29 = vld [vmem:[%s571_s1 + $0x8] sm:$0xf]  ;;  %s170_s9 = scalar_lea.vmem %s573_s3, %s403_s14 }
   0xe   : > { %v524_v0 = vld [vmem:[%s165_s17 + $0x8] sm:$0xf]  ;;  %v526_v1 = vld [vmem:[%s165_s17] sm:$0xff] }
   0xf   : > { %211 = vrot.lane.b32.xlu1 %v524_v0, %s479_s18  ;;  %223 = vrot.lane.b32.xlu0 %v524_v0, %s480_s19  ;;  %v176_v2 = vrot.slane %v526_v1, 4  ;;  %v177_v3 = vrot.slane %v524_v0, 4 }
  0x11   : > { %v178_v4 = vsel %vm175_vm0, %v176_v2, %v177_v3 }
  0x13   : > { %209 = vrot.lane.b32.xlu1 %v526_v1, %s479_s18  ;;  %221 = vrot.lane.b32.xlu0 %v526_v1, %s480_s19 }
  0x17   : > { %215 = vrot.lane.b32.xlu0 %v176_v2, %s481_s20  ;;  %217 = vrot.lane.b32.xlu1 %v178_v4, %s481_s20 }
  0x1b   : > { %205 = vrot.lane.b32.xlu0 %v178_v4, %s482_s21  ;;  %199 = vrot.lane.b32.xlu1 %v524_v0, %s483_s22 }
  0x1f   : > { %203 = vrot.lane.b32.xlu0 %v176_v2, %s482_s21  ;;  %197 = vrot.lane.b32.xlu1 %v526_v1, %s483_s22 }
  0x23   : > { %193 = vrot.lane.b32.xlu0 %v178_v4, %s484_s23  ;;  %187 = vrot.lane.b32.xlu1 %v524_v0, %s485_s24 }
  0x27   : > { %191 = vrot.lane.b32.xlu0 %v176_v2, %s484_s23  ;;  %185 = vrot.lane.b32.xlu1 %v526_v1, %s485_s24 }
  0x2b   : > { %181 = vrot.lane.b32.xlu0 %v178_v4, %s487_s27  ;;  %179 = vrot.lane.b32.xlu1 %v176_v2, %s487_s27 }
  0x2f   : > { %241 = vperm.xlu1 %470, %v233_v7   ;;  %236 = vperm.xlu0 %469, %v232_v8  }
  0x81   : > { %v212_v9 = vpop.permute.xlu1 %211  ;;  %v224_v10 = vpop.permute.xlu0 %223 }
  0x82   : > { %421 = vmatprep.subr.msk.mxu0 %vm175_vm0, %v224_v10 }
  0x83   : > { %422 = vmatpush3.msk.msra.mxu0 %vm175_vm0, %v224_v10 }
  0x85   : > { %v210_v11 = vpop.permute.xlu1 %209  ;;  %v222_v12 = vpop.permute.xlu0 %221 }
  0x86   : > { %423 = vmatprep.subr.mxu0 %v222_v12 }
  0x87   : > { %424 = vmatpush3.msra.mxu0 %v222_v12 }
  0x89   : > { %v216_v13 = vpop.permute.xlu0 %215  ;;  %v218_v14 = vpop.permute.xlu1 %217 }
  0x8a   : > { %425 = vmatprep.subr.mxu0 %v218_v14  ;;  %v229_v15 = vsel %vm175_vm0, %v212_v9, %v216_v13 }
  0x8b   : > { %426 = vmatpush3.msra.mxu0 %v218_v14 }
  0x8c   : > { %427 = vmatprep.subr.mxu0 %v229_v15 }
  0x8d   : > { %v206_v16 = vpop.permute.xlu0 %205  ;;  %428 = vmatpush3.msra.mxu0 %v229_v15  ;;  %v200_v17 = vpop.permute.xlu1 %199 }
  0x8e   : > { %429 = vmatprep.subr.mxu0 %v210_v11 }
  0x8f   : > { %430 = vmatpush3.msra.mxu0 %v210_v11 }
  0x90   : > { %431 = vmatprep.subr.mxu0 %v206_v16 }
  0x91   : > { %v204_v18 = vpop.permute.xlu0 %203  ;;  %432 = vmatpush3.msra.mxu0 %v206_v16  ;;  %v198_v19 = vpop.permute.xlu1 %197 }
  0x92   : > { %v228_v20 = vsel %vm175_vm0, %v200_v17, %v204_v18 }
  0x93   : > { %433 = vmatprep.subr.mxu0 %v228_v20 }
  0x94   : > { %434 = vmatpush3.msra.mxu0 %v228_v20 }
  0x95   : > { %v194_v21 = vpop.permute.xlu0 %193  ;;  %435 = vmatprep.subr.mxu0 %v198_v19  ;;  %v188_v22 = vpop.permute.xlu1 %187 }
  0x96   : > { %436 = vmatpush3.msra.mxu0 %v198_v19 }
  0x97   : > { %437 = vmatprep.subr.mxu0 %v194_v21 }
  0x98   : > { %438 = vmatpush3.msra.mxu0 %v194_v21 }
  0x99   : > { %v192_v23 = vpop.permute.xlu0 %191  ;;  %v186_v24 = vpop.permute.xlu1 %185 }
  0x9a   : > { %v227_v25 = vsel %vm175_vm0, %v188_v22, %v192_v23 }
  0x9b   : > { %439 = vmatprep.subr.mxu0 %v227_v25 }
  0x9c   : > { %440 = vmatpush3.msra.mxu0 %v227_v25 }
  0x9d   : > { %441 = vmatprep.subr.mxu0 %v186_v24  ;;  %v182_v26 = vpop.permute.xlu0 %181  ;;  %v180_v27 = vpop.permute.xlu1 %179 }
  0x9e   : > { %442 = vmatpush3.msra.mxu0 %v186_v24  ;;  %v226_v28 = vsel %vm175_vm0, %v524_v0, %v180_v27 }
  0x9f   : > { %443 = vmatprep.subr.mxu0 %v182_v26 }
  0xa0   : > { %444 = vmatpush3.msra.mxu0 %v182_v26 }
  0xa1   : > { %445 = vmatprep.subr.mxu0 %v226_v28 }
  0xa2   : > { %446 = vmatpush3.msra.mxu0 %v226_v28 }
  0xa3   : > { %447 = vmatprep.subr.mxu0 %v526_v1 }
  0xa4   : > { %448 = vmatpush3.msra.mxu0 %v526_v1 }
  0xa5   : > { %450 = vmatmul.mubr.msk.f32.vlgmr.msra.gmra.mxu0 %vm244_vm1, %v231_v29 }
  0xaa   : > { %v242_v30 = vpop.permute.xlu1 %241  ;;  %v237_v32 = vpop.permute.xlu0 %236 }
 0x165   : > { %v451_v31 = vpop.f32.mrf.mxu0 }
 0x166   : > { %v325_v33 = vadd.f32 %v451_v31, %v242_v30 }
 0x167   : > { %v319_v34 = vpop.f32.mrf.mxu0 }
 0x168   : > { %v329_v35 = vmax.f32 %v325_v33, 0.0  ;;  %v320_v36 = vadd.f32 %v319_v34, %v237_v32 }
 0x16a   : > { %333 = vst.msk [vmem:[%s170_s9 + $0x8] sm:$0xf] %vm332_vm2, %v329_v35  ;;  %v328_v37 = vmax.f32 %v320_v36, 0.0 }
 0x16c   : > { %331 = vst.msk [vmem:[%s170_s9] sm:$0xff] %vm330_vm3, %v328_v37 }
 0x16d PF: > { %s13_s12 = sadd.s32 1, %s477_s12  }
 0x16e   : > { %p10_p4 = scmp.ge.s32.totalorder %s13_s12, 4  }
 0x170   :  { %12 = sbr.rel (!%p10_p4) target bundleno = 1 (0x1), region = 62 }

// kernel: _lambda_.17
= control target key start
LH: loop header
LB: loop body
LE: loop exit
PB: predicated region body
PF: predicated region fallthrough
CT: control target
= control target key end

     0   :  { %s649_s15 = smov 0   ;;  %s835_s0 = inlined_call_operand.vmem [shape: f32[2,12,42], index: 0, kind: input, shape index: {}]   ;;  %s836_s1 = inlined_call_operand.vmem [shape: f32[2,12,42], index: 1, kind: input, shape index: {}]   ;;  %s837_s2 = inlined_call_operand.vmem [shape: f32[12,216], index: 2, kind: input, shape index: {}]   ;;  %s838_s3 = inlined_call_operand.vmem [shape: f32[12,1], index: 3, kind: input, shape index: {}]   ;;  %s839_s4 = inlined_call_operand.vmem [shape: f32[2,12,24], index: 4, kind: output, shape index: {}]  }
   0x1 LB: > { %s514_s16 = sadd.s32 4294967295, %s612_s15   ;;  %p518_p0 = scmp.ge.s32.totalorder %s612_s15, 1  ;;  %s612_s15 = sphi %s649_s15, %s14_s15  }
   0x2   : > { %p172_p1 = scmp.lt.s32.totalorder %s612_s15, 3 }
   0x4   : > { %p173_p2 = pnand %p518_p0, %p172_p1 }
   0x5   : > { %p203_p3 = scmp.lt.s32.totalorder (!%p173_p2), %s514_s16, 1  ;;  %s614_s24 = smov (!%p173_p2), 127  }
   0x6   : > { %176 = sbr.rel (%p173_p2) target bundleno = 474 (0x1da), region = 36  ;;  %s615_s25 = smov (!%p173_p2), 114  }
   0x7   : > { %s616_s26 = smov (!%p173_p2), 115   ;;  %s617_s27 = smov (!%p173_p2), 116  }
   0x8   : > { %s618_s28 = smov (!%p173_p2), 120   ;;  %s620_s29 = smov (!%p173_p2), 121  }
   0x9   : > { %s621_s30 = smov (!%p173_p2), 122   ;;  %s622_s5 = smov (!%p173_p2), 126  }
   0xb   : > { %s841_s16 = smov (!%p203_p3, %s514_s16), 1  ;;  %vm224_vm0 = vcmask 1043456   ;;  %v619_v10 = vmov 0.0   ;;  %v344_v30 = vld [vmem:[%s837_s2 + $0x8] sm:$0xff]  ;;  %vm359_vm1 = vcmask 719872   ;;  %v623_v35 = vmov 0  }
   0xc   : > { %s657_s17 = sshll.u32 %s841_s16, 4  ;;  %366 = vmatprep.subr.mxu0 %v619_v10  ;;  %532 = vmatprep.subr.mxu1 %v619_v10  ;;  %v346_v33 = vld [vmem:[%s837_s2 + $0x18] sm:$0xf]  ;;  %v348_v37 = vld [vmem:[%s838_s3 + $0x8] sm:$0xf]  ;;  %v347_v40 = vld [vmem:[%s838_s3] sm:$0xff] }
   0xd   : > { %s212_s20 = scalar_lea.vmem %s836_s1, %s657_s17  ;;  %s207_s23 = scalar_lea.vmem %s835_s0, %s657_s17  ;;  %525 = vmatprep.mubr.msk.f32.mxu0 %vm359_vm1, %v344_v30  ;;  %526 = vmatprep.mubr.msk.f32.mxu1 %vm359_vm1, %v346_v33  ;;  %v343_v57 = vld [vmem:[%s837_s2] sm:$0xff]  ;;  %v345_v58 = vld [vmem:[%s837_s2 + $0x10] sm:$0xf]  ;;  %vm445_vm2 = vcmask 191488   ;;  %vm443_vm3 = vcmask 195584  }
   0xe   : > { %v667_v0 = vld [vmem:[%s212_s20] sm:$0xff]  ;;  %v669_v1 = vld [vmem:[%s212_s20 + $0x8] sm:$0xf]  ;;  %605 = vset.pattern.permute.xlu0 %v623_v35  ;;  %604 = vset.pattern.permute.xlu1 %v623_v35  ;;  %s217_s22 = scalar_lea.vmem %s839_s4, %s657_s17 }
   0xf   : > { %v671_v2 = vld [vmem:[%s207_s23 + $0x8] sm:$0xf]  ;;  %v674_v3 = vrot.slane %v667_v0, 4  ;;  %v279_v4 = vrot.slane %v669_v1, 4  ;;  %283 = vrot.lane.b32.xlu1 %v667_v0, %s614_s24  ;;  %v679_v5 = vld [vmem:[%s207_s23] sm:$0xff] }
  0x10   : > { %v225_v6 = vrot.slane %v679_v5, 4  ;;  %v226_v7 = vrot.slane %v671_v2, 4 }
  0x11   : > { %v685_v8 = vsel %vm224_vm0, %v674_v3, %v279_v4 }
  0x12   : > { %329 = vrot.lane.b32.xlu0 %v685_v8, %s614_s24  ;;  %v227_v9 = vsel %vm224_vm0, %v225_v6, %v226_v7 }
  0x13   : > { %272 = vrot.lane.b32.xlu1 %v671_v2, %s615_s25 }
  0x16   : > { %327 = vrot.lane.b32.xlu0 %v674_v3, %s614_s24 }
  0x17   : > { %266 = vrot.lane.b32.xlu1 %v227_v9, %s616_s26 }
  0x1a   : > { %270 = vrot.lane.b32.xlu0 %v679_v5, %s615_s25 }
  0x1b   : > { %264 = vrot.lane.b32.xlu1 %v225_v6, %s616_s26 }
  0x1e   : > { %260 = vrot.lane.b32.xlu0 %v671_v2, %s617_s27 }
  0x1f   : > { %254 = vrot.lane.b32.xlu1 %v227_v9, %s618_s28 }
  0x22   : > { %258 = vrot.lane.b32.xlu0 %v679_v5, %s617_s27 }
  0x23   : > { %252 = vrot.lane.b32.xlu1 %v225_v6, %s618_s28 }
  0x26   : > { %248 = vrot.lane.b32.xlu0 %v671_v2, %s620_s29 }
  0x27   : > { %242 = vrot.lane.b32.xlu1 %v227_v9, %s621_s30 }
  0x2a   : > { %246 = vrot.lane.b32.xlu0 %v679_v5, %s620_s29 }
  0x2b   : > { %240 = vrot.lane.b32.xlu1 %v225_v6, %s621_s30 }
  0x2e   : > { %236 = vrot.lane.b32.xlu0 %v671_v2, %s622_s5 }
  0x2f   : > { %230 = vrot.lane.b32.xlu1 %v227_v9, %s614_s24 }
  0x32   : > { %234 = vrot.lane.b32.xlu0 %v679_v5, %s622_s5 }
  0x33   : > { %334 = vrot.lane.b32.xlu1 %v667_v0, %s616_s26 }
  0x36   : > { %228 = vrot.lane.b32.xlu0 %v225_v6, %s614_s24 }
  0x3a   : > { %315 = vrot.lane.b32.xlu0 %v685_v8, %s617_s27 }
  0x81   : > { %v284_v11 = vpop.permute.xlu1 %283 }
  0x82   : > { %367 = vmatpush1.msra.mxu0 %v284_v11  ;;  %559 = vmatpush1.msra.mxu1 %v284_v11 }
  0x83   : > { %368 = vmatprep.subr.mxu0 %v619_v10  ;;  %533 = vmatprep.subr.mxu1 %v619_v10 }
  0x84   : > { %v330_v12 = vpop.permute.xlu0 %329  ;;  %369 = vmatpush1.msra.mxu0 %v685_v8  ;;  %560 = vmatpush1.msra.mxu1 %v685_v8 }
  0x85   : > { %338 = vrot.lane.b32.xlu1 %v330_v12, %s616_s26  ;;  %v273_v13 = vpop.permute.xlu1 %272  ;;  %370 = vmatprep.subr.mxu0 %v619_v10 }
  0x86   : > { %534 = vmatprep.subr.mxu1 %v619_v10  ;;  %v323_v14 = vsel %vm224_vm0, %v273_v13, %v674_v3 }
  0x87   : > { %371 = vmatpush1.msra.mxu0 %v323_v14  ;;  %561 = vmatpush1.msra.mxu1 %v323_v14 }
  0x88   : > { %v328_v15 = vpop.permute.xlu0 %327  ;;  %372 = vmatprep.subr.mxu0 %v619_v10  ;;  %535 = vmatprep.subr.mxu1 %v619_v10 }
  0x89   : > { %v332_v16 = vsel %vm224_vm0, %v669_v1, %v328_v15  ;;  %309 = vrot.lane.b32.xlu1 %v669_v1, %s618_s28  ;;  %v267_v17 = vpop.permute.xlu1 %266 }
  0x8a   : > { %336 = vrot.lane.b32.xlu0 %v332_v16, %s616_s26 }
  0x8c   : > { %v271_v18 = vpop.permute.xlu0 %270 }
  0x8d   : > { %307 = vrot.lane.b32.xlu1 %v667_v0, %s618_s28  ;;  %373 = vmatpush1.msra.mxu0 %v271_v18  ;;  %v265_v19 = vpop.permute.xlu1 %264 }
  0x8e   : > { %313 = vrot.lane.b32.xlu0 %v674_v3, %s617_s27  ;;  %562 = vmatpush1.msra.mxu1 %v271_v18 }
  0x8f   : > { %374 = vmatprep.subr.mxu0 %v619_v10  ;;  %536 = vmatprep.subr.mxu1 %v619_v10 }
  0x90   : > { %v261_v20 = vpop.permute.xlu0 %260  ;;  %375 = vmatpush1.msra.mxu0 %v267_v17  ;;  %563 = vmatpush1.msra.mxu1 %v267_v17 }
  0x91   : > { %297 = vrot.lane.b32.xlu1 %v669_v1, %s621_s30  ;;  %376 = vmatprep.subr.mxu0 %v619_v10  ;;  %v322_v21 = vsel %vm224_vm0, %v261_v20, %v265_v19  ;;  %v255_v22 = vpop.permute.xlu1 %254 }
  0x92   : > { %303 = vrot.lane.b32.xlu0 %v685_v8, %s620_s29  ;;  %537 = vmatprep.subr.mxu1 %v619_v10 }
  0x93   : > { %377 = vmatpush1.msra.mxu0 %v322_v21  ;;  %564 = vmatpush1.msra.mxu1 %v322_v21 }
  0x94   : > { %v259_v23 = vpop.permute.xlu0 %258  ;;  %378 = vmatprep.subr.mxu0 %v619_v10  ;;  %538 = vmatprep.subr.mxu1 %v619_v10 }
  0x95   : > { %295 = vrot.lane.b32.xlu1 %v667_v0, %s621_s30  ;;  %379 = vmatpush1.msra.mxu0 %v259_v23  ;;  %v253_v24 = vpop.permute.xlu1 %252 }
  0x96   : > { %301 = vrot.lane.b32.xlu0 %v674_v3, %s620_s29  ;;  %565 = vmatpush1.msra.mxu1 %v259_v23 }
  0x97   : > { %380 = vmatprep.subr.mxu0 %v619_v10  ;;  %539 = vmatprep.subr.mxu1 %v619_v10 }
  0x98   : > { %v249_v25 = vpop.permute.xlu0 %248  ;;  %381 = vmatpush1.msra.mxu0 %v255_v22  ;;  %566 = vmatpush1.msra.mxu1 %v255_v22 }
  0x99   : > { %285 = vrot.lane.b32.xlu1 %v669_v1, %s614_s24  ;;  %382 = vmatprep.subr.mxu0 %v619_v10  ;;  %v321_v26 = vsel %vm224_vm0, %v249_v25, %v253_v24  ;;  %v243_v27 = vpop.permute.xlu1 %242 }
  0x9a   : > { %291 = vrot.lane.b32.xlu0 %v685_v8, %s622_s5  ;;  %540 = vmatprep.subr.mxu1 %v619_v10 }
  0x9b   : > { %383 = vmatpush1.msra.mxu0 %v321_v26  ;;  %567 = vmatpush1.msra.mxu1 %v321_v26 }
  0x9c   : > { %v247_v28 = vpop.permute.xlu0 %246  ;;  %384 = vmatprep.subr.mxu0 %v619_v10  ;;  %541 = vmatprep.subr.mxu1 %v619_v10 }
  0x9d   : > { %385 = vmatpush1.msra.mxu0 %v247_v28  ;;  %568 = vmatpush1.msra.mxu1 %v247_v28  ;;  %v241_v29 = vpop.permute.xlu1 %240 }
  0x9e   : > { %289 = vrot.lane.b32.xlu0 %v674_v3, %s622_s5  ;;  %386 = vmatprep.subr.mxu0 %v619_v10 }
  0x9f   : > { %542 = vmatprep.subr.mxu1 %v619_v10  ;;  %387 = vmatpush1.msra.mxu0 %v243_v27 }
  0xa0   : > { %v237_v31 = vpop.permute.xlu0 %236  ;;  %569 = vmatpush1.msra.mxu1 %v243_v27  ;;  %388 = vmatprep.subr.mxu0 %v619_v10 }
  0xa1   : > { %543 = vmatprep.subr.mxu1 %v619_v10  ;;  %v320_v32 = vsel %vm224_vm0, %v237_v31, %v241_v29  ;;  %v231_v36 = vpop.permute.xlu1 %230  ;;  %351 = vperm.xlu1 %604, %v347_v40  }
  0xa2   : > { %389 = vmatpush1.msra.mxu0 %v320_v32  ;;  %570 = vmatpush1.msra.mxu1 %v320_v32 }
  0xa3   : > { %390 = vmatprep.subr.mxu0 %v619_v10  ;;  %544 = vmatprep.subr.mxu1 %v619_v10 }
  0xa4   : > { %v235_v34 = vpop.permute.xlu0 %234  ;;  %356 = vperm.xlu0 %605, %v348_v37  }
  0xa5   : > { %391 = vmatpush1.msra.mxu0 %v235_v34  ;;  %571 = vmatpush1.msra.mxu1 %v235_v34  ;;  %v335_v41 = vpop.permute.xlu1 %334 }
  0xa6   : > { %392 = vmatprep.subr.mxu0 %v619_v10  ;;  %545 = vmatprep.subr.mxu1 %v619_v10 }
  0xa7   : > { %393 = vmatpush1.msra.mxu0 %v231_v36  ;;  %572 = vmatpush1.msra.mxu1 %v231_v36 }
  0xa8   : > { %v229_v38 = vpop.permute.xlu0 %228  ;;  %394 = vmatprep.subr.mxu0 %v619_v10  ;;  %546 = vmatprep.subr.mxu1 %v619_v10 }
  0xa9   : > { %v319_v39 = vsel %vm224_vm0, %v671_v2, %v229_v38 }
  0xaa   : > { %395 = vmatpush1.msra.mxu0 %v319_v39  ;;  %573 = vmatpush1.msra.mxu1 %v319_v39 }
  0xab   : > { %396 = vmatprep.subr.mxu0 %v619_v10  ;;  %547 = vmatprep.subr.mxu1 %v619_v10 }
  0xac   : > { %397 = vmatpush1.msra.mxu0 %v679_v5  ;;  %574 = vmatpush1.msra.mxu1 %v679_v5  ;;  %v316_v42 = vpop.permute.xlu0 %315 }
  0xad   : > { %408 = vmatprep.subr.mxu0 %v619_v10  ;;  %548 = vmatprep.subr.mxu1 %v619_v10 }
  0xf7   : > { %v339_v43 = vpop.permute.xlu1 %338 }
  0xf8   : > { %409 = vmatpush2.msra.mxu0 %v339_v43  ;;  %575 = vmatpush2.msra.mxu1 %v339_v43 }
  0xf9   : > { %410 = vmatprep.subr.mxu0 %v619_v10  ;;  %549 = vmatprep.subr.mxu1 %v619_v10 }
  0xfb   : > { %v310_v44 = vpop.permute.xlu1 %309 }
  0xfc   : > { %v337_v45 = vpop.permute.xlu0 %336 }
  0xfd   : > { %411 = vmatpush2.msra.mxu0 %v337_v45  ;;  %576 = vmatpush2.msra.mxu1 %v337_v45 }
  0xfe   : > { %412 = vmatprep.subr.mxu0 %v619_v10  ;;  %550 = vmatprep.subr.mxu1 %v619_v10 }
  0xff   : > { %413 = vmatpush2.msra.mxu0 %v335_v41  ;;  %577 = vmatpush2.msra.mxu1 %v335_v41  ;;  %v308_v46 = vpop.permute.xlu1 %307 }
 0x100   : > { %v314_v47 = vpop.permute.xlu0 %313  ;;  %414 = vmatprep.subr.mxu0 %v619_v10  ;;  %551 = vmatprep.subr.mxu1 %v619_v10 }
 0x101   : > { %415 = vmatpush2.msra.mxu0 %v316_v42  ;;  %578 = vmatpush2.msra.mxu1 %v316_v42  ;;  %v326_v48 = vsel %vm224_vm0, %v310_v44, %v314_v47 }
 0x102   : > { %416 = vmatprep.subr.mxu0 %v619_v10  ;;  %552 = vmatprep.subr.mxu1 %v619_v10 }
 0x103   : > { %417 = vmatpush2.msra.mxu0 %v326_v48  ;;  %579 = vmatpush2.msra.mxu1 %v326_v48  ;;  %v298_v49 = vpop.permute.xlu1 %297 }
 0x104   : > { %v304_v50 = vpop.permute.xlu0 %303  ;;  %418 = vmatprep.subr.mxu0 %v619_v10  ;;  %553 = vmatprep.subr.mxu1 %v619_v10 }
 0x105   : > { %419 = vmatpush2.msra.mxu0 %v308_v46  ;;  %580 = vmatpush2.msra.mxu1 %v308_v46 }
 0x106   : > { %420 = vmatprep.subr.mxu0 %v619_v10  ;;  %554 = vmatprep.subr.mxu1 %v619_v10 }
 0x107   : > { %421 = vmatpush2.msra.mxu0 %v304_v50  ;;  %581 = vmatpush2.msra.mxu1 %v304_v50  ;;  %v296_v52 = vpop.permute.xlu1 %295 }
 0x108   : > { %v302_v51 = vpop.permute.xlu0 %301  ;;  %422 = vmatprep.subr.mxu0 %v619_v10  ;;  %555 = vmatprep.subr.mxu1 %v619_v10 }
 0x109   : > { %v325_v53 = vsel %vm224_vm0, %v298_v49, %v302_v51 }
 0x10a   : > { %423 = vmatpush2.msra.mxu0 %v325_v53  ;;  %582 = vmatpush2.msra.mxu1 %v325_v53 }
 0x10b   : > { %424 = vmatprep.subr.mxu0 %v619_v10  ;;  %556 = vmatprep.subr.mxu1 %v619_v10  ;;  %v286_v55 = vpop.permute.xlu1 %285 }
 0x10c   : > { %v292_v54 = vpop.permute.xlu0 %291  ;;  %425 = vmatpush2.msra.mxu0 %v296_v52  ;;  %583 = vmatpush2.msra.mxu1 %v296_v52 }
 0x10d   : > { %426 = vmatprep.subr.mxu0 %v619_v10  ;;  %557 = vmatprep.subr.mxu1 %v619_v10 }
 0x10e   : > { %427 = vmatpush2.msra.mxu0 %v292_v54  ;;  %584 = vmatpush2.msra.mxu1 %v292_v54 }
 0x10f   : > { %428 = vmatprep.subr.mxu0 %v619_v10  ;;  %558 = vmatprep.subr.mxu1 %v619_v10 }
 0x110   : > { %v290_v56 = vpop.permute.xlu0 %289 }
 0x111   : > { %v324_v59 = vsel %vm224_vm0, %v286_v55, %v290_v56 }
 0x112   : > { %429 = vmatpush2.msra.mxu0 %v324_v59  ;;  %585 = vmatpush2.msra.mxu1 %v324_v59 }
 0x113   : > { %431 = vmatmul.mubr.f32.vlgmr.msra.gmra.mxu0 %v343_v57  ;;  %436 = vmatmul.mubr.f32.vlgmr.msra.gmra.mxu1 %v345_v58 }
 0x11c   : > { %v352_v61 = vpop.permute.xlu1 %351 }
 0x11f   : > { %v357_v60 = vpop.permute.xlu0 %356 }
 0x1d3   : > { %v432_v62 = vpop.f32.mrf.mxu0  ;;  %v437_v63 = vpop.f32.mrf.mxu1 }
 0x1d4   : > { %v438_v0 = vadd.f32 %v437_v63, %v357_v60  ;;  %v433_v1 = vadd.f32 %v432_v62, %v352_v61 }
 0x1d5   : > { %v434_v2 = vpop.f32.mrf.mxu0  ;;  %v439_v3 = vpop.f32.mrf.mxu1 }
 0x1d6   : > { %v442_v4 = vmax.f32 %v438_v0, 0.0  ;;  %v441_v5 = vmax.f32 %v433_v1, 0.0 }
 0x1d8   : > { %446 = vst.msk [vmem:[%s217_s22 + $0x8] sm:$0xf] %vm445_vm2, %v442_v4 }
 0x1d9   : > { %444 = vst.msk [vmem:[%s217_s22] sm:$0xff] %vm443_vm3, %v441_v5 }
 0x1da PF: > { %s14_s15 = sadd.s32 1, %s612_s15  }
 0x1db   : > { %p11_p4 = scmp.ge.s32.totalorder %s14_s15, 4  }
 0x1dd   :  { %13 = sbr.rel (!%p11_p4) target bundleno = 1 (0x1), region = 69 }

// kernel: _lambda_.18
= control target key start
LH: loop header
LB: loop body
LE: loop exit
PB: predicated region body
PF: predicated region fallthrough
CT: control target
= control target key end

     0   :  { %s649_s15 = smov 0   ;;  %s835_s0 = inlined_call_operand.vmem [shape: f32[2,12,110], index: 0, kind: input, shape index: {}]   ;;  %s836_s1 = inlined_call_operand.vmem [shape: f32[2,12,110], index: 1, kind: input, shape index: {}]   ;;  %s837_s2 = inlined_call_operand.vmem [shape: f32[12,216], index: 2, kind: input, shape index: {}]   ;;  %s838_s3 = inlined_call_operand.vmem [shape: f32[12,1], index: 3, kind: input, shape index: {}]   ;;  %s839_s4 = inlined_call_operand.vmem [shape: f32[2,12,80], index: 4, kind: output, shape index: {}]  }
   0x1 LB: > { %s514_s16 = sadd.s32 4294967295, %s612_s15   ;;  %p518_p0 = scmp.ge.s32.totalorder %s612_s15, 1  ;;  %s612_s15 = sphi %s649_s15, %s14_s15  }
   0x2   : > { %p172_p1 = scmp.lt.s32.totalorder %s612_s15, 3 }
   0x4   : > { %p173_p2 = pnand %p518_p0, %p172_p1 }
   0x5   : > { %p203_p3 = scmp.lt.s32.totalorder (!%p173_p2), %s514_s16, 1  ;;  %s614_s24 = smov (!%p173_p2), 127  }
   0x6   : > { %176 = sbr.rel (%p173_p2) target bundleno = 474 (0x1da), region = 36  ;;  %s615_s25 = smov (!%p173_p2), 106  }
   0x7   : > { %s616_s26 = smov (!%p173_p2), 107   ;;  %s617_s27 = smov (!%p173_p2), 108  }
   0x8   : > { %s618_s28 = smov (!%p173_p2), 116   ;;  %s620_s29 = smov (!%p173_p2), 117  }
   0x9   : > { %s621_s30 = smov (!%p173_p2), 118   ;;  %s622_s5 = smov (!%p173_p2), 126  }
   0xb   : > { %s841_s16 = smov (!%p203_p3, %s514_s16), 1  ;;  %vm224_vm0 = vcmask 1043456   ;;  %v619_v10 = vmov 0.0   ;;  %v344_v30 = vld [vmem:[%s837_s2 + $0x8] sm:$0xff]  ;;  %vm359_vm1 = vcmask 719872   ;;  %v623_v35 = vmov 0  }
   0xc   : > { %s657_s17 = sshll.u32 %s841_s16, 4  ;;  %366 = vmatprep.subr.mxu0 %v619_v10  ;;  %532 = vmatprep.subr.mxu1 %v619_v10  ;;  %v346_v33 = vld [vmem:[%s837_s2 + $0x18] sm:$0xf]  ;;  %v348_v37 = vld [vmem:[%s838_s3 + $0x8] sm:$0xf]  ;;  %v347_v40 = vld [vmem:[%s838_s3] sm:$0xff] }
   0xd   : > { %s212_s20 = scalar_lea.vmem %s836_s1, %s657_s17  ;;  %s207_s23 = scalar_lea.vmem %s835_s0, %s657_s17  ;;  %525 = vmatprep.mubr.msk.f32.mxu0 %vm359_vm1, %v344_v30  ;;  %526 = vmatprep.mubr.msk.f32.mxu1 %vm359_vm1, %v346_v33  ;;  %v343_v57 = vld [vmem:[%s837_s2] sm:$0xff]  ;;  %v345_v58 = vld [vmem:[%s837_s2 + $0x10] sm:$0xf]  ;;  %vm445_vm2 = vcmask 650240   ;;  %vm443_vm3 = vcmask 654336  }
   0xe   : > { %v667_v0 = vld [vmem:[%s212_s20] sm:$0xff]  ;;  %v669_v1 = vld [vmem:[%s212_s20 + $0x8] sm:$0xf]  ;;  %605 = vset.pattern.permute.xlu0 %v623_v35  ;;  %604 = vset.pattern.permute.xlu1 %v623_v35  ;;  %s217_s22 = scalar_lea.vmem %s839_s4, %s657_s17 }
   0xf   : > { %v671_v2 = vld [vmem:[%s207_s23 + $0x8] sm:$0xf]  ;;  %v674_v3 = vrot.slane %v667_v0, 4  ;;  %v279_v4 = vrot.slane %v669_v1, 4  ;;  %283 = vrot.lane.b32.xlu1 %v667_v0, %s614_s24  ;;  %v679_v5 = vld [vmem:[%s207_s23] sm:$0xff] }
  0x10   : > { %v225_v6 = vrot.slane %v679_v5, 4  ;;  %v226_v7 = vrot.slane %v671_v2, 4 }
  0x11   : > { %v685_v8 = vsel %vm224_vm0, %v674_v3, %v279_v4 }
  0x12   : > { %329 = vrot.lane.b32.xlu0 %v685_v8, %s614_s24  ;;  %v227_v9 = vsel %vm224_vm0, %v225_v6, %v226_v7 }
  0x13   : > { %272 = vrot.lane.b32.xlu1 %v671_v2, %s615_s25 }
  0x16   : > { %327 = vrot.lane.b32.xlu0 %v674_v3, %s614_s24 }
  0x17   : > { %266 = vrot.lane.b32.xlu1 %v227_v9, %s616_s26 }
  0x1a   : > { %270 = vrot.lane.b32.xlu0 %v679_v5, %s615_s25 }
  0x1b   : > { %264 = vrot.lane.b32.xlu1 %v225_v6, %s616_s26 }
  0x1e   : > { %260 = vrot.lane.b32.xlu0 %v671_v2, %s617_s27 }
  0x1f   : > { %254 = vrot.lane.b32.xlu1 %v227_v9, %s618_s28 }
  0x22   : > { %258 = vrot.lane.b32.xlu0 %v679_v5, %s617_s27 }
  0x23   : > { %252 = vrot.lane.b32.xlu1 %v225_v6, %s618_s28 }
  0x26   : > { %248 = vrot.lane.b32.xlu0 %v671_v2, %s620_s29 }
  0x27   : > { %242 = vrot.lane.b32.xlu1 %v227_v9, %s621_s30 }
  0x2a   : > { %246 = vrot.lane.b32.xlu0 %v679_v5, %s620_s29 }
  0x2b   : > { %240 = vrot.lane.b32.xlu1 %v225_v6, %s621_s30 }
  0x2e   : > { %236 = vrot.lane.b32.xlu0 %v671_v2, %s622_s5 }
  0x2f   : > { %230 = vrot.lane.b32.xlu1 %v227_v9, %s614_s24 }
  0x32   : > { %234 = vrot.lane.b32.xlu0 %v679_v5, %s622_s5 }
  0x33   : > { %334 = vrot.lane.b32.xlu1 %v667_v0, %s616_s26 }
  0x36   : > { %228 = vrot.lane.b32.xlu0 %v225_v6, %s614_s24 }
  0x3a   : > { %315 = vrot.lane.b32.xlu0 %v685_v8, %s617_s27 }
  0x81   : > { %v284_v11 = vpop.permute.xlu1 %283 }
  0x82   : > { %367 = vmatpush1.msra.mxu0 %v284_v11  ;;  %559 = vmatpush1.msra.mxu1 %v284_v11 }
  0x83   : > { %368 = vmatprep.subr.mxu0 %v619_v10  ;;  %533 = vmatprep.subr.mxu1 %v619_v10 }
  0x84   : > { %v330_v12 = vpop.permute.xlu0 %329  ;;  %369 = vmatpush1.msra.mxu0 %v685_v8  ;;  %560 = vmatpush1.msra.mxu1 %v685_v8 }
  0x85   : > { %338 = vrot.lane.b32.xlu1 %v330_v12, %s616_s26  ;;  %v273_v13 = vpop.permute.xlu1 %272  ;;  %370 = vmatprep.subr.mxu0 %v619_v10 }
  0x86   : > { %534 = vmatprep.subr.mxu1 %v619_v10  ;;  %v323_v14 = vsel %vm224_vm0, %v273_v13, %v674_v3 }
  0x87   : > { %371 = vmatpush1.msra.mxu0 %v323_v14  ;;  %561 = vmatpush1.msra.mxu1 %v323_v14 }
  0x88   : > { %v328_v15 = vpop.permute.xlu0 %327  ;;  %372 = vmatprep.subr.mxu0 %v619_v10  ;;  %535 = vmatprep.subr.mxu1 %v619_v10 }
  0x89   : > { %v332_v16 = vsel %vm224_vm0, %v669_v1, %v328_v15  ;;  %309 = vrot.lane.b32.xlu1 %v669_v1, %s618_s28  ;;  %v267_v17 = vpop.permute.xlu1 %266 }
  0x8a   : > { %336 = vrot.lane.b32.xlu0 %v332_v16, %s616_s26 }
  0x8c   : > { %v271_v18 = vpop.permute.xlu0 %270 }
  0x8d   : > { %307 = vrot.lane.b32.xlu1 %v667_v0, %s618_s28  ;;  %373 = vmatpush1.msra.mxu0 %v271_v18  ;;  %v265_v19 = vpop.permute.xlu1 %264 }
  0x8e   : > { %313 = vrot.lane.b32.xlu0 %v674_v3, %s617_s27  ;;  %562 = vmatpush1.msra.mxu1 %v271_v18 }
  0x8f   : > { %374 = vmatprep.subr.mxu0 %v619_v10  ;;  %536 = vmatprep.subr.mxu1 %v619_v10 }
  0x90   : > { %v261_v20 = vpop.permute.xlu0 %260  ;;  %375 = vmatpush1.msra.mxu0 %v267_v17  ;;  %563 = vmatpush1.msra.mxu1 %v267_v17 }
  0x91   : > { %297 = vrot.lane.b32.xlu1 %v669_v1, %s621_s30  ;;  %376 = vmatprep.subr.mxu0 %v619_v10  ;;  %v322_v21 = vsel %vm224_vm0, %v261_v20, %v265_v19  ;;  %v255_v22 = vpop.permute.xlu1 %254 }
  0x92   : > { %303 = vrot.lane.b32.xlu0 %v685_v8, %s620_s29  ;;  %537 = vmatprep.subr.mxu1 %v619_v10 }
  0x93   : > { %377 = vmatpush1.msra.mxu0 %v322_v21  ;;  %564 = vmatpush1.msra.mxu1 %v322_v21 }
  0x94   : > { %v259_v23 = vpop.permute.xlu0 %258  ;;  %378 = vmatprep.subr.mxu0 %v619_v10  ;;  %538 = vmatprep.subr.mxu1 %v619_v10 }
  0x95   : > { %295 = vrot.lane.b32.xlu1 %v667_v0, %s621_s30  ;;  %379 = vmatpush1.msra.mxu0 %v259_v23  ;;  %v253_v24 = vpop.permute.xlu1 %252 }
  0x96   : > { %301 = vrot.lane.b32.xlu0 %v674_v3, %s620_s29  ;;  %565 = vmatpush1.msra.mxu1 %v259_v23 }
  0x97   : > { %380 = vmatprep.subr.mxu0 %v619_v10  ;;  %539 = vmatprep.subr.mxu1 %v619_v10 }
  0x98   : > { %v249_v25 = vpop.permute.xlu0 %248  ;;  %381 = vmatpush1.msra.mxu0 %v255_v22  ;;  %566 = vmatpush1.msra.mxu1 %v255_v22 }
  0x99   : > { %285 = vrot.lane.b32.xlu1 %v669_v1, %s614_s24  ;;  %382 = vmatprep.subr.mxu0 %v619_v10  ;;  %v321_v26 = vsel %vm224_vm0, %v249_v25, %v253_v24  ;;  %v243_v27 = vpop.permute.xlu1 %242 }
  0x9a   : > { %291 = vrot.lane.b32.xlu0 %v685_v8, %s622_s5  ;;  %540 = vmatprep.subr.mxu1 %v619_v10 }
  0x9b   : > { %383 = vmatpush1.msra.mxu0 %v321_v26  ;;  %567 = vmatpush1.msra.mxu1 %v321_v26 }
  0x9c   : > { %v247_v28 = vpop.permute.xlu0 %246  ;;  %384 = vmatprep.subr.mxu0 %v619_v10  ;;  %541 = vmatprep.subr.mxu1 %v619_v10 }
  0x9d   : > { %385 = vmatpush1.msra.mxu0 %v247_v28  ;;  %568 = vmatpush1.msra.mxu1 %v247_v28  ;;  %v241_v29 = vpop.permute.xlu1 %240 }
  0x9e   : > { %289 = vrot.lane.b32.xlu0 %v674_v3, %s622_s5  ;;  %386 = vmatprep.subr.mxu0 %v619_v10 }
  0x9f   : > { %542 = vmatprep.subr.mxu1 %v619_v10  ;;  %387 = vmatpush1.msra.mxu0 %v243_v27 }
  0xa0   : > { %v237_v31 = vpop.permute.xlu0 %236  ;;  %569 = vmatpush1.msra.mxu1 %v243_v27  ;;  %388 = vmatprep.subr.mxu0 %v619_v10 }
  0xa1   : > { %543 = vmatprep.subr.mxu1 %v619_v10  ;;  %v320_v32 = vsel %vm224_vm0, %v237_v31, %v241_v29  ;;  %v231_v36 = vpop.permute.xlu1 %230  ;;  %351 = vperm.xlu1 %604, %v347_v40  }
  0xa2   : > { %389 = vmatpush1.msra.mxu0 %v320_v32  ;;  %570 = vmatpush1.msra.mxu1 %v320_v32 }
  0xa3   : > { %390 = vmatprep.subr.mxu0 %v619_v10  ;;  %544 = vmatprep.subr.mxu1 %v619_v10 }
  0xa4   : > { %v235_v34 = vpop.permute.xlu0 %234  ;;  %356 = vperm.xlu0 %605, %v348_v37  }
  0xa5   : > { %391 = vmatpush1.msra.mxu0 %v235_v34  ;;  %571 = vmatpush1.msra.mxu1 %v235_v34  ;;  %v335_v41 = vpop.permute.xlu1 %334 }
  0xa6   : > { %392 = vmatprep.subr.mxu0 %v619_v10  ;;  %545 = vmatprep.subr.mxu1 %v619_v10 }
  0xa7   : > { %393 = vmatpush1.msra.mxu0 %v231_v36  ;;  %572 = vmatpush1.msra.mxu1 %v231_v36 }
  0xa8   : > { %v229_v38 = vpop.permute.xlu0 %228  ;;  %394 = vmatprep.subr.mxu0 %v619_v10  ;;  %546 = vmatprep.subr.mxu1 %v619_v10 }
  0xa9   : > { %v319_v39 = vsel %vm224_vm0, %v671_v2, %v229_v38 }
  0xaa   : > { %395 = vmatpush1.msra.mxu0 %v319_v39  ;;  %573 = vmatpush1.msra.mxu1 %v319_v39 }
  0xab   : > { %396 = vmatprep.subr.mxu0 %v619_v10  ;;  %547 = vmatprep.subr.mxu1 %v619_v10 }
  0xac   : > { %397 = vmatpush1.msra.mxu0 %v679_v5  ;;  %574 = vmatpush1.msra.mxu1 %v679_v5  ;;  %v316_v42 = vpop.permute.xlu0 %315 }
  0xad   : > { %408 = vmatprep.subr.mxu0 %v619_v10  ;;  %548 = vmatprep.subr.mxu1 %v619_v10 }
  0xf7   : > { %v339_v43 = vpop.permute.xlu1 %338 }
  0xf8   : > { %409 = vmatpush2.msra.mxu0 %v339_v43  ;;  %575 = vmatpush2.msra.mxu1 %v339_v43 }
  0xf9   : > { %410 = vmatprep.subr.mxu0 %v619_v10  ;;  %549 = vmatprep.subr.mxu1 %v619_v10 }
  0xfb   : > { %v310_v44 = vpop.permute.xlu1 %309 }
  0xfc   : > { %v337_v45 = vpop.permute.xlu0 %336 }
  0xfd   : > { %411 = vmatpush2.msra.mxu0 %v337_v45  ;;  %576 = vmatpush2.msra.mxu1 %v337_v45 }
  0xfe   : > { %412 = vmatprep.subr.mxu0 %v619_v10  ;;  %550 = vmatprep.subr.mxu1 %v619_v10 }
  0xff   : > { %413 = vmatpush2.msra.mxu0 %v335_v41  ;;  %577 = vmatpush2.msra.mxu1 %v335_v41  ;;  %v308_v46 = vpop.permute.xlu1 %307 }
 0x100   : > { %v314_v47 = vpop.permute.xlu0 %313  ;;  %414 = vmatprep.subr.mxu0 %v619_v10  ;;  %551 = vmatprep.subr.mxu1 %v619_v10 }
 0x101   : > { %415 = vmatpush2.msra.mxu0 %v316_v42  ;;  %578 = vmatpush2.msra.mxu1 %v316_v42  ;;  %v326_v48 = vsel %vm224_vm0, %v310_v44, %v314_v47 }
 0x102   : > { %416 = vmatprep.subr.mxu0 %v619_v10  ;;  %552 = vmatprep.subr.mxu1 %v619_v10 }
 0x103   : > { %417 = vmatpush2.msra.mxu0 %v326_v48  ;;  %579 = vmatpush2.msra.mxu1 %v326_v48  ;;  %v298_v49 = vpop.permute.xlu1 %297 }
 0x104   : > { %v304_v50 = vpop.permute.xlu0 %303  ;;  %418 = vmatprep.subr.mxu0 %v619_v10  ;;  %553 = vmatprep.subr.mxu1 %v619_v10 }
 0x105   : > { %419 = vmatpush2.msra.mxu0 %v308_v46  ;;  %580 = vmatpush2.msra.mxu1 %v308_v46 }
 0x106   : > { %420 = vmatprep.subr.mxu0 %v619_v10  ;;  %554 = vmatprep.subr.mxu1 %v619_v10 }
 0x107   : > { %421 = vmatpush2.msra.mxu0 %v304_v50  ;;  %581 = vmatpush2.msra.mxu1 %v304_v50  ;;  %v296_v52 = vpop.permute.xlu1 %295 }
 0x108   : > { %v302_v51 = vpop.permute.xlu0 %301  ;;  %422 = vmatprep.subr.mxu0 %v619_v10  ;;  %555 = vmatprep.subr.mxu1 %v619_v10 }
 0x109   : > { %v325_v53 = vsel %vm224_vm0, %v298_v49, %v302_v51 }
 0x10a   : > { %423 = vmatpush2.msra.mxu0 %v325_v53  ;;  %582 = vmatpush2.msra.mxu1 %v325_v53 }
 0x10b   : > { %424 = vmatprep.subr.mxu0 %v619_v10  ;;  %556 = vmatprep.subr.mxu1 %v619_v10  ;;  %v286_v55 = vpop.permute.xlu1 %285 }
 0x10c   : > { %v292_v54 = vpop.permute.xlu0 %291  ;;  %425 = vmatpush2.msra.mxu0 %v296_v52  ;;  %583 = vmatpush2.msra.mxu1 %v296_v52 }
 0x10d   : > { %426 = vmatprep.subr.mxu0 %v619_v10  ;;  %557 = vmatprep.subr.mxu1 %v619_v10 }
 0x10e   : > { %427 = vmatpush2.msra.mxu0 %v292_v54  ;;  %584 = vmatpush2.msra.mxu1 %v292_v54 }
 0x10f   : > { %428 = vmatprep.subr.mxu0 %v619_v10  ;;  %558 = vmatprep.subr.mxu1 %v619_v10 }
 0x110   : > { %v290_v56 = vpop.permute.xlu0 %289 }
 0x111   : > { %v324_v59 = vsel %vm224_vm0, %v286_v55, %v290_v56 }
 0x112   : > { %429 = vmatpush2.msra.mxu0 %v324_v59  ;;  %585 = vmatpush2.msra.mxu1 %v324_v59 }
 0x113   : > { %431 = vmatmul.mubr.f32.vlgmr.msra.gmra.mxu0 %v343_v57  ;;  %436 = vmatmul.mubr.f32.vlgmr.msra.gmra.mxu1 %v345_v58 }
 0x11c   : > { %v352_v61 = vpop.permute.xlu1 %351 }
 0x11f   : > { %v357_v60 = vpop.permute.xlu0 %356 }
 0x1d3   : > { %v432_v62 = vpop.f32.mrf.mxu0  ;;  %v437_v63 = vpop.f32.mrf.mxu1 }
 0x1d4   : > { %v438_v0 = vadd.f32 %v437_v63, %v357_v60  ;;  %v433_v1 = vadd.f32 %v432_v62, %v352_v61 }
 0x1d5   : > { %v434_v2 = vpop.f32.mrf.mxu0  ;;  %v439_v3 = vpop.f32.mrf.mxu1 }
 0x1d6   : > { %v442_v4 = vmax.f32 %v438_v0, 0.0  ;;  %v441_v5 = vmax.f32 %v433_v1, 0.0 }
 0x1d8   : > { %446 = vst.msk [vmem:[%s217_s22 + $0x8] sm:$0xf] %vm445_vm2, %v442_v4 }
 0x1d9   : > { %444 = vst.msk [vmem:[%s217_s22] sm:$0xff] %vm443_vm3, %v441_v5 }
 0x1da PF: > { %s14_s15 = sadd.s32 1, %s612_s15  }
 0x1db   : > { %p11_p4 = scmp.ge.s32.totalorder %s14_s15, 4  }
 0x1dd   :  { %13 = sbr.rel (!%p11_p4) target bundleno = 1 (0x1), region = 69 }

// kernel: _lambda_.19
= control target key start
LH: loop header
LB: loop body
LE: loop exit
PB: predicated region body
PF: predicated region fallthrough
CT: control target
= control target key end

     0   :  { %s973_s15 = smov 0   ;;  %s1363_s0 = inlined_call_operand.vmem [shape: f32[2,12,342], index: 0, kind: input, shape index: {}]   ;;  %s1364_s1 = inlined_call_operand.vmem [shape: f32[2,12,342], index: 1, kind: input, shape index: {}]   ;;  %s1365_s2 = inlined_call_operand.vmem [shape: f32[3,216], index: 2, kind: input, shape index: {}]   ;;  %s1366_s3 = inlined_call_operand.vmem [shape: f32[3,1], index: 3, kind: input, shape index: {}]   ;;  %s1367_s4 = inlined_call_operand.vmem [shape: f32[2,3,288], index: 4, kind: output, shape index: {}]  }
   0x1 LB: > { %s895_s16 = sadd.s32 4294967295, %s936_s15   ;;  %p899_p0 = scmp.ge.s32.totalorder %s936_s15, 1  ;;  %s936_s15 = sphi %s973_s15, %s14_s15  }
   0x2   : > { %p172_p1 = scmp.lt.s32.totalorder %s936_s15, 3 }
   0x4   : > { %p173_p2 = pnand %p899_p0, %p172_p1 }
   0x5   : > { %p203_p3 = scmp.lt.s32.totalorder (!%p173_p2), %s895_s16, 1  ;;  %s938_s21 = smov (!%p173_p2), 127  }
   0x6   : > { %176 = sbr.rel (%p173_p2) target bundleno = 538 (0x21a), region = 36  ;;  %s940_s25 = smov (!%p173_p2), 90  }
   0x7   : > { %s941_s26 = smov (!%p173_p2), 91   ;;  %s942_s27 = smov (!%p173_p2), 92  }
   0x8   : > { %s943_s28 = smov (!%p173_p2), 108   ;;  %s944_s29 = smov (!%p173_p2), 109  }
   0x9   : > { %s945_s30 = smov (!%p173_p2), 110   ;;  %s946_s5 = smov (!%p173_p2), 126  }
   0xb   : > { %s1369_s16 = smov (!%p203_p3, %s895_s16), 1  ;;  %vm236_vm0 = vcmask 1043456   ;;  %v939_v15 = vmov 0.0   ;;  %vm258_vm1 = vcmask 1039360   ;;  %vm419_vm2 = vcmask 736256  }
   0xc   : > { %s907_s17 = smul.u32 48, %s1369_s16  ;;  %748 = vmatprep.subr.mxu1 %v939_v15  ;;  %vm396_vm3 = vcmask 744448   ;;  %vm373_vm4 = vcmask 752640   ;;  %vm350_vm5 = vcmask 883712   ;;  %vm327_vm6 = vcmask 891904  }
   0xd   : > { %vm674_vm7 = vcmask 719872   ;;  %vm304_vm8 = vcmask 900096   ;;  %vm281_vm9 = vcmask 1031168   ;;  %s908_s10 = smul.u32 12, %s1369_s16  ;;  %vm826_vm10 = vcmask 256000  }
   0xe   : > { %s212_s20 = scalar_lea.vmem %s1364_s1, %s907_s17  ;;  %s207_s24 = scalar_lea.vmem %s1363_s0, %s907_s17 }
   0xf   : > { %v987_v0 = vld [vmem:[%s212_s20 + $0x8] sm:$0xff]  ;;  %v989_v1 = vld [vmem:[%s212_s20 + $0x20] sm:$0xf]  ;;  %v991_v2 = vld [vmem:[%s212_s20 + $0x10] sm:$0xff]  ;;  %s217_s13 = scalar_lea.vmem %s1367_s4, %s908_s10 }
  0x10   : > { %v994_v3 = vrot.slane %v987_v0, 4  ;;  %v441_v4 = vrot.slane %v989_v1, 4  ;;  %v998_v5 = vrot.slane %v991_v2, 4  ;;  %v1000_v6 = vld [vmem:[%s212_s20 + $0x28] sm:$0xf]  ;;  %v1003_v8 = vld [vmem:[%s212_s20] sm:$0xff] }
  0x11   : > { %v443_v7 = vrot.slane %v1000_v6, 4  ;;  %v1005_v9 = vld [vmem:[%s212_s20 + $0x18] sm:$0xf]  ;;  %v1020_v12 = vrot.slane %v1003_v8, 4  ;;  %v1043_v16 = vld [vmem:[%s207_s24 + $0x20] sm:$0xf] }
  0x12   : > { %609 = vrot.lane.b32.xlu1 %v994_v3, %s938_s21  ;;  %v1011_v10 = vsel %vm236_vm0, %v994_v3, %v441_v4  ;;  %v439_v13 = vrot.slane %v1005_v9, 4  ;;  %v1048_v17 = vld [vmem:[%s207_s24 + $0x18] sm:$0xf]  ;;  %v1050_v18 = vld [vmem:[%s207_s24 + $0x28] sm:$0xf]  ;;  %v1056_v20 = vld [vmem:[%s207_s24 + $0x10] sm:$0xff] }
  0x13   : > { %615 = vrot.lane.b32.xlu0 %v1011_v10, %s938_s21  ;;  %v1017_v11 = vsel %vm236_vm0, %v998_v5, %v443_v7  ;;  %v1052_v19 = vld [vmem:[%s207_s24 + $0x8] sm:$0xff]  ;;  %v242_v22 = vrot.slane %v1043_v16, 4  ;;  %v1063_v24 = vld [vmem:[%s207_s24] sm:$0xff]  ;;  %v239_v25 = vrot.slane %v1056_v20, 4  ;;  %v244_v26 = vrot.slane %v1050_v18, 4 }
  0x14   : > { %v1029_v14 = vsel %vm236_vm0, %v1020_v12, %v439_v13  ;;  %v238_v21 = vrot.slane %v1052_v19, 4  ;;  %v237_v28 = vrot.slane %v1063_v24, 4  ;;  %v240_v29 = vrot.slane %v1048_v17, 4 }
  0x15   : > { %v245_v27 = vsel %vm236_vm0, %v239_v25, %v244_v26 }
  0x16   : > { %611 = vrot.lane.b32.xlu1 %v998_v5, %s938_s21  ;;  %v243_v23 = vsel %vm236_vm0, %v238_v21, %v242_v22  ;;  %v241_v30 = vsel %vm236_vm0, %v237_v28, %v240_v29 }
  0x17   : > { %617 = vrot.lane.b32.xlu0 %v1017_v11, %s938_s21 }
  0x1a   : > { %607 = vrot.lane.b32.xlu1 %v1020_v12, %s938_s21 }
  0x1b   : > { %613 = vrot.lane.b32.xlu0 %v1029_v14, %s938_s21 }
  0x1e   : > { %455 = vrot.lane.b32.xlu1 %v991_v2, %s938_s21 }
  0x1f   : > { %453 = vrot.lane.b32.xlu0 %v987_v0, %s938_s21 }
  0x22   : > { %415 = vrot.lane.b32.xlu1 %v1043_v16, %s940_s25 }
  0x23   : > { %451 = vrot.lane.b32.xlu0 %v1003_v8, %s938_s21 }
  0x26   : > { %413 = vrot.lane.b32.xlu1 %v1048_v17, %s940_s25 }
  0x27   : > { %417 = vrot.lane.b32.xlu0 %v1050_v18, %s940_s25 }
  0x2a   : > { %411 = vrot.lane.b32.xlu1 %v1056_v20, %s940_s25 }
  0x2b   : > { %409 = vrot.lane.b32.xlu0 %v1052_v19, %s940_s25 }
  0x2e   : > { %392 = vrot.lane.b32.xlu1 %v243_v23, %s941_s26 }
  0x2f   : > { %407 = vrot.lane.b32.xlu0 %v1063_v24, %s940_s25 }
  0x32   : > { %369 = vrot.lane.b32.xlu1 %v1043_v16, %s942_s27 }
  0x33   : > { %394 = vrot.lane.b32.xlu0 %v245_v27, %s941_s26 }
  0x36   : > { %386 = vrot.lane.b32.xlu1 %v238_v21, %s941_s26 }
  0x37   : > { %371 = vrot.lane.b32.xlu0 %v1050_v18, %s942_s27 }
  0x3a   : > { %390 = vrot.lane.b32.xlu1 %v241_v30, %s941_s26 }
  0x3b   : > { %388 = vrot.lane.b32.xlu0 %v239_v25, %s941_s26 }
  0x3e   : > { %384 = vrot.lane.b32.xlu1 %v237_v28, %s941_s26 }
  0x3f   : > { %367 = vrot.lane.b32.xlu0 %v1048_v17, %s942_s27 }
  0x42   : > { %365 = vrot.lane.b32.xlu1 %v1056_v20, %s942_s27 }
  0x43   : > { %363 = vrot.lane.b32.xlu0 %v1052_v19, %s942_s27 }
  0x46   : > { %346 = vrot.lane.b32.xlu1 %v243_v23, %s943_s28 }
  0x47   : > { %361 = vrot.lane.b32.xlu0 %v1063_v24, %s942_s27 }
  0x4a   : > { %323 = vrot.lane.b32.xlu1 %v1043_v16, %s944_s29 }
  0x4b   : > { %348 = vrot.lane.b32.xlu0 %v245_v27, %s943_s28 }
  0x4e   : > { %340 = vrot.lane.b32.xlu1 %v238_v21, %s943_s28 }
  0x4f   : > { %325 = vrot.lane.b32.xlu0 %v1050_v18, %s944_s29 }
  0x52   : > { %344 = vrot.lane.b32.xlu1 %v241_v30, %s943_s28 }
  0x53   : > { %342 = vrot.lane.b32.xlu0 %v239_v25, %s943_s28 }
  0x56   : > { %338 = vrot.lane.b32.xlu1 %v237_v28, %s943_s28 }
  0x57   : > { %321 = vrot.lane.b32.xlu0 %v1048_v17, %s944_s29 }
  0x5a   : > { %319 = vrot.lane.b32.xlu1 %v1056_v20, %s944_s29 }
  0x5b   : > { %317 = vrot.lane.b32.xlu0 %v1052_v19, %s944_s29 }
  0x5e   : > { %300 = vrot.lane.b32.xlu1 %v243_v23, %s945_s30 }
  0x5f   : > { %315 = vrot.lane.b32.xlu0 %v1063_v24, %s944_s29 }
  0x62   : > { %277 = vrot.lane.b32.xlu1 %v1043_v16, %s946_s5 }
  0x63   : > { %302 = vrot.lane.b32.xlu0 %v245_v27, %s945_s30 }
  0x66   : > { %294 = vrot.lane.b32.xlu1 %v238_v21, %s945_s30 }
  0x67   : > { %279 = vrot.lane.b32.xlu0 %v1050_v18, %s946_s5 }
  0x6a   : > { %298 = vrot.lane.b32.xlu1 %v241_v30, %s945_s30 }
  0x6b   : > { %296 = vrot.lane.b32.xlu0 %v239_v25, %s945_s30 }
  0x6e   : > { %292 = vrot.lane.b32.xlu1 %v237_v28, %s945_s30 }
  0x6f   : > { %275 = vrot.lane.b32.xlu0 %v1048_v17, %s946_s5 }
  0x72   : > { %273 = vrot.lane.b32.xlu1 %v1056_v20, %s946_s5 }
  0x73   : > { %271 = vrot.lane.b32.xlu0 %v1052_v19, %s946_s5 }
  0x76   : > { %254 = vrot.lane.b32.xlu1 %v243_v23, %s938_s21 }
  0x77   : > { %269 = vrot.lane.b32.xlu0 %v1063_v24, %s946_s5 }
  0x7a   : > { %248 = vrot.lane.b32.xlu1 %v238_v21, %s938_s21 }
  0x7b   : > { %256 = vrot.lane.b32.xlu0 %v245_v27, %s938_s21 }
  0x7e   : > { %252 = vrot.lane.b32.xlu1 %v241_v30, %s938_s21 }
  0x7f   : > { %250 = vrot.lane.b32.xlu0 %v239_v25, %s938_s21 }
  0x82   : > { %634 = vrot.lane.b32.xlu1 %v987_v0, %s941_s26 }
  0x83   : > { %246 = vrot.lane.b32.xlu0 %v237_v28, %s938_s21 }
  0x84   : > { %v610_v31 = vpop.permute.xlu1 %609 }
  0x85   : > { %v616_v32 = vpop.permute.xlu0 %615 }
  0x88   : > { %v612_v33 = vpop.permute.xlu1 %611 }
  0x89   : > { %v618_v34 = vpop.permute.xlu0 %617  ;;  %v628_v35 = vsel %vm236_vm0, %v1000_v6, %v612_v33  ;;  %v620_v36 = vsel %vm258_vm1, %v610_v31, %v612_v33 }
  0x8a   : > { %648 = vrot.lane.b32.xlu0 %v618_v34, %s941_s26  ;;  %642 = vrot.lane.b32.xlu1 %v628_v35, %s941_s26  ;;  %v627_v39 = vsel %vm236_vm0, %v989_v1, %v620_v36  ;;  %v622_v40 = vsel %vm258_vm1, %v616_v32, %v618_v34 }
  0x8c   : > { %v608_v37 = vpop.permute.xlu1 %607 }
  0x8d   : > { %v614_v38 = vpop.permute.xlu0 %613  ;;  %v619_v41 = vsel %vm258_vm1, %v608_v37, %v610_v31 }
  0x8e   : > { %640 = vrot.lane.b32.xlu0 %v627_v39, %s941_s26  ;;  %646 = vrot.lane.b32.xlu1 %v622_v40, %s941_s26  ;;  %v626_v44 = vsel %vm236_vm0, %v1005_v9, %v619_v41  ;;  %v621_v45 = vsel %vm258_vm1, %v614_v38, %v616_v32 }
  0x90   : > { %v456_v42 = vpop.permute.xlu1 %455 }
  0x91   : > { %v454_v43 = vpop.permute.xlu0 %453  ;;  %749 = vmatpush1.msra.mxu1 %v456_v42 }
  0x92   : > { %638 = vrot.lane.b32.xlu0 %v626_v44, %s941_s26  ;;  %644 = vrot.lane.b32.xlu1 %v621_v45, %s941_s26  ;;  %v464_v46 = vsel %vm258_vm1, %v454_v43, %v456_v42 }
  0x93   : > { %677 = vmatprep.subr.mxu0 %v464_v46  ;;  %750 = vmatprep.subr.mxu1 %v939_v15 }
  0x94   : > { %v416_v47 = vpop.permute.xlu1 %415  ;;  %751 = vmatpush1.msra.mxu1 %v1017_v11 }
  0x95   : > { %v452_v48 = vpop.permute.xlu0 %451  ;;  %752 = vmatprep.subr.mxu1 %v939_v15 }
  0x96   : > { %636 = vrot.lane.b32.xlu0 %v991_v2, %s941_s26  ;;  %632 = vrot.lane.b32.xlu1 %v1003_v8, %s941_s26  ;;  %v463_v49 = vsel %vm258_vm1, %v452_v48, %v454_v43 }
  0x97   : > { %678 = vmatpush1.msra.mxu0 %v463_v49 }
  0x98   : > { %v414_v50 = vpop.permute.xlu1 %413  ;;  %679 = vmatprep.subr.mxu0 %v1011_v10 }
  0x99   : > { %v422_v51 = vsel %vm419_vm2, %v414_v50, %v416_v47  ;;  %v418_v52 = vpop.permute.xlu0 %417  ;;  %680 = vmatpush1.msra.mxu0 %v1029_v14 }
  0x9a   : > { %v423_v53 = vsel %vm419_vm2, %v416_v47, %v418_v52  ;;  %569 = vrot.lane.b32.xlu0 %v1011_v10, %s942_s27  ;;  %571 = vrot.lane.b32.xlu1 %v1017_v11, %s942_s27  ;;  %v597_v54 = vsel %vm236_vm0, %v418_v52, %v998_v5  ;;  %v595_v55 = vsel %vm236_vm0, %v422_v51, %v1020_v12 }
  0x9b   : > { %v596_v56 = vsel %vm236_vm0, %v423_v53, %v994_v3  ;;  %753 = vmatpush1.msra.mxu1 %v597_v54 }
  0x9c   : > { %v412_v57 = vpop.permute.xlu1 %411  ;;  %681 = vmatprep.subr.mxu0 %v596_v56  ;;  %754 = vmatprep.subr.mxu1 %v939_v15 }
  0x9d   : > { %v410_v58 = vpop.permute.xlu0 %409  ;;  %682 = vmatpush1.msra.mxu0 %v595_v55  ;;  %755 = vmatpush1.msra.mxu1 %v412_v57 }
  0x9e   : > { %547 = vrot.lane.b32.xlu0 %v989_v1, %s943_s28  ;;  %549 = vrot.lane.b32.xlu1 %v1000_v6, %s943_s28  ;;  %v421_v59 = vsel %vm419_vm2, %v410_v58, %v412_v57  ;;  %v1253_v57 = vld [vmem:[%s1365_s2] sm:$0x77] }
  0x9f   : > { %683 = vmatprep.subr.mxu0 %v421_v59  ;;  %756 = vmatprep.subr.mxu1 %v939_v15 }
  0xa0   : > { %v393_v60 = vpop.permute.xlu1 %392 }
  0xa1   : > { %v408_v61 = vpop.permute.xlu0 %407 }
  0xa2   : > { %563 = vrot.lane.b32.xlu0 %v994_v3, %s942_s27  ;;  %565 = vrot.lane.b32.xlu1 %v998_v5, %s942_s27  ;;  %v420_v62 = vsel %vm419_vm2, %v408_v61, %v410_v58 }
  0xa3   : > { %684 = vmatpush1.msra.mxu0 %v420_v62 }
  0xa4   : > { %v370_v63 = vpop.permute.xlu1 %369 }
  0xa5   : > { %v395_v4 = vpop.permute.xlu0 %394 }
  0xa6   : > { %567 = vrot.lane.b32.xlu0 %v1029_v14, %s942_s27  ;;  %545 = vrot.lane.b32.xlu1 %v1005_v9, %s943_s28  ;;  %v400_v7 = vsel %vm396_vm3, %v393_v60, %v395_v4 }
  0xa7   : > { %757 = vmatpush1.msra.mxu1 %v395_v4  ;;  %685 = vmatprep.subr.mxu0 %v400_v7 }
  0xa8   : > { %v387_v13 = vpop.permute.xlu1 %386  ;;  %758 = vmatprep.subr.mxu1 %v939_v15 }
  0xa9   : > { %v372_v21 = vpop.permute.xlu0 %371 }
  0xaa   : > { %561 = vrot.lane.b32.xlu0 %v1020_v12, %s942_s27  ;;  %541 = vrot.lane.b32.xlu1 %v987_v0, %s943_s28  ;;  %v377_v22 = vsel %vm373_vm4, %v370_v63, %v372_v21 }
  0xac   : > { %v391_v23 = vpop.permute.xlu1 %390 }
  0xad   : > { %v389_v25 = vpop.permute.xlu0 %388  ;;  %v399_v26 = vsel %vm396_vm3, %v391_v23, %v393_v60  ;;  %v947_v60 = vmov 0  }
  0xae   : > { %v398_v27 = vsel %vm396_vm3, %v387_v13, %v389_v25  ;;  %543 = vrot.lane.b32.xlu0 %v991_v2, %s943_s28  ;;  %539 = vrot.lane.b32.xlu1 %v1003_v8, %s943_s28  ;;  %v594_v28 = vsel %vm236_vm0, %v372_v21, %v389_v25 }
  0xaf   : > { %686 = vmatpush1.msra.mxu0 %v399_v26  ;;  %759 = vmatpush1.msra.mxu1 %v594_v28  ;;  %v593_v29 = vsel %vm236_vm0, %v377_v22, %v398_v27 }
  0xb0   : > { %687 = vmatprep.subr.mxu0 %v593_v29  ;;  %v385_v30 = vpop.permute.xlu1 %384  ;;  %760 = vmatprep.subr.mxu1 %v939_v15 }
  0xb1   : > { %v397_v31 = vsel %vm396_vm3, %v385_v30, %v387_v13  ;;  %v368_v32 = vpop.permute.xlu0 %367  ;;  %927 = vset.pattern.permute.xlu1 %v947_v60  ;;  %928 = vset.pattern.permute.xlu0 %v947_v60 }
  0xb2   : > { %v376_v33 = vsel %vm373_vm4, %v368_v32, %v370_v63  ;;  %525 = vrot.lane.b32.xlu0 %v1011_v10, %s944_s29  ;;  %527 = vrot.lane.b32.xlu1 %v1017_v11, %s944_s29 }
  0xb3   : > { %v592_v34 = vsel %vm236_vm0, %v376_v33, %v397_v31 }
  0xb4   : > { %688 = vmatpush1.msra.mxu0 %v592_v34  ;;  %v366_v35 = vpop.permute.xlu1 %365 }
  0xb5   : > { %v364_v36 = vpop.permute.xlu0 %363  ;;  %761 = vmatpush1.msra.mxu1 %v366_v35 }
  0xb6   : > { %503 = vrot.lane.b32.xlu0 %v989_v1, %s945_s30  ;;  %505 = vrot.lane.b32.xlu1 %v1000_v6, %s945_s30  ;;  %v375_v37 = vsel %vm373_vm4, %v364_v36, %v366_v35 }
  0xb7   : > { %689 = vmatprep.subr.mxu0 %v375_v37  ;;  %762 = vmatprep.subr.mxu1 %v939_v15 }
  0xb8   : > { %v347_v38 = vpop.permute.xlu1 %346 }
  0xb9   : > { %v362_v39 = vpop.permute.xlu0 %361 }
  0xba   : > { %519 = vrot.lane.b32.xlu0 %v994_v3, %s944_s29  ;;  %521 = vrot.lane.b32.xlu1 %v998_v5, %s944_s29  ;;  %v374_v40 = vsel %vm373_vm4, %v362_v39, %v364_v36 }
  0xbb   : > { %690 = vmatpush1.msra.mxu0 %v374_v40 }
  0xbc   : > { %v324_v41 = vpop.permute.xlu1 %323 }
  0xbd   : > { %v349_v42 = vpop.permute.xlu0 %348 }
  0xbe   : > { %523 = vrot.lane.b32.xlu0 %v1029_v14, %s944_s29  ;;  %501 = vrot.lane.b32.xlu1 %v1005_v9, %s945_s30  ;;  %v354_v43 = vsel %vm350_vm5, %v347_v38, %v349_v42 }
  0xbf   : > { %763 = vmatpush1.msra.mxu1 %v349_v42  ;;  %691 = vmatprep.subr.mxu0 %v354_v43 }
  0xc0   : > { %v341_v44 = vpop.permute.xlu1 %340  ;;  %764 = vmatprep.subr.mxu1 %v939_v15 }
  0xc1   : > { %v326_v45 = vpop.permute.xlu0 %325 }
  0xc2   : > { %517 = vrot.lane.b32.xlu0 %v1020_v12, %s944_s29  ;;  %497 = vrot.lane.b32.xlu1 %v987_v0, %s945_s30  ;;  %v331_v46 = vsel %vm327_vm6, %v324_v41, %v326_v45 }
  0xc4   : > { %v345_v47 = vpop.permute.xlu1 %344 }
  0xc5   : > { %v343_v48 = vpop.permute.xlu0 %342  ;;  %v353_v49 = vsel %vm350_vm5, %v345_v47, %v347_v38 }
  0xc6   : > { %v352_v50 = vsel %vm350_vm5, %v341_v44, %v343_v48  ;;  %499 = vrot.lane.b32.xlu0 %v991_v2, %s945_s30  ;;  %495 = vrot.lane.b32.xlu1 %v1003_v8, %s945_s30  ;;  %v591_v51 = vsel %vm236_vm0, %v326_v45, %v343_v48 }
  0xc7   : > { %692 = vmatpush1.msra.mxu0 %v353_v49  ;;  %765 = vmatpush1.msra.mxu1 %v591_v51  ;;  %v590_v0 = vsel %vm236_vm0, %v331_v46, %v352_v50 }
  0xc8   : > { %693 = vmatprep.subr.mxu0 %v590_v0  ;;  %v339_v52 = vpop.permute.xlu1 %338  ;;  %766 = vmatprep.subr.mxu1 %v939_v15 }
  0xc9   : > { %v351_v53 = vsel %vm350_vm5, %v339_v52, %v341_v44  ;;  %v322_v54 = vpop.permute.xlu0 %321 }
  0xca   : > { %v330_v55 = vsel %vm327_vm6, %v322_v54, %v324_v41  ;;  %481 = vrot.lane.b32.xlu0 %v1011_v10, %s946_s5  ;;  %483 = vrot.lane.b32.xlu1 %v1017_v11, %s946_s5  ;;  %v673_v11 = vcombine.high %v1253_v57, %v1253_v57 }
  0xcb   : > { %v589_v2 = vsel %vm236_vm0, %v330_v55, %v351_v53 }
  0xcc   : > { %694 = vmatpush1.msra.mxu0 %v589_v2  ;;  %v320_v8 = vpop.permute.xlu1 %319  ;;  %903 = vmatprep.mubr.msk.f32.mxu0 %vm674_vm7, %v673_v11 }
  0xcd   : > { %v318_v56 = vpop.permute.xlu0 %317  ;;  %767 = vmatpush1.msra.mxu1 %v320_v8  ;;  %904 = vmatprep.mubr.msk.f32.mxu1 %vm674_vm7, %v673_v11 }
  0xce   : > { %459 = vrot.lane.b32.xlu0 %v989_v1, %s938_s21  ;;  %461 = vrot.lane.b32.xlu1 %v1000_v6, %s938_s21  ;;  %v329_v10 = vsel %vm327_vm6, %v318_v56, %v320_v8 }
  0xcf   : > { %695 = vmatprep.subr.mxu0 %v329_v10  ;;  %768 = vmatprep.subr.mxu1 %v939_v15 }
  0xd0   : > { %v301_v58 = vpop.permute.xlu1 %300 }
  0xd1   : > { %v316_v59 = vpop.permute.xlu0 %315 }
  0xd2   : > { %475 = vrot.lane.b32.xlu0 %v994_v3, %s946_s5  ;;  %477 = vrot.lane.b32.xlu1 %v998_v5, %s946_s5  ;;  %v328_v1 = vsel %vm327_vm6, %v316_v59, %v318_v56  ;;  %v666_v3 = vld [vmem:[%s1366_s3] sm:$0x7] }
  0xd3   : > { %696 = vmatpush1.msra.mxu0 %v328_v1 }
  0xd4   : > { %v278_v6 = vpop.permute.xlu1 %277 }
  0xd5   : > { %v303_v61 = vpop.permute.xlu0 %302 }
  0xd6   : > { %479 = vrot.lane.b32.xlu0 %v1029_v14, %s946_s5  ;;  %457 = vrot.lane.b32.xlu1 %v1005_v9, %s938_s21  ;;  %v308_v62 = vsel %vm304_vm8, %v301_v58, %v303_v61 }
  0xd7   : > { %769 = vmatpush1.msra.mxu1 %v303_v61  ;;  %697 = vmatprep.subr.mxu0 %v308_v62 }
  0xd8   : > { %v295_v5 = vpop.permute.xlu1 %294  ;;  %770 = vmatprep.subr.mxu1 %v939_v15 }
  0xd9   : > { %v280_v63 = vpop.permute.xlu0 %279 }
  0xda   : > { %473 = vrot.lane.b32.xlu0 %v1020_v12, %s946_s5  ;;  %669 = vperm.xlu1 %927, %v666_v3   ;;  %v285_v14 = vsel %vm281_vm9, %v278_v6, %v280_v63 }
  0xdc   : > { %v299_v9 = vpop.permute.xlu1 %298 }
  0xdd   : > { %v297_v4 = vpop.permute.xlu0 %296  ;;  %v307_v7 = vsel %vm304_vm8, %v299_v9, %v301_v58 }
  0xde   : > { %v306_v13 = vsel %vm304_vm8, %v295_v5, %v297_v4  ;;  %698 = vmatpush1.msra.mxu0 %v307_v7  ;;  %v588_v21 = vsel %vm236_vm0, %v280_v63, %v297_v4 }
  0xdf   : > { %771 = vmatpush1.msra.mxu1 %v588_v21  ;;  %v587_v22 = vsel %vm236_vm0, %v285_v14, %v306_v13 }
  0xe0   : > { %699 = vmatprep.subr.mxu0 %v587_v22  ;;  %v293_v23 = vpop.permute.xlu1 %292  ;;  %772 = vmatprep.subr.mxu1 %v939_v15 }
  0xe1   : > { %v305_v12 = vsel %vm304_vm8, %v293_v23, %v295_v5  ;;  %v276_v25 = vpop.permute.xlu0 %275 }
  0xe2   : > { %v284_v26 = vsel %vm281_vm9, %v276_v25, %v278_v6 }
  0xe3   : > { %v586_v27 = vsel %vm236_vm0, %v284_v26, %v305_v12 }
  0xe4   : > { %700 = vmatpush1.msra.mxu0 %v586_v27  ;;  %v274_v28 = vpop.permute.xlu1 %273 }
  0xe5   : > { %v272_v29 = vpop.permute.xlu0 %271  ;;  %773 = vmatpush1.msra.mxu1 %v274_v28 }
  0xe6   : > { %v283_v30 = vsel %vm281_vm9, %v272_v29, %v274_v28  ;;  %774 = vmatprep.subr.mxu1 %v939_v15 }
  0xe7   : > { %701 = vmatprep.subr.mxu0 %v283_v30 }
  0xe8   : > { %v255_v31 = vpop.permute.xlu1 %254 }
  0xe9   : > { %v270_v32 = vpop.permute.xlu0 %269 }
  0xea   : > { %v282_v33 = vsel %vm281_vm9, %v270_v32, %v272_v29 }
  0xeb   : > { %702 = vmatpush1.msra.mxu0 %v282_v33 }
  0xec   : > { %v249_v34 = vpop.permute.xlu1 %248 }
  0xed   : > { %v257_v35 = vpop.permute.xlu0 %256 }
  0xee   : > { %v262_v36 = vsel %vm258_vm1, %v255_v31, %v257_v35  ;;  %775 = vmatpush1.msra.mxu1 %v257_v35 }
  0xef   : > { %703 = vmatprep.subr.mxu0 %v262_v36  ;;  %776 = vmatprep.subr.mxu1 %v939_v15 }
  0xf0   : > { %v253_v37 = vpop.permute.xlu1 %252 }
  0xf1   : > { %v251_v38 = vpop.permute.xlu0 %250  ;;  %v261_v39 = vsel %vm258_vm1, %v253_v37, %v255_v31 }
  0xf2   : > { %v260_v40 = vsel %vm258_vm1, %v249_v34, %v251_v38  ;;  %704 = vmatpush1.msra.mxu0 %v261_v39  ;;  %v585_v41 = vsel %vm236_vm0, %v1050_v18, %v251_v38 }
  0xf3   : > { %777 = vmatpush1.msra.mxu1 %v585_v41  ;;  %v584_v42 = vsel %vm236_vm0, %v1043_v16, %v260_v40 }
  0xf4   : > { %705 = vmatprep.subr.mxu0 %v584_v42  ;;  %778 = vmatprep.subr.mxu1 %v939_v15  ;;  %v635_v45 = vpop.permute.xlu1 %634 }
  0xf5   : > { %v247_v43 = vpop.permute.xlu0 %246  ;;  %779 = vmatpush1.msra.mxu1 %v1056_v20 }
  0xf6   : > { %v259_v44 = vsel %vm258_vm1, %v247_v43, %v249_v34  ;;  %790 = vmatprep.subr.mxu1 %v939_v15 }
  0xf7   : > { %v583_v46 = vsel %vm236_vm0, %v1048_v17, %v259_v44 }
  0xf8   : > { %706 = vmatpush1.msra.mxu0 %v583_v46 }
  0xf9   : > { %707 = vmatprep.subr.mxu0 %v1052_v19 }
  0xfa   : > { %708 = vmatpush1.msra.mxu0 %v1063_v24 }
  0xfc   : > { %v649_v16 = vpop.permute.xlu0 %648  ;;  %v643_v18 = vpop.permute.xlu1 %642 }
  0xfd   : > { %791 = vmatpush2.msra.mxu1 %v649_v16 }
  0xfe   : > { %792 = vmatprep.subr.mxu1 %v939_v15 }
  0xff   : > { %793 = vmatpush2.msra.mxu1 %v643_v18 }
 0x100   : > { %v641_v20 = vpop.permute.xlu0 %640  ;;  %v647_v47 = vpop.permute.xlu1 %646  ;;  %794 = vmatprep.subr.mxu1 %v939_v15 }
 0x101   : > { %v655_v48 = vsel %vm396_vm3, %v647_v47, %v649_v16  ;;  %v653_v19 = vsel %vm396_vm3, %v641_v20, %v643_v18 }
 0x102   : > { %719 = vmatprep.subr.mxu0 %v655_v48 }
 0x104   : > { %v639_v49 = vpop.permute.xlu0 %638  ;;  %v645_v17 = vpop.permute.xlu1 %644 }
 0x105   : > { %v654_v50 = vsel %vm396_vm3, %v645_v17, %v647_v47  ;;  %v652_v24 = vsel %vm396_vm3, %v639_v49, %v641_v20 }
 0x106   : > { %720 = vmatpush2.msra.mxu0 %v654_v50 }
 0x107   : > { %721 = vmatprep.subr.mxu0 %v653_v19 }
 0x108   : > { %v637_v51 = vpop.permute.xlu0 %636  ;;  %722 = vmatpush2.msra.mxu0 %v652_v24  ;;  %v633_v0 = vpop.permute.xlu1 %632 }
 0x109   : > { %795 = vmatpush2.msra.mxu1 %v637_v51  ;;  %v651_v52 = vsel %vm396_vm3, %v635_v45, %v637_v51  ;;  %v650_v53 = vsel %vm396_vm3, %v633_v0, %v635_v45 }
 0x10a   : > { %723 = vmatprep.subr.mxu0 %v651_v52  ;;  %796 = vmatprep.subr.mxu1 %v939_v15 }
 0x10b   : > { %724 = vmatpush2.msra.mxu0 %v650_v53 }
 0x10c   : > { %v570_v54 = vpop.permute.xlu0 %569  ;;  %v572_v55 = vpop.permute.xlu1 %571 }
 0x10d   : > { %v576_v2 = vsel %vm373_vm4, %v570_v54, %v572_v55  ;;  %797 = vmatpush2.msra.mxu1 %v572_v55 }
 0x10e   : > { %725 = vmatprep.subr.mxu0 %v576_v2  ;;  %798 = vmatprep.subr.mxu1 %v939_v15 }
 0x110   : > { %v548_v8 = vpop.permute.xlu0 %547  ;;  %v550_v56 = vpop.permute.xlu1 %549 }
 0x111   : > { %v554_v6 = vsel %vm350_vm5, %v548_v8, %v550_v56 }
 0x114   : > { %v564_v10 = vpop.permute.xlu0 %563  ;;  %v566_v11 = vpop.permute.xlu1 %565 }
 0x115   : > { %v606_v58 = vsel %vm236_vm0, %v550_v56, %v566_v11  ;;  %v574_v59 = vsel %vm373_vm4, %v564_v10, %v566_v11 }
 0x116   : > { %799 = vmatpush2.msra.mxu1 %v606_v58  ;;  %v605_v62 = vsel %vm236_vm0, %v554_v6, %v574_v59 }
 0x117   : > { %800 = vmatprep.subr.mxu1 %v939_v15 }
 0x118   : > { %v568_v60 = vpop.permute.xlu0 %567  ;;  %v546_v1 = vpop.permute.xlu1 %545 }
 0x119   : > { %v575_v61 = vsel %vm373_vm4, %v568_v60, %v570_v54  ;;  %v553_v63 = vsel %vm350_vm5, %v546_v1, %v548_v8 }
 0x11a   : > { %726 = vmatpush2.msra.mxu0 %v575_v61 }
 0x11b   : > { %727 = vmatprep.subr.mxu0 %v605_v62 }
 0x11c   : > { %v562_v3 = vpop.permute.xlu0 %561  ;;  %v542_v5 = vpop.permute.xlu1 %541 }
 0x11d   : > { %v573_v14 = vsel %vm373_vm4, %v562_v3, %v564_v10 }
 0x11e   : > { %v604_v9 = vsel %vm236_vm0, %v553_v63, %v573_v14 }
 0x11f   : > { %728 = vmatpush2.msra.mxu0 %v604_v9 }
 0x120   : > { %v544_v4 = vpop.permute.xlu0 %543  ;;  %v540_v7 = vpop.permute.xlu1 %539 }
 0x121   : > { %801 = vmatpush2.msra.mxu1 %v544_v4  ;;  %v552_v13 = vsel %vm350_vm5, %v542_v5, %v544_v4  ;;  %v551_v21 = vsel %vm350_vm5, %v540_v7, %v542_v5 }
 0x122   : > { %729 = vmatprep.subr.mxu0 %v552_v13  ;;  %802 = vmatprep.subr.mxu1 %v939_v15 }
 0x123   : > { %730 = vmatpush2.msra.mxu0 %v551_v21 }
 0x124   : > { %v526_v22 = vpop.permute.xlu0 %525  ;;  %v528_v23 = vpop.permute.xlu1 %527 }
 0x125   : > { %v532_v12 = vsel %vm327_vm6, %v526_v22, %v528_v23  ;;  %803 = vmatpush2.msra.mxu1 %v528_v23 }
 0x126   : > { %731 = vmatprep.subr.mxu0 %v532_v12  ;;  %804 = vmatprep.subr.mxu1 %v939_v15 }
 0x128   : > { %v504_v25 = vpop.permute.xlu0 %503  ;;  %v506_v26 = vpop.permute.xlu1 %505 }
 0x129   : > { %v510_v33 = vsel %vm304_vm8, %v504_v25, %v506_v26 }
 0x12c   : > { %v520_v27 = vpop.permute.xlu0 %519  ;;  %v522_v28 = vpop.permute.xlu1 %521 }
 0x12d   : > { %v603_v29 = vsel %vm236_vm0, %v506_v26, %v522_v28  ;;  %v530_v30 = vsel %vm327_vm6, %v520_v27, %v522_v28 }
 0x12e   : > { %805 = vmatpush2.msra.mxu1 %v603_v29  ;;  %v602_v35 = vsel %vm236_vm0, %v510_v33, %v530_v30 }
 0x12f   : > { %806 = vmatprep.subr.mxu1 %v939_v15 }
 0x130   : > { %v524_v31 = vpop.permute.xlu0 %523  ;;  %v502_v32 = vpop.permute.xlu1 %501 }
 0x131   : > { %v531_v34 = vsel %vm327_vm6, %v524_v31, %v526_v22  ;;  %v509_v38 = vsel %vm304_vm8, %v502_v32, %v504_v25 }
 0x132   : > { %732 = vmatpush2.msra.mxu0 %v531_v34 }
 0x133   : > { %733 = vmatprep.subr.mxu0 %v602_v35 }
 0x134   : > { %v518_v36 = vpop.permute.xlu0 %517  ;;  %v498_v37 = vpop.permute.xlu1 %497 }
 0x135   : > { %v529_v39 = vsel %vm327_vm6, %v518_v36, %v520_v27 }
 0x136   : > { %v601_v40 = vsel %vm236_vm0, %v509_v38, %v529_v39 }
 0x137   : > { %734 = vmatpush2.msra.mxu0 %v601_v40 }
 0x138   : > { %v500_v41 = vpop.permute.xlu0 %499  ;;  %v496_v42 = vpop.permute.xlu1 %495 }
 0x139   : > { %807 = vmatpush2.msra.mxu1 %v500_v41  ;;  %v508_v43 = vsel %vm304_vm8, %v498_v37, %v500_v41  ;;  %v507_v44 = vsel %vm304_vm8, %v496_v42, %v498_v37 }
 0x13a   : > { %735 = vmatprep.subr.mxu0 %v508_v43  ;;  %808 = vmatprep.subr.mxu1 %v939_v15 }
 0x13b   : > { %736 = vmatpush2.msra.mxu0 %v507_v44 }
 0x13c   : > { %v482_v45 = vpop.permute.xlu0 %481  ;;  %v484_v46 = vpop.permute.xlu1 %483 }
 0x13d   : > { %v488_v16 = vsel %vm281_vm9, %v482_v45, %v484_v46  ;;  %809 = vmatpush2.msra.mxu1 %v484_v46 }
 0x13e   : > { %737 = vmatprep.subr.mxu0 %v488_v16  ;;  %810 = vmatprep.subr.mxu1 %v939_v15 }
 0x140   : > { %v460_v18 = vpop.permute.xlu0 %459  ;;  %v462_v20 = vpop.permute.xlu1 %461 }
 0x141   : > { %v466_v19 = vsel %vm258_vm1, %v460_v18, %v462_v20 }
 0x144   : > { %v476_v47 = vpop.permute.xlu0 %475  ;;  %v478_v48 = vpop.permute.xlu1 %477 }
 0x145   : > { %v600_v49 = vsel %vm236_vm0, %v462_v20, %v478_v48  ;;  %v486_v17 = vsel %vm281_vm9, %v476_v47, %v478_v48 }
 0x146   : > { %811 = vmatpush2.msra.mxu1 %v600_v49  ;;  %v599_v15 = vsel %vm236_vm0, %v466_v19, %v486_v17 }
 0x147   : > { %813 = vmatmul.mubr.f32.vlgmr.msra.gmra.mxu1 %v1253_v57 }
 0x148   : > { %v480_v50 = vpop.permute.xlu0 %479  ;;  %v458_v51 = vpop.permute.xlu1 %457 }
 0x149   : > { %v487_v24 = vsel %vm281_vm9, %v480_v50, %v482_v45  ;;  %v465_v52 = vsel %vm258_vm1, %v458_v51, %v460_v18 }
 0x14a   : > { %738 = vmatpush2.msra.mxu0 %v487_v24 }
 0x14b   : > { %739 = vmatprep.subr.mxu0 %v599_v15 }
 0x14c   : > { %v474_v0 = vpop.permute.xlu0 %473 }
 0x14d   : > { %v485_v53 = vsel %vm281_vm9, %v474_v0, %v476_v47 }
 0x14e   : > { %v598_v54 = vsel %vm236_vm0, %v465_v52, %v485_v53 }
 0x14f   : > { %740 = vmatpush2.msra.mxu0 %v598_v54 }
 0x150   : > { %742 = vmatmul.mubr.f32.vlgmr.msra.gmra.mxu0 %v1253_v57 }
 0x155   : > { %v670_v55 = vpop.permute.xlu1 %669 }
 0x207   : > { %v814_v2 = vpop.f32.mrf.mxu1 }
 0x208   : > { %v815_v8 = vadd.f32 %v814_v2, %v670_v55 }
 0x209   : > { %v816_v56 = vpop.f32.mrf.mxu1 }
 0x20a   : > { %v820_v10 = vmax.f32 %v815_v8, 0.0 }
 0x20c   : > { %827 = vst.msk [vmem:[%s217_s13 + $0x8] sm:$0x7] %vm826_vm10, %v820_v10 }
 0x210   : > { %v743_v11 = vpop.f32.mrf.mxu0 }
 0x211   : > { %v744_v58 = vadd.f32 %v743_v11, %v670_v55 }
 0x212   : > { %v745_v59 = vpop.f32.mrf.mxu0 }
 0x213   : > { %v746_v60 = vadd.f32 %v745_v59, %v670_v55  ;;  %v818_v1 = vmax.f32 %v744_v58, 0.0 }
 0x215   : > { %v819_v6 = vmax.f32 %v746_v60, 0.0 }
 0x217   : > { %v823_v61 = vcombine.low %v818_v1, %v819_v6 }
 0x219   : > { %825 = vst [vmem:[%s217_s13] sm:$0x77] %v823_v61 }
 0x21a PF: > { %s14_s15 = sadd.s32 1, %s936_s15  }
 0x21b   : > { %p11_p4 = scmp.ge.s32.totalorder %s14_s15, 4  }
 0x21d   :  { %13 = sbr.rel (!%p11_p4) target bundleno = 1 (0x1), region = 69 }

</bundles_post_ra>
